<compile_context>
chip_gen: v7x
topology: tpu7x:2x2x1
jax: 0.10.0
libtpu: 0.0.40
codegen_flags: <defaults>
</compile_context>

<pallas_src>
import functools

import jax
import jax.numpy as jnp
from jax.experimental import pallas as pl
from jax.experimental.pallas import tpu as pltpu


# ----------------------------------------------------------------------------
# Fused Pallas kernel: one invocation == the whole model forward pass
# ----------------------------------------------------------------------------

def _fused_forward_kernel(
    x_ref, in_w_ref, in_b_ref,
    wq_ref, wk_ref, wv_ref, bq_ref, bk_ref, bv_ref,
    wo_ref, bo_ref,
    w1_ref, bf1_ref, w2_ref, bf2_ref,
    g1_ref, b1_ref, g2_ref, b2_ref,
    out_w_ref, out_b_ref,
    o_ref,
    *, num_layers, num_heads, seq_len, batch, eps):

    def mm(a, b):
        return jnp.dot(a, b, preferred_element_type=jnp.float32)

    def mm_nt(a, b):
        # a @ b.T without materializing a transpose (contract on last dims).
        return jax.lax.dot_general(
            a, b, (((1,), (1,)), ((), ())),
            preferred_element_type=jnp.float32)

    def layer_norm(y, gamma, beta):
        mu = jnp.mean(y, axis=-1, keepdims=True)
        yc = y - mu
        var = jnp.mean(yc * yc, axis=-1, keepdims=True)
        return yc * jax.lax.rsqrt(var + eps) * gamma + beta

    # Input projection over all B*S rows at once (lane-padded input, zero-padded
    # weight rows -> identical result to the unpadded projection).
    h = mm(x_ref[...], in_w_ref[...]) + in_b_ref[...]          # (B*S, D)

    for li in range(num_layers):
        # ---- self-attention block (post-norm) --------------------------------
        # Per-head Q/K/V straight from per-head weight stacks: leading-dim ref
        # indexing is free, no lane extraction of a fused QKV result.
        # (1/sqrt(dh) is already folded into wq at init.)
        head_q = [mm(h, wq_ref[li, hh]) + bq_ref[li, hh] for hh in range(num_heads)]
        head_k = [mm(h, wk_ref[li, hh]) + bk_ref[li, hh] for hh in range(num_heads)]
        head_v = [mm(h, wv_ref[li, hh]) + bv_ref[li, hh] for hh in range(num_heads)]

        seq_rows = []
        for b in range(batch):                 # attention is per-sequence (S, S)
            r0, r1 = b * seq_len, (b + 1) * seq_len
            head_outs = []
            for hh in range(num_heads):
                qh = head_q[hh][r0:r1]         # (S, dh)  sublane-aligned row slice
                kh = head_k[hh][r0:r1]
                vh = head_v[hh][r0:r1]
                s = mm_nt(qh, kh)              # (S, S), scale folded into wq
                m = jnp.max(s, axis=-1, keepdims=True)
                p = jnp.exp(s - m)
                p = p / jnp.sum(p, axis=-1, keepdims=True)   # exact softmax (torch parity)
                head_outs.append(mm(p, vh))    # (S, dh)
            seq_rows.append(jnp.concatenate(head_outs, axis=-1))   # (S, D)
        attn = jnp.concatenate(seq_rows, axis=0)                   # (B*S, D)

        # Single output-projection matmul per layer (not H tiny folded matmuls).
        attn = mm(attn, wo_ref[li]) + bo_ref[li]
        h = layer_norm(h + attn, g1_ref[li], b1_ref[li])           # norm1(x + sa(x))

        # ---- feed-forward block (post-norm) -----------------------------------
        f = jnp.maximum(mm(h, w1_ref[li]) + bf1_ref[li], 0.0)
        f = mm(f, w2_ref[li]) + bf2_ref[li]
        h = layer_norm(h + f, g2_ref[li], b2_ref[li])              # norm2(x + ff(x))

    # Output projection, lane-dense store (padded output width == multiple of 128).
    o_ref[...] = mm(h, out_w_ref[...]) + out_b_ref[...]           # (B*S, Dpad)


# ----------------------------------------------------------------------------
# Parameter initialization (deterministic, synthetic, layer-stacked layout)
# ----------------------------------------------------------------------------

def init_params(key, num_layers, d_model, num_heads, d_feedforward, input_dim):
    dh = d_model // num_heads
    scale = 1.0 / float(dh) ** 0.5
    lane = 128
    din_pad = ((input_dim + lane - 1) // lane) * lane     # lane-dense I/O width

    def dense(k, shape, s=0.05):
        return s * jax.random.normal(k, shape, jnp.float32)

    def split_heads(w):
        # (d_model, d_model) -> (num_heads, d_model, dh): column block per head.
        return jnp.transpose(w.reshape(d_model, num_heads, dh), (1, 0, 2))

    keys = jax.random.split(key, 2 + num_layers)
    wq, wk, wv, wo, w1, w2 = [], [], [], [], [], []
    for li in range(num_layers):
        lk = jax.random.split(keys[2 + li], 6)
        # 1/sqrt(dh) attention scale folded into the per-head Q weights
        # (Q bias is zero here; fold it too if it were nonzero).
        wq.append(split_heads(dense(lk[0], (d_model, d_model))) * scale)
        wk.append(split_heads(dense(lk[1], (d_model, d_model))))
        wv.append(split_heads(dense(lk[2], (d_model, d_model))))
        wo.append(dense(lk[3], (d_model, d_model)))
        w1.append(dense(lk[4], (d_model, d_feedforward)))
        w2.append(dense(lk[5], (d_feedforward, d_model)))

    L = num_layers
    in_w = dense(keys[0], (input_dim, d_model))
    out_w = dense(keys[1], (d_model, input_dim))
    # Zero-padded projections so in/out blocks are lane-dense with identical math.
    in_w_pad = jnp.zeros((din_pad, d_model), jnp.float32).at[:input_dim, :].set(in_w)
    out_w_pad = jnp.zeros((d_model, din_pad), jnp.float32).at[:, :input_dim].set(out_w)

    return {
        "num_heads": num_heads,
        "input_dim": input_dim,
        "in_w_pad": in_w_pad,
        "in_b": jnp.zeros((1, d_model), jnp.float32),
        "out_w_pad": out_w_pad,
        "out_b_pad": jnp.zeros((1, din_pad), jnp.float32),
        # per-head attention projections, stacked over layers
        "wq": jnp.stack(wq), "wk": jnp.stack(wk), "wv": jnp.stack(wv),   # (L,H,D,dh)
        "bq": jnp.zeros((L, num_heads, 1, dh), jnp.float32),
        "bk": jnp.zeros((L, num_heads, 1, dh), jnp.float32),
        "bv": jnp.zeros((L, num_heads, 1, dh), jnp.float32),
        "wo": jnp.stack(wo),                                             # (L,D,D)
        "bo": jnp.zeros((L, 1, d_model), jnp.float32),
        # feed-forward
        "w1": jnp.stack(w1),
        "bf1": jnp.zeros((L, 1, d_feedforward), jnp.float32),
        "w2": jnp.stack(w2),
        "bf2": jnp.zeros((L, 1, d_model), jnp.float32),
        # LayerNorms
        "g1": jnp.ones((L, 1, d_model), jnp.float32),
        "b1": jnp.zeros((L, 1, d_model), jnp.float32),
        "g2": jnp.ones((L, 1, d_model), jnp.float32),
        "b2": jnp.zeros((L, 1, d_model), jnp.float32),
    }


# ----------------------------------------------------------------------------
# Forward pass: one pallas_call for the whole model (batch flattened into rows)
# ----------------------------------------------------------------------------

def graph_transformer_forward(params, x, weights=None, use_weights=False):
    B, S, Din = x.shape
    x = x.astype(jnp.float32)
    if use_weights and weights is not None:
        x = x * weights.astype(jnp.float32)

    H = int(params["num_heads"])
    L = int(params["wq"].shape[0])
    din_pad = int(params["in_w_pad"].shape[0])
    dout_pad = int(params["out_w_pad"].shape[1])
    R = B * S

    # Flatten batch into rows and pad the feature dim to a lane-dense width.
    x2 = x.reshape(R, Din)
    if din_pad > Din:
        x2 = jnp.pad(x2, ((0, 0), (0, din_pad - Din)))

    weight_names = ["in_w_pad", "in_b", "wq", "wk", "wv", "bq", "bk", "bv",
                    "wo", "bo", "w1", "bf1", "w2", "bf2",
                    "g1", "b1", "g2", "b2", "out_w_pad", "out_b_pad"]
    weight_args = [params[n] for n in weight_names]

    def whole(shape):
        zeros = (0,) * len(shape)
        return pl.BlockSpec(shape, lambda i, z=zeros: z)

    kernel = functools.partial(
        _fused_forward_kernel,
        num_layers=L, num_heads=H, seq_len=S, batch=B, eps=1e-5)

    out = pl.pallas_call(
        kernel,
        out_shape=jax.ShapeDtypeStruct((R, dout_pad), jnp.float32),
        grid=(1,),
        in_specs=[whole(x2.shape)] + [whole(a.shape) for a in weight_args],
        out_specs=whole((R, dout_pad)),
        compiler_params=pltpu.CompilerParams(
            dimension_semantics=("arbitrary",)),
    )(x2, *weight_args)

    return out[:, :Din].reshape(B, S, Din)


# ----------------------------------------------------------------------------
# Main
# ----------------------------------------------------------------------------

if __name__ == "__main__":
    num_layers = 2
    d_model = 32
    num_heads = 4
    d_feedforward = 64
    input_dim = 16
    batch, seq = 2, 8

    key = jax.random.PRNGKey(0)
    pkey, xkey = jax.random.split(key)
    params = init_params(pkey, num_layers, d_model, num_heads,
                         d_feedforward, input_dim)
    x = jax.random.normal(xkey, (batch, seq, input_dim), jnp.float32)

    out = graph_transformer_forward(params, x, weights=None, use_weights=False)
    out = jax.block_until_ready(out)

    assert out.shape == (batch, seq, input_dim)
    assert out.dtype == jnp.float32
    assert bool(jnp.all(jnp.isfinite(out)))
    print("KERNEL_OK")
</pallas_src>

<mosaic_0001>
module attributes {stable_mosaic.version = 11 : i64} {
  func.func @_fused_forward_kernel(%arg0: i32, %arg1: memref<16x128xf32, #tpu.memory_space<vmem>>, %arg2: memref<128x32xf32, #tpu.memory_space<vmem>>, %arg3: memref<1x32xf32, #tpu.memory_space<vmem>>, %arg4: memref<2x4x32x8xf32, #tpu.memory_space<vmem>>, %arg5: memref<2x4x32x8xf32, #tpu.memory_space<vmem>>, %arg6: memref<2x4x32x8xf32, #tpu.memory_space<vmem>>, %arg7: memref<2x4x1x8xf32, #tpu.memory_space<vmem>>, %arg8: memref<2x4x1x8xf32, #tpu.memory_space<vmem>>, %arg9: memref<2x4x1x8xf32, #tpu.memory_space<vmem>>, %arg10: memref<2x32x32xf32, #tpu.memory_space<vmem>>, %arg11: memref<2x1x32xf32, #tpu.memory_space<vmem>>, %arg12: memref<2x32x64xf32, #tpu.memory_space<vmem>>, %arg13: memref<2x1x64xf32, #tpu.memory_space<vmem>>, %arg14: memref<2x64x32xf32, #tpu.memory_space<vmem>>, %arg15: memref<2x1x32xf32, #tpu.memory_space<vmem>>, %arg16: memref<2x1x32xf32, #tpu.memory_space<vmem>>, %arg17: memref<2x1x32xf32, #tpu.memory_space<vmem>>, %arg18: memref<2x1x32xf32, #tpu.memory_space<vmem>>, %arg19: memref<2x1x32xf32, #tpu.memory_space<vmem>>, %arg20: memref<32x128xf32, #tpu.memory_space<vmem>>, %arg21: memref<1x128xf32, #tpu.memory_space<vmem>>, %arg22: memref<16x128xf32, #tpu.memory_space<vmem>>) attributes {dimension_semantics = [#tpu.dimension_semantics<arbitrary>], iteration_bounds = array<i64: 1>, scalar_prefetch = 0 : i64, scratch_operands = 0 : i64, tpu.core_type = #tpu.core_type<tc>, window_params = [{pipeline_mode = #tpu.pipeline_mode<synchronous>, transform_indices = @transform_0, window_bounds = array<i64: 16, 128>}, {pipeline_mode = #tpu.pipeline_mode<synchronous>, transform_indices = @transform_1, window_bounds = array<i64: 128, 32>}, {pipeline_mode = #tpu.pipeline_mode<synchronous>, transform_indices = @transform_2, window_bounds = array<i64: 1, 32>}, {pipeline_mode = #tpu.pipeline_mode<synchronous>, transform_indices = @transform_3, window_bounds = array<i64: 2, 4, 32, 8>}, {pipeline_mode = #tpu.pipeline_mode<synchronous>, transform_indices = @transform_4, window_bounds = array<i64: 2, 4, 32, 8>}, {pipeline_mode = #tpu.pipeline_mode<synchronous>, transform_indices = @transform_5, window_bounds = array<i64: 2, 4, 32, 8>}, {pipeline_mode = #tpu.pipeline_mode<synchronous>, transform_indices = @transform_6, window_bounds = array<i64: 2, 4, 1, 8>}, {pipeline_mode = #tpu.pipeline_mode<synchronous>, transform_indices = @transform_7, window_bounds = array<i64: 2, 4, 1, 8>}, {pipeline_mode = #tpu.pipeline_mode<synchronous>, transform_indices = @transform_8, window_bounds = array<i64: 2, 4, 1, 8>}, {pipeline_mode = #tpu.pipeline_mode<synchronous>, transform_indices = @transform_9, window_bounds = array<i64: 2, 32, 32>}, {pipeline_mode = #tpu.pipeline_mode<synchronous>, transform_indices = @transform_10, window_bounds = array<i64: 2, 1, 32>}, {pipeline_mode = #tpu.pipeline_mode<synchronous>, transform_indices = @transform_11, window_bounds = array<i64: 2, 32, 64>}, {pipeline_mode = #tpu.pipeline_mode<synchronous>, transform_indices = @transform_12, window_bounds = array<i64: 2, 1, 64>}, {pipeline_mode = #tpu.pipeline_mode<synchronous>, transform_indices = @transform_13, window_bounds = array<i64: 2, 64, 32>}, {pipeline_mode = #tpu.pipeline_mode<synchronous>, transform_indices = @transform_14, window_bounds = array<i64: 2, 1, 32>}, {pipeline_mode = #tpu.pipeline_mode<synchronous>, transform_indices = @transform_15, window_bounds = array<i64: 2, 1, 32>}, {pipeline_mode = #tpu.pipeline_mode<synchronous>, transform_indices = @transform_16, window_bounds = array<i64: 2, 1, 32>}, {pipeline_mode = #tpu.pipeline_mode<synchronous>, transform_indices = @transform_17, window_bounds = array<i64: 2, 1, 32>}, {pipeline_mode = #tpu.pipeline_mode<synchronous>, transform_indices = @transform_18, window_bounds = array<i64: 2, 1, 32>}, {pipeline_mode = #tpu.pipeline_mode<synchronous>, transform_indices = @transform_19, window_bounds = array<i64: 32, 128>}, {pipeline_mode = #tpu.pipeline_mode<synchronous>, transform_indices = @transform_20, window_bounds = array<i64: 1, 128>}, {pipeline_mode = #tpu.pipeline_mode<synchronous>, transform_indices = @transform_21, window_bounds = array<i64: 16, 128>}]} {
    %c0 = arith.constant 0 : index
    %c0_0 = arith.constant 0 : index
    %0 = vector.load %arg1[%c0, %c0_0] : memref<16x128xf32, #tpu.memory_space<vmem>>, vector<16x128xf32>
    %c0_1 = arith.constant 0 : index
    %c0_2 = arith.constant 0 : index
    %1 = vector.load %arg2[%c0_1, %c0_2] : memref<128x32xf32, #tpu.memory_space<vmem>>, vector<128x32xf32>
    %cst = arith.constant dense<0.000000e+00> : vector<16x32xf32>
    %2 = tpu.matmul %0, %1, %cst {dimension_numbers = #tpu.dot_dimension_numbers<[1], [0], [0], [1], [0, 0, 1, 1], [], []>} : vector<16x128xf32>, vector<128x32xf32>, vector<16x32xf32> -> vector<16x32xf32>
    %c0_3 = arith.constant 0 : index
    %c0_4 = arith.constant 0 : index
    %3 = vector.load %arg3[%c0_3, %c0_4] : memref<1x32xf32, #tpu.memory_space<vmem>>, vector<1x32xf32>
    %4 = vector.broadcast %3 : vector<1x32xf32> to vector<16x32xf32>
    %5 = arith.addf %2, %4 : vector<16x32xf32>
    %c0_5 = arith.constant 0 : index
    %c0_6 = arith.constant 0 : index
    %c0_7 = arith.constant 0 : index
    %c0_8 = arith.constant 0 : index
    %6 = vector.load %arg4[%c0_5, %c0_6, %c0_7, %c0_8] : memref<2x4x32x8xf32, #tpu.memory_space<vmem>>, vector<1x1x32x8xf32>
    %7 = vector.shape_cast %6 : vector<1x1x32x8xf32> to vector<32x8xf32>
    %cst_9 = arith.constant dense<0.000000e+00> : vector<16x8xf32>
    %8 = tpu.matmul %5, %7, %cst_9 {dimension_numbers = #tpu.dot_dimension_numbers<[1], [0], [0], [1], [0, 0, 1, 1], [], []>} : vector<16x32xf32>, vector<32x8xf32>, vector<16x8xf32> -> vector<16x8xf32>
    %c0_10 = arith.constant 0 : index
    %c0_11 = arith.constant 0 : index
    %c0_12 = arith.constant 0 : index
    %c0_13 = arith.constant 0 : index
    %9 = vector.load %arg7[%c0_10, %c0_11, %c0_12, %c0_13] : memref<2x4x1x8xf32, #tpu.memory_space<vmem>>, vector<1x1x1x8xf32>
    %10 = vector.shape_cast %9 : vector<1x1x1x8xf32> to vector<1x8xf32>
    %11 = vector.broadcast %10 : vector<1x8xf32> to vector<16x8xf32>
    %12 = arith.addf %8, %11 : vector<16x8xf32>
    %c0_14 = arith.constant 0 : index
    %c1 = arith.constant 1 : index
    %c0_15 = arith.constant 0 : index
    %c0_16 = arith.constant 0 : index
    %13 = vector.load %arg4[%c0_14, %c1, %c0_15, %c0_16] : memref<2x4x32x8xf32, #tpu.memory_space<vmem>>, vector<1x1x32x8xf32>
    %14 = vector.shape_cast %13 : vector<1x1x32x8xf32> to vector<32x8xf32>
    %cst_17 = arith.constant dense<0.000000e+00> : vector<16x8xf32>
    %15 = tpu.matmul %5, %14, %cst_17 {dimension_numbers = #tpu.dot_dimension_numbers<[1], [0], [0], [1], [0, 0, 1, 1], [], []>} : vector<16x32xf32>, vector<32x8xf32>, vector<16x8xf32> -> vector<16x8xf32>
    %c0_18 = arith.constant 0 : index
    %c1_19 = arith.constant 1 : index
    %c0_20 = arith.constant 0 : index
    %c0_21 = arith.constant 0 : index
    %16 = vector.load %arg7[%c0_18, %c1_19, %c0_20, %c0_21] : memref<2x4x1x8xf32, #tpu.memory_space<vmem>>, vector<1x1x1x8xf32>
    %17 = vector.shape_cast %16 : vector<1x1x1x8xf32> to vector<1x8xf32>
    %18 = vector.broadcast %17 : vector<1x8xf32> to vector<16x8xf32>
    %19 = arith.addf %15, %18 : vector<16x8xf32>
    %c0_22 = arith.constant 0 : index
    %c2 = arith.constant 2 : index
    %c0_23 = arith.constant 0 : index
    %c0_24 = arith.constant 0 : index
    %20 = vector.load %arg4[%c0_22, %c2, %c0_23, %c0_24] : memref<2x4x32x8xf32, #tpu.memory_space<vmem>>, vector<1x1x32x8xf32>
    %21 = vector.shape_cast %20 : vector<1x1x32x8xf32> to vector<32x8xf32>
    %cst_25 = arith.constant dense<0.000000e+00> : vector<16x8xf32>
    %22 = tpu.matmul %5, %21, %cst_25 {dimension_numbers = #tpu.dot_dimension_numbers<[1], [0], [0], [1], [0, 0, 1, 1], [], []>} : vector<16x32xf32>, vector<32x8xf32>, vector<16x8xf32> -> vector<16x8xf32>
    %c0_26 = arith.constant 0 : index
    %c2_27 = arith.constant 2 : index
    %c0_28 = arith.constant 0 : index
    %c0_29 = arith.constant 0 : index
    %23 = vector.load %arg7[%c0_26, %c2_27, %c0_28, %c0_29] : memref<2x4x1x8xf32, #tpu.memory_space<vmem>>, vector<1x1x1x8xf32>
    %24 = vector.shape_cast %23 : vector<1x1x1x8xf32> to vector<1x8xf32>
    %25 = vector.broadcast %24 : vector<1x8xf32> to vector<16x8xf32>
    %26 = arith.addf %22, %25 : vector<16x8xf32>
    %c0_30 = arith.constant 0 : index
    %c3 = arith.constant 3 : index
    %c0_31 = arith.constant 0 : index
    %c0_32 = arith.constant 0 : index
    %27 = vector.load %arg4[%c0_30, %c3, %c0_31, %c0_32] : memref<2x4x32x8xf32, #tpu.memory_space<vmem>>, vector<1x1x32x8xf32>
    %28 = vector.shape_cast %27 : vector<1x1x32x8xf32> to vector<32x8xf32>
    %cst_33 = arith.constant dense<0.000000e+00> : vector<16x8xf32>
    %29 = tpu.matmul %5, %28, %cst_33 {dimension_numbers = #tpu.dot_dimension_numbers<[1], [0], [0], [1], [0, 0, 1, 1], [], []>} : vector<16x32xf32>, vector<32x8xf32>, vector<16x8xf32> -> vector<16x8xf32>
    %c0_34 = arith.constant 0 : index
    %c3_35 = arith.constant 3 : index
    %c0_36 = arith.constant 0 : index
    %c0_37 = arith.constant 0 : index
    %30 = vector.load %arg7[%c0_34, %c3_35, %c0_36, %c0_37] : memref<2x4x1x8xf32, #tpu.memory_space<vmem>>, vector<1x1x1x8xf32>
    %31 = vector.shape_cast %30 : vector<1x1x1x8xf32> to vector<1x8xf32>
    %32 = vector.broadcast %31 : vector<1x8xf32> to vector<16x8xf32>
    %33 = arith.addf %29, %32 : vector<16x8xf32>
    %c0_38 = arith.constant 0 : index
    %c0_39 = arith.constant 0 : index
    %c0_40 = arith.constant 0 : index
    %c0_41 = arith.constant 0 : index
    %34 = vector.load %arg5[%c0_38, %c0_39, %c0_40, %c0_41] : memref<2x4x32x8xf32, #tpu.memory_space<vmem>>, vector<1x1x32x8xf32>
    %35 = vector.shape_cast %34 : vector<1x1x32x8xf32> to vector<32x8xf32>
    %cst_42 = arith.constant dense<0.000000e+00> : vector<16x8xf32>
    %36 = tpu.matmul %5, %35, %cst_42 {dimension_numbers = #tpu.dot_dimension_numbers<[1], [0], [0], [1], [0, 0, 1, 1], [], []>} : vector<16x32xf32>, vector<32x8xf32>, vector<16x8xf32> -> vector<16x8xf32>
    %c0_43 = arith.constant 0 : index
    %c0_44 = arith.constant 0 : index
    %c0_45 = arith.constant 0 : index
    %c0_46 = arith.constant 0 : index
    %37 = vector.load %arg8[%c0_43, %c0_44, %c0_45, %c0_46] : memref<2x4x1x8xf32, #tpu.memory_space<vmem>>, vector<1x1x1x8xf32>
    %38 = vector.shape_cast %37 : vector<1x1x1x8xf32> to vector<1x8xf32>
    %39 = vector.broadcast %38 : vector<1x8xf32> to vector<16x8xf32>
    %40 = arith.addf %36, %39 : vector<16x8xf32>
    %c0_47 = arith.constant 0 : index
    %c1_48 = arith.constant 1 : index
    %c0_49 = arith.constant 0 : index
    %c0_50 = arith.constant 0 : index
    %41 = vector.load %arg5[%c0_47, %c1_48, %c0_49, %c0_50] : memref<2x4x32x8xf32, #tpu.memory_space<vmem>>, vector<1x1x32x8xf32>
    %42 = vector.shape_cast %41 : vector<1x1x32x8xf32> to vector<32x8xf32>
    %cst_51 = arith.constant dense<0.000000e+00> : vector<16x8xf32>
    %43 = tpu.matmul %5, %42, %cst_51 {dimension_numbers = #tpu.dot_dimension_numbers<[1], [0], [0], [1], [0, 0, 1, 1], [], []>} : vector<16x32xf32>, vector<32x8xf32>, vector<16x8xf32> -> vector<16x8xf32>
    %c0_52 = arith.constant 0 : index
    %c1_53 = arith.constant 1 : index
    %c0_54 = arith.constant 0 : index
    %c0_55 = arith.constant 0 : index
    %44 = vector.load %arg8[%c0_52, %c1_53, %c0_54, %c0_55] : memref<2x4x1x8xf32, #tpu.memory_space<vmem>>, vector<1x1x1x8xf32>
    %45 = vector.shape_cast %44 : vector<1x1x1x8xf32> to vector<1x8xf32>
    %46 = vector.broadcast %45 : vector<1x8xf32> to vector<16x8xf32>
    %47 = arith.addf %43, %46 : vector<16x8xf32>
    %c0_56 = arith.constant 0 : index
    %c2_57 = arith.constant 2 : index
    %c0_58 = arith.constant 0 : index
    %c0_59 = arith.constant 0 : index
    %48 = vector.load %arg5[%c0_56, %c2_57, %c0_58, %c0_59] : memref<2x4x32x8xf32, #tpu.memory_space<vmem>>, vector<1x1x32x8xf32>
    %49 = vector.shape_cast %48 : vector<1x1x32x8xf32> to vector<32x8xf32>
    %cst_60 = arith.constant dense<0.000000e+00> : vector<16x8xf32>
    %50 = tpu.matmul %5, %49, %cst_60 {dimension_numbers = #tpu.dot_dimension_numbers<[1], [0], [0], [1], [0, 0, 1, 1], [], []>} : vector<16x32xf32>, vector<32x8xf32>, vector<16x8xf32> -> vector<16x8xf32>
    %c0_61 = arith.constant 0 : index
    %c2_62 = arith.constant 2 : index
    %c0_63 = arith.constant 0 : index
    %c0_64 = arith.constant 0 : index
    %51 = vector.load %arg8[%c0_61, %c2_62, %c0_63, %c0_64] : memref<2x4x1x8xf32, #tpu.memory_space<vmem>>, vector<1x1x1x8xf32>
    %52 = vector.shape_cast %51 : vector<1x1x1x8xf32> to vector<1x8xf32>
    %53 = vector.broadcast %52 : vector<1x8xf32> to vector<16x8xf32>
    %54 = arith.addf %50, %53 : vector<16x8xf32>
    %c0_65 = arith.constant 0 : index
    %c3_66 = arith.constant 3 : index
    %c0_67 = arith.constant 0 : index
    %c0_68 = arith.constant 0 : index
    %55 = vector.load %arg5[%c0_65, %c3_66, %c0_67, %c0_68] : memref<2x4x32x8xf32, #tpu.memory_space<vmem>>, vector<1x1x32x8xf32>
    %56 = vector.shape_cast %55 : vector<1x1x32x8xf32> to vector<32x8xf32>
    %cst_69 = arith.constant dense<0.000000e+00> : vector<16x8xf32>
    %57 = tpu.matmul %5, %56, %cst_69 {dimension_numbers = #tpu.dot_dimension_numbers<[1], [0], [0], [1], [0, 0, 1, 1], [], []>} : vector<16x32xf32>, vector<32x8xf32>, vector<16x8xf32> -> vector<16x8xf32>
    %c0_70 = arith.constant 0 : index
    %c3_71 = arith.constant 3 : index
    %c0_72 = arith.constant 0 : index
    %c0_73 = arith.constant 0 : index
    %58 = vector.load %arg8[%c0_70, %c3_71, %c0_72, %c0_73] : memref<2x4x1x8xf32, #tpu.memory_space<vmem>>, vector<1x1x1x8xf32>
    %59 = vector.shape_cast %58 : vector<1x1x1x8xf32> to vector<1x8xf32>
    %60 = vector.broadcast %59 : vector<1x8xf32> to vector<16x8xf32>
    %61 = arith.addf %57, %60 : vector<16x8xf32>
    %c0_74 = arith.constant 0 : index
    %c0_75 = arith.constant 0 : index
    %c0_76 = arith.constant 0 : index
    %c0_77 = arith.constant 0 : index
    %62 = vector.load %arg6[%c0_74, %c0_75, %c0_76, %c0_77] : memref<2x4x32x8xf32, #tpu.memory_space<vmem>>, vector<1x1x32x8xf32>
    %63 = vector.shape_cast %62 : vector<1x1x32x8xf32> to vector<32x8xf32>
    %cst_78 = arith.constant dense<0.000000e+00> : vector<16x8xf32>
    %64 = tpu.matmul %5, %63, %cst_78 {dimension_numbers = #tpu.dot_dimension_numbers<[1], [0], [0], [1], [0, 0, 1, 1], [], []>} : vector<16x32xf32>, vector<32x8xf32>, vector<16x8xf32> -> vector<16x8xf32>
    %c0_79 = arith.constant 0 : index
    %c0_80 = arith.constant 0 : index
    %c0_81 = arith.constant 0 : index
    %c0_82 = arith.constant 0 : index
    %65 = vector.load %arg9[%c0_79, %c0_80, %c0_81, %c0_82] : memref<2x4x1x8xf32, #tpu.memory_space<vmem>>, vector<1x1x1x8xf32>
    %66 = vector.shape_cast %65 : vector<1x1x1x8xf32> to vector<1x8xf32>
    %67 = vector.broadcast %66 : vector<1x8xf32> to vector<16x8xf32>
    %68 = arith.addf %64, %67 : vector<16x8xf32>
    %c0_83 = arith.constant 0 : index
    %c1_84 = arith.constant 1 : index
    %c0_85 = arith.constant 0 : index
    %c0_86 = arith.constant 0 : index
    %69 = vector.load %arg6[%c0_83, %c1_84, %c0_85, %c0_86] : memref<2x4x32x8xf32, #tpu.memory_space<vmem>>, vector<1x1x32x8xf32>
    %70 = vector.shape_cast %69 : vector<1x1x32x8xf32> to vector<32x8xf32>
    %cst_87 = arith.constant dense<0.000000e+00> : vector<16x8xf32>
    %71 = tpu.matmul %5, %70, %cst_87 {dimension_numbers = #tpu.dot_dimension_numbers<[1], [0], [0], [1], [0, 0, 1, 1], [], []>} : vector<16x32xf32>, vector<32x8xf32>, vector<16x8xf32> -> vector<16x8xf32>
    %c0_88 = arith.constant 0 : index
    %c1_89 = arith.constant 1 : index
    %c0_90 = arith.constant 0 : index
    %c0_91 = arith.constant 0 : index
    %72 = vector.load %arg9[%c0_88, %c1_89, %c0_90, %c0_91] : memref<2x4x1x8xf32, #tpu.memory_space<vmem>>, vector<1x1x1x8xf32>
    %73 = vector.shape_cast %72 : vector<1x1x1x8xf32> to vector<1x8xf32>
    %74 = vector.broadcast %73 : vector<1x8xf32> to vector<16x8xf32>
    %75 = arith.addf %71, %74 : vector<16x8xf32>
    %c0_92 = arith.constant 0 : index
    %c2_93 = arith.constant 2 : index
    %c0_94 = arith.constant 0 : index
    %c0_95 = arith.constant 0 : index
    %76 = vector.load %arg6[%c0_92, %c2_93, %c0_94, %c0_95] : memref<2x4x32x8xf32, #tpu.memory_space<vmem>>, vector<1x1x32x8xf32>
    %77 = vector.shape_cast %76 : vector<1x1x32x8xf32> to vector<32x8xf32>
    %cst_96 = arith.constant dense<0.000000e+00> : vector<16x8xf32>
    %78 = tpu.matmul %5, %77, %cst_96 {dimension_numbers = #tpu.dot_dimension_numbers<[1], [0], [0], [1], [0, 0, 1, 1], [], []>} : vector<16x32xf32>, vector<32x8xf32>, vector<16x8xf32> -> vector<16x8xf32>
    %c0_97 = arith.constant 0 : index
    %c2_98 = arith.constant 2 : index
    %c0_99 = arith.constant 0 : index
    %c0_100 = arith.constant 0 : index
    %79 = vector.load %arg9[%c0_97, %c2_98, %c0_99, %c0_100] : memref<2x4x1x8xf32, #tpu.memory_space<vmem>>, vector<1x1x1x8xf32>
    %80 = vector.shape_cast %79 : vector<1x1x1x8xf32> to vector<1x8xf32>
    %81 = vector.broadcast %80 : vector<1x8xf32> to vector<16x8xf32>
    %82 = arith.addf %78, %81 : vector<16x8xf32>
    %c0_101 = arith.constant 0 : index
    %c3_102 = arith.constant 3 : index
    %c0_103 = arith.constant 0 : index
    %c0_104 = arith.constant 0 : index
    %83 = vector.load %arg6[%c0_101, %c3_102, %c0_103, %c0_104] : memref<2x4x32x8xf32, #tpu.memory_space<vmem>>, vector<1x1x32x8xf32>
    %84 = vector.shape_cast %83 : vector<1x1x32x8xf32> to vector<32x8xf32>
    %cst_105 = arith.constant dense<0.000000e+00> : vector<16x8xf32>
    %85 = tpu.matmul %5, %84, %cst_105 {dimension_numbers = #tpu.dot_dimension_numbers<[1], [0], [0], [1], [0, 0, 1, 1], [], []>} : vector<16x32xf32>, vector<32x8xf32>, vector<16x8xf32> -> vector<16x8xf32>
    %c0_106 = arith.constant 0 : index
    %c3_107 = arith.constant 3 : index
    %c0_108 = arith.constant 0 : index
    %c0_109 = arith.constant 0 : index
    %86 = vector.load %arg9[%c0_106, %c3_107, %c0_108, %c0_109] : memref<2x4x1x8xf32, #tpu.memory_space<vmem>>, vector<1x1x1x8xf32>
    %87 = vector.shape_cast %86 : vector<1x1x1x8xf32> to vector<1x8xf32>
    %88 = vector.broadcast %87 : vector<1x8xf32> to vector<16x8xf32>
    %89 = arith.addf %85, %88 : vector<16x8xf32>
    %90 = vector.extract_strided_slice %12 {offsets = [0, 0], sizes = [8, 8], strides = [1, 1]} : vector<16x8xf32> to vector<8x8xf32>
    %91 = vector.extract_strided_slice %40 {offsets = [0, 0], sizes = [8, 8], strides = [1, 1]} : vector<16x8xf32> to vector<8x8xf32>
    %92 = vector.extract_strided_slice %68 {offsets = [0, 0], sizes = [8, 8], strides = [1, 1]} : vector<16x8xf32> to vector<8x8xf32>
    %cst_110 = arith.constant dense<0.000000e+00> : vector<8x8xf32>
    %93 = tpu.matmul %90, %91, %cst_110 {dimension_numbers = #tpu.dot_dimension_numbers<[1], [1], [0], [0], [0, 0, 1, 0], [], []>} : vector<8x8xf32>, vector<8x8xf32>, vector<8x8xf32> -> vector<8x8xf32>
    %cst_111 = arith.constant dense<0xFF800000> : vector<8xf32>
    %94 = vector.multi_reduction <maximumf>, %93, %cst_111 [1] : vector<8x8xf32> to vector<8xf32>
    %95 = vector.shape_cast %94 : vector<8xf32> to vector<8x1xf32>
    %96 = vector.broadcast %95 : vector<8x1xf32> to vector<8x8xf32>
    %97 = arith.subf %93, %96 : vector<8x8xf32>
    %98 = math.exp %97 : vector<8x8xf32>
    %cst_112 = arith.constant dense<0.000000e+00> : vector<8xf32>
    %99 = vector.multi_reduction <add>, %98, %cst_112 [1] : vector<8x8xf32> to vector<8xf32>
    %100 = vector.shape_cast %99 : vector<8xf32> to vector<8x1xf32>
    %101 = vector.broadcast %100 : vector<8x1xf32> to vector<8x8xf32>
    %102 = arith.divf %98, %101 : vector<8x8xf32>
    %cst_113 = arith.constant dense<0.000000e+00> : vector<8x8xf32>
    %103 = tpu.matmul %102, %92, %cst_113 {dimension_numbers = #tpu.dot_dimension_numbers<[1], [0], [0], [1], [0, 0, 1, 1], [], []>} : vector<8x8xf32>, vector<8x8xf32>, vector<8x8xf32> -> vector<8x8xf32>
    %104 = vector.extract_strided_slice %19 {offsets = [0, 0], sizes = [8, 8], strides = [1, 1]} : vector<16x8xf32> to vector<8x8xf32>
    %105 = vector.extract_strided_slice %47 {offsets = [0, 0], sizes = [8, 8], strides = [1, 1]} : vector<16x8xf32> to vector<8x8xf32>
    %106 = vector.extract_strided_slice %75 {offsets = [0, 0], sizes = [8, 8], strides = [1, 1]} : vector<16x8xf32> to vector<8x8xf32>
    %cst_114 = arith.constant dense<0.000000e+00> : vector<8x8xf32>
    %107 = tpu.matmul %104, %105, %cst_114 {dimension_numbers = #tpu.dot_dimension_numbers<[1], [1], [0], [0], [0, 0, 1, 0], [], []>} : vector<8x8xf32>, vector<8x8xf32>, vector<8x8xf32> -> vector<8x8xf32>
    %cst_115 = arith.constant dense<0xFF800000> : vector<8xf32>
    %108 = vector.multi_reduction <maximumf>, %107, %cst_115 [1] : vector<8x8xf32> to vector<8xf32>
    %109 = vector.shape_cast %108 : vector<8xf32> to vector<8x1xf32>
    %110 = vector.broadcast %109 : vector<8x1xf32> to vector<8x8xf32>
    %111 = arith.subf %107, %110 : vector<8x8xf32>
    %112 = math.exp %111 : vector<8x8xf32>
    %cst_116 = arith.constant dense<0.000000e+00> : vector<8xf32>
    %113 = vector.multi_reduction <add>, %112, %cst_116 [1] : vector<8x8xf32> to vector<8xf32>
    %114 = vector.shape_cast %113 : vector<8xf32> to vector<8x1xf32>
    %115 = vector.broadcast %114 : vector<8x1xf32> to vector<8x8xf32>
    %116 = arith.divf %112, %115 : vector<8x8xf32>
    %cst_117 = arith.constant dense<0.000000e+00> : vector<8x8xf32>
    %117 = tpu.matmul %116, %106, %cst_117 {dimension_numbers = #tpu.dot_dimension_numbers<[1], [0], [0], [1], [0, 0, 1, 1], [], []>} : vector<8x8xf32>, vector<8x8xf32>, vector<8x8xf32> -> vector<8x8xf32>
    %118 = vector.extract_strided_slice %26 {offsets = [0, 0], sizes = [8, 8], strides = [1, 1]} : vector<16x8xf32> to vector<8x8xf32>
    %119 = vector.extract_strided_slice %54 {offsets = [0, 0], sizes = [8, 8], strides = [1, 1]} : vector<16x8xf32> to vector<8x8xf32>
    %120 = vector.extract_strided_slice %82 {offsets = [0, 0], sizes = [8, 8], strides = [1, 1]} : vector<16x8xf32> to vector<8x8xf32>
    %cst_118 = arith.constant dense<0.000000e+00> : vector<8x8xf32>
    %121 = tpu.matmul %118, %119, %cst_118 {dimension_numbers = #tpu.dot_dimension_numbers<[1], [1], [0], [0], [0, 0, 1, 0], [], []>} : vector<8x8xf32>, vector<8x8xf32>, vector<8x8xf32> -> vector<8x8xf32>
    %cst_119 = arith.constant dense<0xFF800000> : vector<8xf32>
    %122 = vector.multi_reduction <maximumf>, %121, %cst_119 [1] : vector<8x8xf32> to vector<8xf32>
    %123 = vector.shape_cast %122 : vector<8xf32> to vector<8x1xf32>
    %124 = vector.broadcast %123 : vector<8x1xf32> to vector<8x8xf32>
    %125 = arith.subf %121, %124 : vector<8x8xf32>
    %126 = math.exp %125 : vector<8x8xf32>
    %cst_120 = arith.constant dense<0.000000e+00> : vector<8xf32>
    %127 = vector.multi_reduction <add>, %126, %cst_120 [1] : vector<8x8xf32> to vector<8xf32>
    %128 = vector.shape_cast %127 : vector<8xf32> to vector<8x1xf32>
    %129 = vector.broadcast %128 : vector<8x1xf32> to vector<8x8xf32>
    %130 = arith.divf %126, %129 : vector<8x8xf32>
    %cst_121 = arith.constant dense<0.000000e+00> : vector<8x8xf32>
    %131 = tpu.matmul %130, %120, %cst_121 {dimension_numbers = #tpu.dot_dimension_numbers<[1], [0], [0], [1], [0, 0, 1, 1], [], []>} : vector<8x8xf32>, vector<8x8xf32>, vector<8x8xf32> -> vector<8x8xf32>
    %132 = vector.extract_strided_slice %33 {offsets = [0, 0], sizes = [8, 8], strides = [1, 1]} : vector<16x8xf32> to vector<8x8xf32>
    %133 = vector.extract_strided_slice %61 {offsets = [0, 0], sizes = [8, 8], strides = [1, 1]} : vector<16x8xf32> to vector<8x8xf32>
    %134 = vector.extract_strided_slice %89 {offsets = [0, 0], sizes = [8, 8], strides = [1, 1]} : vector<16x8xf32> to vector<8x8xf32>
    %cst_122 = arith.constant dense<0.000000e+00> : vector<8x8xf32>
    %135 = tpu.matmul %132, %133, %cst_122 {dimension_numbers = #tpu.dot_dimension_numbers<[1], [1], [0], [0], [0, 0, 1, 0], [], []>} : vector<8x8xf32>, vector<8x8xf32>, vector<8x8xf32> -> vector<8x8xf32>
    %cst_123 = arith.constant dense<0xFF800000> : vector<8xf32>
    %136 = vector.multi_reduction <maximumf>, %135, %cst_123 [1] : vector<8x8xf32> to vector<8xf32>
    %137 = vector.shape_cast %136 : vector<8xf32> to vector<8x1xf32>
    %138 = vector.broadcast %137 : vector<8x1xf32> to vector<8x8xf32>
    %139 = arith.subf %135, %138 : vector<8x8xf32>
    %140 = math.exp %139 : vector<8x8xf32>
    %cst_124 = arith.constant dense<0.000000e+00> : vector<8xf32>
    %141 = vector.multi_reduction <add>, %140, %cst_124 [1] : vector<8x8xf32> to vector<8xf32>
    %142 = vector.shape_cast %141 : vector<8xf32> to vector<8x1xf32>
    %143 = vector.broadcast %142 : vector<8x1xf32> to vector<8x8xf32>
    %144 = arith.divf %140, %143 : vector<8x8xf32>
    %cst_125 = arith.constant dense<0.000000e+00> : vector<8x8xf32>
    %145 = tpu.matmul %144, %134, %cst_125 {dimension_numbers = #tpu.dot_dimension_numbers<[1], [0], [0], [1], [0, 0, 1, 1], [], []>} : vector<8x8xf32>, vector<8x8xf32>, vector<8x8xf32> -> vector<8x8xf32>
    %146 = tpu.concatenate %103, %117, %131, %145 in 1 : vector<8x8xf32>, vector<8x8xf32>, vector<8x8xf32>, vector<8x8xf32> -> vector<8x32xf32>
    %147 = vector.extract_strided_slice %12 {offsets = [8, 0], sizes = [8, 8], strides = [1, 1]} : vector<16x8xf32> to vector<8x8xf32>
    %148 = vector.extract_strided_slice %40 {offsets = [8, 0], sizes = [8, 8], strides = [1, 1]} : vector<16x8xf32> to vector<8x8xf32>
    %149 = vector.extract_strided_slice %68 {offsets = [8, 0], sizes = [8, 8], strides = [1, 1]} : vector<16x8xf32> to vector<8x8xf32>
    %cst_126 = arith.constant dense<0.000000e+00> : vector<8x8xf32>
    %150 = tpu.matmul %147, %148, %cst_126 {dimension_numbers = #tpu.dot_dimension_numbers<[1], [1], [0], [0], [0, 0, 1, 0], [], []>} : vector<8x8xf32>, vector<8x8xf32>, vector<8x8xf32> -> vector<8x8xf32>
    %cst_127 = arith.constant dense<0xFF800000> : vector<8xf32>
    %151 = vector.multi_reduction <maximumf>, %150, %cst_127 [1] : vector<8x8xf32> to vector<8xf32>
    %152 = vector.shape_cast %151 : vector<8xf32> to vector<8x1xf32>
    %153 = vector.broadcast %152 : vector<8x1xf32> to vector<8x8xf32>
    %154 = arith.subf %150, %153 : vector<8x8xf32>
    %155 = math.exp %154 : vector<8x8xf32>
    %cst_128 = arith.constant dense<0.000000e+00> : vector<8xf32>
    %156 = vector.multi_reduction <add>, %155, %cst_128 [1] : vector<8x8xf32> to vector<8xf32>
    %157 = vector.shape_cast %156 : vector<8xf32> to vector<8x1xf32>
    %158 = vector.broadcast %157 : vector<8x1xf32> to vector<8x8xf32>
    %159 = arith.divf %155, %158 : vector<8x8xf32>
    %cst_129 = arith.constant dense<0.000000e+00> : vector<8x8xf32>
    %160 = tpu.matmul %159, %149, %cst_129 {dimension_numbers = #tpu.dot_dimension_numbers<[1], [0], [0], [1], [0, 0, 1, 1], [], []>} : vector<8x8xf32>, vector<8x8xf32>, vector<8x8xf32> -> vector<8x8xf32>
    %161 = vector.extract_strided_slice %19 {offsets = [8, 0], sizes = [8, 8], strides = [1, 1]} : vector<16x8xf32> to vector<8x8xf32>
    %162 = vector.extract_strided_slice %47 {offsets = [8, 0], sizes = [8, 8], strides = [1, 1]} : vector<16x8xf32> to vector<8x8xf32>
    %163 = vector.extract_strided_slice %75 {offsets = [8, 0], sizes = [8, 8], strides = [1, 1]} : vector<16x8xf32> to vector<8x8xf32>
    %cst_130 = arith.constant dense<0.000000e+00> : vector<8x8xf32>
    %164 = tpu.matmul %161, %162, %cst_130 {dimension_numbers = #tpu.dot_dimension_numbers<[1], [1], [0], [0], [0, 0, 1, 0], [], []>} : vector<8x8xf32>, vector<8x8xf32>, vector<8x8xf32> -> vector<8x8xf32>
    %cst_131 = arith.constant dense<0xFF800000> : vector<8xf32>
    %165 = vector.multi_reduction <maximumf>, %164, %cst_131 [1] : vector<8x8xf32> to vector<8xf32>
    %166 = vector.shape_cast %165 : vector<8xf32> to vector<8x1xf32>
    %167 = vector.broadcast %166 : vector<8x1xf32> to vector<8x8xf32>
    %168 = arith.subf %164, %167 : vector<8x8xf32>
    %169 = math.exp %168 : vector<8x8xf32>
    %cst_132 = arith.constant dense<0.000000e+00> : vector<8xf32>
    %170 = vector.multi_reduction <add>, %169, %cst_132 [1] : vector<8x8xf32> to vector<8xf32>
    %171 = vector.shape_cast %170 : vector<8xf32> to vector<8x1xf32>
    %172 = vector.broadcast %171 : vector<8x1xf32> to vector<8x8xf32>
    %173 = arith.divf %169, %172 : vector<8x8xf32>
    %cst_133 = arith.constant dense<0.000000e+00> : vector<8x8xf32>
    %174 = tpu.matmul %173, %163, %cst_133 {dimension_numbers = #tpu.dot_dimension_numbers<[1], [0], [0], [1], [0, 0, 1, 1], [], []>} : vector<8x8xf32>, vector<8x8xf32>, vector<8x8xf32> -> vector<8x8xf32>
    %175 = vector.extract_strided_slice %26 {offsets = [8, 0], sizes = [8, 8], strides = [1, 1]} : vector<16x8xf32> to vector<8x8xf32>
    %176 = vector.extract_strided_slice %54 {offsets = [8, 0], sizes = [8, 8], strides = [1, 1]} : vector<16x8xf32> to vector<8x8xf32>
    %177 = vector.extract_strided_slice %82 {offsets = [8, 0], sizes = [8, 8], strides = [1, 1]} : vector<16x8xf32> to vector<8x8xf32>
    %cst_134 = arith.constant dense<0.000000e+00> : vector<8x8xf32>
    %178 = tpu.matmul %175, %176, %cst_134 {dimension_numbers = #tpu.dot_dimension_numbers<[1], [1], [0], [0], [0, 0, 1, 0], [], []>} : vector<8x8xf32>, vector<8x8xf32>, vector<8x8xf32> -> vector<8x8xf32>
    %cst_135 = arith.constant dense<0xFF800000> : vector<8xf32>
    %179 = vector.multi_reduction <maximumf>, %178, %cst_135 [1] : vector<8x8xf32> to vector<8xf32>
    %180 = vector.shape_cast %179 : vector<8xf32> to vector<8x1xf32>
    %181 = vector.broadcast %180 : vector<8x1xf32> to vector<8x8xf32>
    %182 = arith.subf %178, %181 : vector<8x8xf32>
    %183 = math.exp %182 : vector<8x8xf32>
    %cst_136 = arith.constant dense<0.000000e+00> : vector<8xf32>
    %184 = vector.multi_reduction <add>, %183, %cst_136 [1] : vector<8x8xf32> to vector<8xf32>
    %185 = vector.shape_cast %184 : vector<8xf32> to vector<8x1xf32>
    %186 = vector.broadcast %185 : vector<8x1xf32> to vector<8x8xf32>
    %187 = arith.divf %183, %186 : vector<8x8xf32>
    %cst_137 = arith.constant dense<0.000000e+00> : vector<8x8xf32>
    %188 = tpu.matmul %187, %177, %cst_137 {dimension_numbers = #tpu.dot_dimension_numbers<[1], [0], [0], [1], [0, 0, 1, 1], [], []>} : vector<8x8xf32>, vector<8x8xf32>, vector<8x8xf32> -> vector<8x8xf32>
    %189 = vector.extract_strided_slice %33 {offsets = [8, 0], sizes = [8, 8], strides = [1, 1]} : vector<16x8xf32> to vector<8x8xf32>
    %190 = vector.extract_strided_slice %61 {offsets = [8, 0], sizes = [8, 8], strides = [1, 1]} : vector<16x8xf32> to vector<8x8xf32>
    %191 = vector.extract_strided_slice %89 {offsets = [8, 0], sizes = [8, 8], strides = [1, 1]} : vector<16x8xf32> to vector<8x8xf32>
    %cst_138 = arith.constant dense<0.000000e+00> : vector<8x8xf32>
    %192 = tpu.matmul %189, %190, %cst_138 {dimension_numbers = #tpu.dot_dimension_numbers<[1], [1], [0], [0], [0, 0, 1, 0], [], []>} : vector<8x8xf32>, vector<8x8xf32>, vector<8x8xf32> -> vector<8x8xf32>
    %cst_139 = arith.constant dense<0xFF800000> : vector<8xf32>
    %193 = vector.multi_reduction <maximumf>, %192, %cst_139 [1] : vector<8x8xf32> to vector<8xf32>
    %194 = vector.shape_cast %193 : vector<8xf32> to vector<8x1xf32>
    %195 = vector.broadcast %194 : vector<8x1xf32> to vector<8x8xf32>
    %196 = arith.subf %192, %195 : vector<8x8xf32>
    %197 = math.exp %196 : vector<8x8xf32>
    %cst_140 = arith.constant dense<0.000000e+00> : vector<8xf32>
    %198 = vector.multi_reduction <add>, %197, %cst_140 [1] : vector<8x8xf32> to vector<8xf32>
    %199 = vector.shape_cast %198 : vector<8xf32> to vector<8x1xf32>
    %200 = vector.broadcast %199 : vector<8x1xf32> to vector<8x8xf32>
    %201 = arith.divf %197, %200 : vector<8x8xf32>
    %cst_141 = arith.constant dense<0.000000e+00> : vector<8x8xf32>
    %202 = tpu.matmul %201, %191, %cst_141 {dimension_numbers = #tpu.dot_dimension_numbers<[1], [0], [0], [1], [0, 0, 1, 1], [], []>} : vector<8x8xf32>, vector<8x8xf32>, vector<8x8xf32> -> vector<8x8xf32>
    %203 = tpu.concatenate %160, %174, %188, %202 in 1 : vector<8x8xf32>, vector<8x8xf32>, vector<8x8xf32>, vector<8x8xf32> -> vector<8x32xf32>
    %204 = tpu.concatenate %146, %203 in 0 : vector<8x32xf32>, vector<8x32xf32> -> vector<16x32xf32>
    %c0_142 = arith.constant 0 : index
    %c0_143 = arith.constant 0 : index
    %c0_144 = arith.constant 0 : index
    %205 = vector.load %arg10[%c0_142, %c0_143, %c0_144] : memref<2x32x32xf32, #tpu.memory_space<vmem>>, vector<1x32x32xf32>
    %206 = vector.shape_cast %205 : vector<1x32x32xf32> to vector<32x32xf32>
    %cst_145 = arith.constant dense<0.000000e+00> : vector<16x32xf32>
    %207 = tpu.matmul %204, %206, %cst_145 {dimension_numbers = #tpu.dot_dimension_numbers<[1], [0], [0], [1], [0, 0, 1, 1], [], []>} : vector<16x32xf32>, vector<32x32xf32>, vector<16x32xf32> -> vector<16x32xf32>
    %c0_146 = arith.constant 0 : index
    %c0_147 = arith.constant 0 : index
    %c0_148 = arith.constant 0 : index
    %208 = vector.load %arg11[%c0_146, %c0_147, %c0_148] : memref<2x1x32xf32, #tpu.memory_space<vmem>>, vector<1x1x32xf32>
    %209 = vector.shape_cast %208 : vector<1x1x32xf32> to vector<1x32xf32>
    %210 = vector.broadcast %209 : vector<1x32xf32> to vector<16x32xf32>
    %211 = arith.addf %207, %210 : vector<16x32xf32>
    %212 = arith.addf %5, %211 : vector<16x32xf32>
    %c0_149 = arith.constant 0 : index
    %c0_150 = arith.constant 0 : index
    %c0_151 = arith.constant 0 : index
    %213 = vector.load %arg16[%c0_149, %c0_150, %c0_151] : memref<2x1x32xf32, #tpu.memory_space<vmem>>, vector<1x1x32xf32>
    %214 = vector.shape_cast %213 : vector<1x1x32xf32> to vector<1x32xf32>
    %c0_152 = arith.constant 0 : index
    %c0_153 = arith.constant 0 : index
    %c0_154 = arith.constant 0 : index
    %215 = vector.load %arg17[%c0_152, %c0_153, %c0_154] : memref<2x1x32xf32, #tpu.memory_space<vmem>>, vector<1x1x32xf32>
    %216 = vector.shape_cast %215 : vector<1x1x32xf32> to vector<1x32xf32>
    %cst_155 = arith.constant dense<0.000000e+00> : vector<16xf32>
    %217 = vector.multi_reduction <add>, %212, %cst_155 [1] : vector<16x32xf32> to vector<16xf32>
    %218 = vector.shape_cast %217 : vector<16xf32> to vector<16x1xf32>
    %cst_156 = arith.constant 3.200000e+01 : f32
    %219 = vector.broadcast %cst_156 : f32 to vector<16x1xf32>
    %220 = arith.divf %218, %219 : vector<16x1xf32>
    %221 = vector.broadcast %220 : vector<16x1xf32> to vector<16x32xf32>
    %222 = arith.subf %212, %221 : vector<16x32xf32>
    %223 = arith.mulf %222, %222 : vector<16x32xf32>
    %cst_157 = arith.constant dense<0.000000e+00> : vector<16xf32>
    %224 = vector.multi_reduction <add>, %223, %cst_157 [1] : vector<16x32xf32> to vector<16xf32>
    %225 = vector.shape_cast %224 : vector<16xf32> to vector<16x1xf32>
    %cst_158 = arith.constant 3.200000e+01 : f32
    %226 = vector.broadcast %cst_158 : f32 to vector<16x1xf32>
    %227 = arith.divf %225, %226 : vector<16x1xf32>
    %cst_159 = arith.constant 9.99999974E-6 : f32
    %228 = vector.broadcast %cst_159 : f32 to vector<16x1xf32>
    %229 = arith.addf %227, %228 : vector<16x1xf32>
    %230 = math.rsqrt %229 : vector<16x1xf32>
    %231 = vector.broadcast %230 : vector<16x1xf32> to vector<16x32xf32>
    %232 = arith.mulf %222, %231 : vector<16x32xf32>
    %233 = vector.broadcast %214 : vector<1x32xf32> to vector<16x32xf32>
    %234 = arith.mulf %232, %233 : vector<16x32xf32>
    %235 = vector.broadcast %216 : vector<1x32xf32> to vector<16x32xf32>
    %236 = arith.addf %234, %235 : vector<16x32xf32>
    %c0_160 = arith.constant 0 : index
    %c0_161 = arith.constant 0 : index
    %c0_162 = arith.constant 0 : index
    %237 = vector.load %arg12[%c0_160, %c0_161, %c0_162] : memref<2x32x64xf32, #tpu.memory_space<vmem>>, vector<1x32x64xf32>
    %238 = vector.shape_cast %237 : vector<1x32x64xf32> to vector<32x64xf32>
    %cst_163 = arith.constant dense<0.000000e+00> : vector<16x64xf32>
    %239 = tpu.matmul %236, %238, %cst_163 {dimension_numbers = #tpu.dot_dimension_numbers<[1], [0], [0], [1], [0, 0, 1, 1], [], []>} : vector<16x32xf32>, vector<32x64xf32>, vector<16x64xf32> -> vector<16x64xf32>
    %c0_164 = arith.constant 0 : index
    %c0_165 = arith.constant 0 : index
    %c0_166 = arith.constant 0 : index
    %240 = vector.load %arg13[%c0_164, %c0_165, %c0_166] : memref<2x1x64xf32, #tpu.memory_space<vmem>>, vector<1x1x64xf32>
    %241 = vector.shape_cast %240 : vector<1x1x64xf32> to vector<1x64xf32>
    %242 = vector.broadcast %241 : vector<1x64xf32> to vector<16x64xf32>
    %243 = arith.addf %239, %242 : vector<16x64xf32>
    %cst_167 = arith.constant 0.000000e+00 : f32
    %244 = vector.broadcast %cst_167 : f32 to vector<16x64xf32>
    %245 = arith.maximumf %243, %244 : vector<16x64xf32>
    %c0_168 = arith.constant 0 : index
    %c0_169 = arith.constant 0 : index
    %c0_170 = arith.constant 0 : index
    %246 = vector.load %arg14[%c0_168, %c0_169, %c0_170] : memref<2x64x32xf32, #tpu.memory_space<vmem>>, vector<1x64x32xf32>
    %247 = vector.shape_cast %246 : vector<1x64x32xf32> to vector<64x32xf32>
    %cst_171 = arith.constant dense<0.000000e+00> : vector<16x32xf32>
    %248 = tpu.matmul %245, %247, %cst_171 {dimension_numbers = #tpu.dot_dimension_numbers<[1], [0], [0], [1], [0, 0, 1, 1], [], []>} : vector<16x64xf32>, vector<64x32xf32>, vector<16x32xf32> -> vector<16x32xf32>
    %c0_172 = arith.constant 0 : index
    %c0_173 = arith.constant 0 : index
    %c0_174 = arith.constant 0 : index
    %249 = vector.load %arg15[%c0_172, %c0_173, %c0_174] : memref<2x1x32xf32, #tpu.memory_space<vmem>>, vector<1x1x32xf32>
    %250 = vector.shape_cast %249 : vector<1x1x32xf32> to vector<1x32xf32>
    %251 = vector.broadcast %250 : vector<1x32xf32> to vector<16x32xf32>
    %252 = arith.addf %248, %251 : vector<16x32xf32>
    %253 = arith.addf %236, %252 : vector<16x32xf32>
    %c0_175 = arith.constant 0 : index
    %c0_176 = arith.constant 0 : index
    %c0_177 = arith.constant 0 : index
    %254 = vector.load %arg18[%c0_175, %c0_176, %c0_177] : memref<2x1x32xf32, #tpu.memory_space<vmem>>, vector<1x1x32xf32>
    %255 = vector.shape_cast %254 : vector<1x1x32xf32> to vector<1x32xf32>
    %c0_178 = arith.constant 0 : index
    %c0_179 = arith.constant 0 : index
    %c0_180 = arith.constant 0 : index
    %256 = vector.load %arg19[%c0_178, %c0_179, %c0_180] : memref<2x1x32xf32, #tpu.memory_space<vmem>>, vector<1x1x32xf32>
    %257 = vector.shape_cast %256 : vector<1x1x32xf32> to vector<1x32xf32>
    %cst_181 = arith.constant dense<0.000000e+00> : vector<16xf32>
    %258 = vector.multi_reduction <add>, %253, %cst_181 [1] : vector<16x32xf32> to vector<16xf32>
    %259 = vector.shape_cast %258 : vector<16xf32> to vector<16x1xf32>
    %cst_182 = arith.constant 3.200000e+01 : f32
    %260 = vector.broadcast %cst_182 : f32 to vector<16x1xf32>
    %261 = arith.divf %259, %260 : vector<16x1xf32>
    %262 = vector.broadcast %261 : vector<16x1xf32> to vector<16x32xf32>
    %263 = arith.subf %253, %262 : vector<16x32xf32>
    %264 = arith.mulf %263, %263 : vector<16x32xf32>
    %cst_183 = arith.constant dense<0.000000e+00> : vector<16xf32>
    %265 = vector.multi_reduction <add>, %264, %cst_183 [1] : vector<16x32xf32> to vector<16xf32>
    %266 = vector.shape_cast %265 : vector<16xf32> to vector<16x1xf32>
    %cst_184 = arith.constant 3.200000e+01 : f32
    %267 = vector.broadcast %cst_184 : f32 to vector<16x1xf32>
    %268 = arith.divf %266, %267 : vector<16x1xf32>
    %cst_185 = arith.constant 9.99999974E-6 : f32
    %269 = vector.broadcast %cst_185 : f32 to vector<16x1xf32>
    %270 = arith.addf %268, %269 : vector<16x1xf32>
    %271 = math.rsqrt %270 : vector<16x1xf32>
    %272 = vector.broadcast %271 : vector<16x1xf32> to vector<16x32xf32>
    %273 = arith.mulf %263, %272 : vector<16x32xf32>
    %274 = vector.broadcast %255 : vector<1x32xf32> to vector<16x32xf32>
    %275 = arith.mulf %273, %274 : vector<16x32xf32>
    %276 = vector.broadcast %257 : vector<1x32xf32> to vector<16x32xf32>
    %277 = arith.addf %275, %276 : vector<16x32xf32>
    %c1_186 = arith.constant 1 : index
    %c0_187 = arith.constant 0 : index
    %c0_188 = arith.constant 0 : index
    %c0_189 = arith.constant 0 : index
    %278 = vector.load %arg4[%c1_186, %c0_187, %c0_188, %c0_189] : memref<2x4x32x8xf32, #tpu.memory_space<vmem>>, vector<1x1x32x8xf32>
    %279 = vector.shape_cast %278 : vector<1x1x32x8xf32> to vector<32x8xf32>
    %cst_190 = arith.constant dense<0.000000e+00> : vector<16x8xf32>
    %280 = tpu.matmul %277, %279, %cst_190 {dimension_numbers = #tpu.dot_dimension_numbers<[1], [0], [0], [1], [0, 0, 1, 1], [], []>} : vector<16x32xf32>, vector<32x8xf32>, vector<16x8xf32> -> vector<16x8xf32>
    %c1_191 = arith.constant 1 : index
    %c0_192 = arith.constant 0 : index
    %c0_193 = arith.constant 0 : index
    %c0_194 = arith.constant 0 : index
    %281 = vector.load %arg7[%c1_191, %c0_192, %c0_193, %c0_194] : memref<2x4x1x8xf32, #tpu.memory_space<vmem>>, vector<1x1x1x8xf32>
    %282 = vector.shape_cast %281 : vector<1x1x1x8xf32> to vector<1x8xf32>
    %283 = vector.broadcast %282 : vector<1x8xf32> to vector<16x8xf32>
    %284 = arith.addf %280, %283 : vector<16x8xf32>
    %c1_195 = arith.constant 1 : index
    %c1_196 = arith.constant 1 : index
    %c0_197 = arith.constant 0 : index
    %c0_198 = arith.constant 0 : index
    %285 = vector.load %arg4[%c1_195, %c1_196, %c0_197, %c0_198] : memref<2x4x32x8xf32, #tpu.memory_space<vmem>>, vector<1x1x32x8xf32>
    %286 = vector.shape_cast %285 : vector<1x1x32x8xf32> to vector<32x8xf32>
    %cst_199 = arith.constant dense<0.000000e+00> : vector<16x8xf32>
    %287 = tpu.matmul %277, %286, %cst_199 {dimension_numbers = #tpu.dot_dimension_numbers<[1], [0], [0], [1], [0, 0, 1, 1], [], []>} : vector<16x32xf32>, vector<32x8xf32>, vector<16x8xf32> -> vector<16x8xf32>
    %c1_200 = arith.constant 1 : index
    %c1_201 = arith.constant 1 : index
    %c0_202 = arith.constant 0 : index
    %c0_203 = arith.constant 0 : index
    %288 = vector.load %arg7[%c1_200, %c1_201, %c0_202, %c0_203] : memref<2x4x1x8xf32, #tpu.memory_space<vmem>>, vector<1x1x1x8xf32>
    %289 = vector.shape_cast %288 : vector<1x1x1x8xf32> to vector<1x8xf32>
    %290 = vector.broadcast %289 : vector<1x8xf32> to vector<16x8xf32>
    %291 = arith.addf %287, %290 : vector<16x8xf32>
    %c1_204 = arith.constant 1 : index
    %c2_205 = arith.constant 2 : index
    %c0_206 = arith.constant 0 : index
    %c0_207 = arith.constant 0 : index
    %292 = vector.load %arg4[%c1_204, %c2_205, %c0_206, %c0_207] : memref<2x4x32x8xf32, #tpu.memory_space<vmem>>, vector<1x1x32x8xf32>
    %293 = vector.shape_cast %292 : vector<1x1x32x8xf32> to vector<32x8xf32>
    %cst_208 = arith.constant dense<0.000000e+00> : vector<16x8xf32>
    %294 = tpu.matmul %277, %293, %cst_208 {dimension_numbers = #tpu.dot_dimension_numbers<[1], [0], [0], [1], [0, 0, 1, 1], [], []>} : vector<16x32xf32>, vector<32x8xf32>, vector<16x8xf32> -> vector<16x8xf32>
    %c1_209 = arith.constant 1 : index
    %c2_210 = arith.constant 2 : index
    %c0_211 = arith.constant 0 : index
    %c0_212 = arith.constant 0 : index
    %295 = vector.load %arg7[%c1_209, %c2_210, %c0_211, %c0_212] : memref<2x4x1x8xf32, #tpu.memory_space<vmem>>, vector<1x1x1x8xf32>
    %296 = vector.shape_cast %295 : vector<1x1x1x8xf32> to vector<1x8xf32>
    %297 = vector.broadcast %296 : vector<1x8xf32> to vector<16x8xf32>
    %298 = arith.addf %294, %297 : vector<16x8xf32>
    %c1_213 = arith.constant 1 : index
    %c3_214 = arith.constant 3 : index
    %c0_215 = arith.constant 0 : index
    %c0_216 = arith.constant 0 : index
    %299 = vector.load %arg4[%c1_213, %c3_214, %c0_215, %c0_216] : memref<2x4x32x8xf32, #tpu.memory_space<vmem>>, vector<1x1x32x8xf32>
    %300 = vector.shape_cast %299 : vector<1x1x32x8xf32> to vector<32x8xf32>
    %cst_217 = arith.constant dense<0.000000e+00> : vector<16x8xf32>
    %301 = tpu.matmul %277, %300, %cst_217 {dimension_numbers = #tpu.dot_dimension_numbers<[1], [0], [0], [1], [0, 0, 1, 1], [], []>} : vector<16x32xf32>, vector<32x8xf32>, vector<16x8xf32> -> vector<16x8xf32>
    %c1_218 = arith.constant 1 : index
    %c3_219 = arith.constant 3 : index
    %c0_220 = arith.constant 0 : index
    %c0_221 = arith.constant 0 : index
    %302 = vector.load %arg7[%c1_218, %c3_219, %c0_220, %c0_221] : memref<2x4x1x8xf32, #tpu.memory_space<vmem>>, vector<1x1x1x8xf32>
    %303 = vector.shape_cast %302 : vector<1x1x1x8xf32> to vector<1x8xf32>
    %304 = vector.broadcast %303 : vector<1x8xf32> to vector<16x8xf32>
    %305 = arith.addf %301, %304 : vector<16x8xf32>
    %c1_222 = arith.constant 1 : index
    %c0_223 = arith.constant 0 : index
    %c0_224 = arith.constant 0 : index
    %c0_225 = arith.constant 0 : index
    %306 = vector.load %arg5[%c1_222, %c0_223, %c0_224, %c0_225] : memref<2x4x32x8xf32, #tpu.memory_space<vmem>>, vector<1x1x32x8xf32>
    %307 = vector.shape_cast %306 : vector<1x1x32x8xf32> to vector<32x8xf32>
    %cst_226 = arith.constant dense<0.000000e+00> : vector<16x8xf32>
    %308 = tpu.matmul %277, %307, %cst_226 {dimension_numbers = #tpu.dot_dimension_numbers<[1], [0], [0], [1], [0, 0, 1, 1], [], []>} : vector<16x32xf32>, vector<32x8xf32>, vector<16x8xf32> -> vector<16x8xf32>
    %c1_227 = arith.constant 1 : index
    %c0_228 = arith.constant 0 : index
    %c0_229 = arith.constant 0 : index
    %c0_230 = arith.constant 0 : index
    %309 = vector.load %arg8[%c1_227, %c0_228, %c0_229, %c0_230] : memref<2x4x1x8xf32, #tpu.memory_space<vmem>>, vector<1x1x1x8xf32>
    %310 = vector.shape_cast %309 : vector<1x1x1x8xf32> to vector<1x8xf32>
    %311 = vector.broadcast %310 : vector<1x8xf32> to vector<16x8xf32>
    %312 = arith.addf %308, %311 : vector<16x8xf32>
    %c1_231 = arith.constant 1 : index
    %c1_232 = arith.constant 1 : index
    %c0_233 = arith.constant 0 : index
    %c0_234 = arith.constant 0 : index
    %313 = vector.load %arg5[%c1_231, %c1_232, %c0_233, %c0_234] : memref<2x4x32x8xf32, #tpu.memory_space<vmem>>, vector<1x1x32x8xf32>
    %314 = vector.shape_cast %313 : vector<1x1x32x8xf32> to vector<32x8xf32>
    %cst_235 = arith.constant dense<0.000000e+00> : vector<16x8xf32>
    %315 = tpu.matmul %277, %314, %cst_235 {dimension_numbers = #tpu.dot_dimension_numbers<[1], [0], [0], [1], [0, 0, 1, 1], [], []>} : vector<16x32xf32>, vector<32x8xf32>, vector<16x8xf32> -> vector<16x8xf32>
    %c1_236 = arith.constant 1 : index
    %c1_237 = arith.constant 1 : index
    %c0_238 = arith.constant 0 : index
    %c0_239 = arith.constant 0 : index
    %316 = vector.load %arg8[%c1_236, %c1_237, %c0_238, %c0_239] : memref<2x4x1x8xf32, #tpu.memory_space<vmem>>, vector<1x1x1x8xf32>
    %317 = vector.shape_cast %316 : vector<1x1x1x8xf32> to vector<1x8xf32>
    %318 = vector.broadcast %317 : vector<1x8xf32> to vector<16x8xf32>
    %319 = arith.addf %315, %318 : vector<16x8xf32>
    %c1_240 = arith.constant 1 : index
    %c2_241 = arith.constant 2 : index
    %c0_242 = arith.constant 0 : index
    %c0_243 = arith.constant 0 : index
    %320 = vector.load %arg5[%c1_240, %c2_241, %c0_242, %c0_243] : memref<2x4x32x8xf32, #tpu.memory_space<vmem>>, vector<1x1x32x8xf32>
    %321 = vector.shape_cast %320 : vector<1x1x32x8xf32> to vector<32x8xf32>
    %cst_244 = arith.constant dense<0.000000e+00> : vector<16x8xf32>
    %322 = tpu.matmul %277, %321, %cst_244 {dimension_numbers = #tpu.dot_dimension_numbers<[1], [0], [0], [1], [0, 0, 1, 1], [], []>} : vector<16x32xf32>, vector<32x8xf32>, vector<16x8xf32> -> vector<16x8xf32>
    %c1_245 = arith.constant 1 : index
    %c2_246 = arith.constant 2 : index
    %c0_247 = arith.constant 0 : index
    %c0_248 = arith.constant 0 : index
    %323 = vector.load %arg8[%c1_245, %c2_246, %c0_247, %c0_248] : memref<2x4x1x8xf32, #tpu.memory_space<vmem>>, vector<1x1x1x8xf32>
    %324 = vector.shape_cast %323 : vector<1x1x1x8xf32> to vector<1x8xf32>
    %325 = vector.broadcast %324 : vector<1x8xf32> to vector<16x8xf32>
    %326 = arith.addf %322, %325 : vector<16x8xf32>
    %c1_249 = arith.constant 1 : index
    %c3_250 = arith.constant 3 : index
    %c0_251 = arith.constant 0 : index
    %c0_252 = arith.constant 0 : index
    %327 = vector.load %arg5[%c1_249, %c3_250, %c0_251, %c0_252] : memref<2x4x32x8xf32, #tpu.memory_space<vmem>>, vector<1x1x32x8xf32>
    %328 = vector.shape_cast %327 : vector<1x1x32x8xf32> to vector<32x8xf32>
    %cst_253 = arith.constant dense<0.000000e+00> : vector<16x8xf32>
    %329 = tpu.matmul %277, %328, %cst_253 {dimension_numbers = #tpu.dot_dimension_numbers<[1], [0], [0], [1], [0, 0, 1, 1], [], []>} : vector<16x32xf32>, vector<32x8xf32>, vector<16x8xf32> -> vector<16x8xf32>
    %c1_254 = arith.constant 1 : index
    %c3_255 = arith.constant 3 : index
    %c0_256 = arith.constant 0 : index
    %c0_257 = arith.constant 0 : index
    %330 = vector.load %arg8[%c1_254, %c3_255, %c0_256, %c0_257] : memref<2x4x1x8xf32, #tpu.memory_space<vmem>>, vector<1x1x1x8xf32>
    %331 = vector.shape_cast %330 : vector<1x1x1x8xf32> to vector<1x8xf32>
    %332 = vector.broadcast %331 : vector<1x8xf32> to vector<16x8xf32>
    %333 = arith.addf %329, %332 : vector<16x8xf32>
    %c1_258 = arith.constant 1 : index
    %c0_259 = arith.constant 0 : index
    %c0_260 = arith.constant 0 : index
    %c0_261 = arith.constant 0 : index
    %334 = vector.load %arg6[%c1_258, %c0_259, %c0_260, %c0_261] : memref<2x4x32x8xf32, #tpu.memory_space<vmem>>, vector<1x1x32x8xf32>
    %335 = vector.shape_cast %334 : vector<1x1x32x8xf32> to vector<32x8xf32>
    %cst_262 = arith.constant dense<0.000000e+00> : vector<16x8xf32>
    %336 = tpu.matmul %277, %335, %cst_262 {dimension_numbers = #tpu.dot_dimension_numbers<[1], [0], [0], [1], [0, 0, 1, 1], [], []>} : vector<16x32xf32>, vector<32x8xf32>, vector<16x8xf32> -> vector<16x8xf32>
    %c1_263 = arith.constant 1 : index
    %c0_264 = arith.constant 0 : index
    %c0_265 = arith.constant 0 : index
    %c0_266 = arith.constant 0 : index
    %337 = vector.load %arg9[%c1_263, %c0_264, %c0_265, %c0_266] : memref<2x4x1x8xf32, #tpu.memory_space<vmem>>, vector<1x1x1x8xf32>
    %338 = vector.shape_cast %337 : vector<1x1x1x8xf32> to vector<1x8xf32>
    %339 = vector.broadcast %338 : vector<1x8xf32> to vector<16x8xf32>
    %340 = arith.addf %336, %339 : vector<16x8xf32>
    %c1_267 = arith.constant 1 : index
    %c1_268 = arith.constant 1 : index
    %c0_269 = arith.constant 0 : index
    %c0_270 = arith.constant 0 : index
    %341 = vector.load %arg6[%c1_267, %c1_268, %c0_269, %c0_270] : memref<2x4x32x8xf32, #tpu.memory_space<vmem>>, vector<1x1x32x8xf32>
    %342 = vector.shape_cast %341 : vector<1x1x32x8xf32> to vector<32x8xf32>
    %cst_271 = arith.constant dense<0.000000e+00> : vector<16x8xf32>
    %343 = tpu.matmul %277, %342, %cst_271 {dimension_numbers = #tpu.dot_dimension_numbers<[1], [0], [0], [1], [0, 0, 1, 1], [], []>} : vector<16x32xf32>, vector<32x8xf32>, vector<16x8xf32> -> vector<16x8xf32>
    %c1_272 = arith.constant 1 : index
    %c1_273 = arith.constant 1 : index
    %c0_274 = arith.constant 0 : index
    %c0_275 = arith.constant 0 : index
    %344 = vector.load %arg9[%c1_272, %c1_273, %c0_274, %c0_275] : memref<2x4x1x8xf32, #tpu.memory_space<vmem>>, vector<1x1x1x8xf32>
    %345 = vector.shape_cast %344 : vector<1x1x1x8xf32> to vector<1x8xf32>
    %346 = vector.broadcast %345 : vector<1x8xf32> to vector<16x8xf32>
    %347 = arith.addf %343, %346 : vector<16x8xf32>
    %c1_276 = arith.constant 1 : index
    %c2_277 = arith.constant 2 : index
    %c0_278 = arith.constant 0 : index
    %c0_279 = arith.constant 0 : index
    %348 = vector.load %arg6[%c1_276, %c2_277, %c0_278, %c0_279] : memref<2x4x32x8xf32, #tpu.memory_space<vmem>>, vector<1x1x32x8xf32>
    %349 = vector.shape_cast %348 : vector<1x1x32x8xf32> to vector<32x8xf32>
    %cst_280 = arith.constant dense<0.000000e+00> : vector<16x8xf32>
    %350 = tpu.matmul %277, %349, %cst_280 {dimension_numbers = #tpu.dot_dimension_numbers<[1], [0], [0], [1], [0, 0, 1, 1], [], []>} : vector<16x32xf32>, vector<32x8xf32>, vector<16x8xf32> -> vector<16x8xf32>
    %c1_281 = arith.constant 1 : index
    %c2_282 = arith.constant 2 : index
    %c0_283 = arith.constant 0 : index
    %c0_284 = arith.constant 0 : index
    %351 = vector.load %arg9[%c1_281, %c2_282, %c0_283, %c0_284] : memref<2x4x1x8xf32, #tpu.memory_space<vmem>>, vector<1x1x1x8xf32>
    %352 = vector.shape_cast %351 : vector<1x1x1x8xf32> to vector<1x8xf32>
    %353 = vector.broadcast %352 : vector<1x8xf32> to vector<16x8xf32>
    %354 = arith.addf %350, %353 : vector<16x8xf32>
    %c1_285 = arith.constant 1 : index
    %c3_286 = arith.constant 3 : index
    %c0_287 = arith.constant 0 : index
    %c0_288 = arith.constant 0 : index
    %355 = vector.load %arg6[%c1_285, %c3_286, %c0_287, %c0_288] : memref<2x4x32x8xf32, #tpu.memory_space<vmem>>, vector<1x1x32x8xf32>
    %356 = vector.shape_cast %355 : vector<1x1x32x8xf32> to vector<32x8xf32>
    %cst_289 = arith.constant dense<0.000000e+00> : vector<16x8xf32>
    %357 = tpu.matmul %277, %356, %cst_289 {dimension_numbers = #tpu.dot_dimension_numbers<[1], [0], [0], [1], [0, 0, 1, 1], [], []>} : vector<16x32xf32>, vector<32x8xf32>, vector<16x8xf32> -> vector<16x8xf32>
    %c1_290 = arith.constant 1 : index
    %c3_291 = arith.constant 3 : index
    %c0_292 = arith.constant 0 : index
    %c0_293 = arith.constant 0 : index
    %358 = vector.load %arg9[%c1_290, %c3_291, %c0_292, %c0_293] : memref<2x4x1x8xf32, #tpu.memory_space<vmem>>, vector<1x1x1x8xf32>
    %359 = vector.shape_cast %358 : vector<1x1x1x8xf32> to vector<1x8xf32>
    %360 = vector.broadcast %359 : vector<1x8xf32> to vector<16x8xf32>
    %361 = arith.addf %357, %360 : vector<16x8xf32>
    %362 = vector.extract_strided_slice %284 {offsets = [0, 0], sizes = [8, 8], strides = [1, 1]} : vector<16x8xf32> to vector<8x8xf32>
    %363 = vector.extract_strided_slice %312 {offsets = [0, 0], sizes = [8, 8], strides = [1, 1]} : vector<16x8xf32> to vector<8x8xf32>
    %364 = vector.extract_strided_slice %340 {offsets = [0, 0], sizes = [8, 8], strides = [1, 1]} : vector<16x8xf32> to vector<8x8xf32>
    %cst_294 = arith.constant dense<0.000000e+00> : vector<8x8xf32>
    %365 = tpu.matmul %362, %363, %cst_294 {dimension_numbers = #tpu.dot_dimension_numbers<[1], [1], [0], [0], [0, 0, 1, 0], [], []>} : vector<8x8xf32>, vector<8x8xf32>, vector<8x8xf32> -> vector<8x8xf32>
    %cst_295 = arith.constant dense<0xFF800000> : vector<8xf32>
    %366 = vector.multi_reduction <maximumf>, %365, %cst_295 [1] : vector<8x8xf32> to vector<8xf32>
    %367 = vector.shape_cast %366 : vector<8xf32> to vector<8x1xf32>
    %368 = vector.broadcast %367 : vector<8x1xf32> to vector<8x8xf32>
    %369 = arith.subf %365, %368 : vector<8x8xf32>
    %370 = math.exp %369 : vector<8x8xf32>
    %cst_296 = arith.constant dense<0.000000e+00> : vector<8xf32>
    %371 = vector.multi_reduction <add>, %370, %cst_296 [1] : vector<8x8xf32> to vector<8xf32>
    %372 = vector.shape_cast %371 : vector<8xf32> to vector<8x1xf32>
    %373 = vector.broadcast %372 : vector<8x1xf32> to vector<8x8xf32>
    %374 = arith.divf %370, %373 : vector<8x8xf32>
    %cst_297 = arith.constant dense<0.000000e+00> : vector<8x8xf32>
    %375 = tpu.matmul %374, %364, %cst_297 {dimension_numbers = #tpu.dot_dimension_numbers<[1], [0], [0], [1], [0, 0, 1, 1], [], []>} : vector<8x8xf32>, vector<8x8xf32>, vector<8x8xf32> -> vector<8x8xf32>
    %376 = vector.extract_strided_slice %291 {offsets = [0, 0], sizes = [8, 8], strides = [1, 1]} : vector<16x8xf32> to vector<8x8xf32>
    %377 = vector.extract_strided_slice %319 {offsets = [0, 0], sizes = [8, 8], strides = [1, 1]} : vector<16x8xf32> to vector<8x8xf32>
    %378 = vector.extract_strided_slice %347 {offsets = [0, 0], sizes = [8, 8], strides = [1, 1]} : vector<16x8xf32> to vector<8x8xf32>
    %cst_298 = arith.constant dense<0.000000e+00> : vector<8x8xf32>
    %379 = tpu.matmul %376, %377, %cst_298 {dimension_numbers = #tpu.dot_dimension_numbers<[1], [1], [0], [0], [0, 0, 1, 0], [], []>} : vector<8x8xf32>, vector<8x8xf32>, vector<8x8xf32> -> vector<8x8xf32>
    %cst_299 = arith.constant dense<0xFF800000> : vector<8xf32>
    %380 = vector.multi_reduction <maximumf>, %379, %cst_299 [1] : vector<8x8xf32> to vector<8xf32>
    %381 = vector.shape_cast %380 : vector<8xf32> to vector<8x1xf32>
    %382 = vector.broadcast %381 : vector<8x1xf32> to vector<8x8xf32>
    %383 = arith.subf %379, %382 : vector<8x8xf32>
    %384 = math.exp %383 : vector<8x8xf32>
    %cst_300 = arith.constant dense<0.000000e+00> : vector<8xf32>
    %385 = vector.multi_reduction <add>, %384, %cst_300 [1] : vector<8x8xf32> to vector<8xf32>
    %386 = vector.shape_cast %385 : vector<8xf32> to vector<8x1xf32>
    %387 = vector.broadcast %386 : vector<8x1xf32> to vector<8x8xf32>
    %388 = arith.divf %384, %387 : vector<8x8xf32>
    %cst_301 = arith.constant dense<0.000000e+00> : vector<8x8xf32>
    %389 = tpu.matmul %388, %378, %cst_301 {dimension_numbers = #tpu.dot_dimension_numbers<[1], [0], [0], [1], [0, 0, 1, 1], [], []>} : vector<8x8xf32>, vector<8x8xf32>, vector<8x8xf32> -> vector<8x8xf32>
    %390 = vector.extract_strided_slice %298 {offsets = [0, 0], sizes = [8, 8], strides = [1, 1]} : vector<16x8xf32> to vector<8x8xf32>
    %391 = vector.extract_strided_slice %326 {offsets = [0, 0], sizes = [8, 8], strides = [1, 1]} : vector<16x8xf32> to vector<8x8xf32>
    %392 = vector.extract_strided_slice %354 {offsets = [0, 0], sizes = [8, 8], strides = [1, 1]} : vector<16x8xf32> to vector<8x8xf32>
    %cst_302 = arith.constant dense<0.000000e+00> : vector<8x8xf32>
    %393 = tpu.matmul %390, %391, %cst_302 {dimension_numbers = #tpu.dot_dimension_numbers<[1], [1], [0], [0], [0, 0, 1, 0], [], []>} : vector<8x8xf32>, vector<8x8xf32>, vector<8x8xf32> -> vector<8x8xf32>
    %cst_303 = arith.constant dense<0xFF800000> : vector<8xf32>
    %394 = vector.multi_reduction <maximumf>, %393, %cst_303 [1] : vector<8x8xf32> to vector<8xf32>
    %395 = vector.shape_cast %394 : vector<8xf32> to vector<8x1xf32>
    %396 = vector.broadcast %395 : vector<8x1xf32> to vector<8x8xf32>
    %397 = arith.subf %393, %396 : vector<8x8xf32>
    %398 = math.exp %397 : vector<8x8xf32>
    %cst_304 = arith.constant dense<0.000000e+00> : vector<8xf32>
    %399 = vector.multi_reduction <add>, %398, %cst_304 [1] : vector<8x8xf32> to vector<8xf32>
    %400 = vector.shape_cast %399 : vector<8xf32> to vector<8x1xf32>
    %401 = vector.broadcast %400 : vector<8x1xf32> to vector<8x8xf32>
    %402 = arith.divf %398, %401 : vector<8x8xf32>
    %cst_305 = arith.constant dense<0.000000e+00> : vector<8x8xf32>
    %403 = tpu.matmul %402, %392, %cst_305 {dimension_numbers = #tpu.dot_dimension_numbers<[1], [0], [0], [1], [0, 0, 1, 1], [], []>} : vector<8x8xf32>, vector<8x8xf32>, vector<8x8xf32> -> vector<8x8xf32>
    %404 = vector.extract_strided_slice %305 {offsets = [0, 0], sizes = [8, 8], strides = [1, 1]} : vector<16x8xf32> to vector<8x8xf32>
    %405 = vector.extract_strided_slice %333 {offsets = [0, 0], sizes = [8, 8], strides = [1, 1]} : vector<16x8xf32> to vector<8x8xf32>
    %406 = vector.extract_strided_slice %361 {offsets = [0, 0], sizes = [8, 8], strides = [1, 1]} : vector<16x8xf32> to vector<8x8xf32>
    %cst_306 = arith.constant dense<0.000000e+00> : vector<8x8xf32>
    %407 = tpu.matmul %404, %405, %cst_306 {dimension_numbers = #tpu.dot_dimension_numbers<[1], [1], [0], [0], [0, 0, 1, 0], [], []>} : vector<8x8xf32>, vector<8x8xf32>, vector<8x8xf32> -> vector<8x8xf32>
    %cst_307 = arith.constant dense<0xFF800000> : vector<8xf32>
    %408 = vector.multi_reduction <maximumf>, %407, %cst_307 [1] : vector<8x8xf32> to vector<8xf32>
    %409 = vector.shape_cast %408 : vector<8xf32> to vector<8x1xf32>
    %410 = vector.broadcast %409 : vector<8x1xf32> to vector<8x8xf32>
    %411 = arith.subf %407, %410 : vector<8x8xf32>
    %412 = math.exp %411 : vector<8x8xf32>
    %cst_308 = arith.constant dense<0.000000e+00> : vector<8xf32>
    %413 = vector.multi_reduction <add>, %412, %cst_308 [1] : vector<8x8xf32> to vector<8xf32>
    %414 = vector.shape_cast %413 : vector<8xf32> to vector<8x1xf32>
    %415 = vector.broadcast %414 : vector<8x1xf32> to vector<8x8xf32>
    %416 = arith.divf %412, %415 : vector<8x8xf32>
    %cst_309 = arith.constant dense<0.000000e+00> : vector<8x8xf32>
    %417 = tpu.matmul %416, %406, %cst_309 {dimension_numbers = #tpu.dot_dimension_numbers<[1], [0], [0], [1], [0, 0, 1, 1], [], []>} : vector<8x8xf32>, vector<8x8xf32>, vector<8x8xf32> -> vector<8x8xf32>
    %418 = tpu.concatenate %375, %389, %403, %417 in 1 : vector<8x8xf32>, vector<8x8xf32>, vector<8x8xf32>, vector<8x8xf32> -> vector<8x32xf32>
    %419 = vector.extract_strided_slice %284 {offsets = [8, 0], sizes = [8, 8], strides = [1, 1]} : vector<16x8xf32> to vector<8x8xf32>
    %420 = vector.extract_strided_slice %312 {offsets = [8, 0], sizes = [8, 8], strides = [1, 1]} : vector<16x8xf32> to vector<8x8xf32>
    %421 = vector.extract_strided_slice %340 {offsets = [8, 0], sizes = [8, 8], strides = [1, 1]} : vector<16x8xf32> to vector<8x8xf32>
    %cst_310 = arith.constant dense<0.000000e+00> : vector<8x8xf32>
    %422 = tpu.matmul %419, %420, %cst_310 {dimension_numbers = #tpu.dot_dimension_numbers<[1], [1], [0], [0], [0, 0, 1, 0], [], []>} : vector<8x8xf32>, vector<8x8xf32>, vector<8x8xf32> -> vector<8x8xf32>
    %cst_311 = arith.constant dense<0xFF800000> : vector<8xf32>
    %423 = vector.multi_reduction <maximumf>, %422, %cst_311 [1] : vector<8x8xf32> to vector<8xf32>
    %424 = vector.shape_cast %423 : vector<8xf32> to vector<8x1xf32>
    %425 = vector.broadcast %424 : vector<8x1xf32> to vector<8x8xf32>
    %426 = arith.subf %422, %425 : vector<8x8xf32>
    %427 = math.exp %426 : vector<8x8xf32>
    %cst_312 = arith.constant dense<0.000000e+00> : vector<8xf32>
    %428 = vector.multi_reduction <add>, %427, %cst_312 [1] : vector<8x8xf32> to vector<8xf32>
    %429 = vector.shape_cast %428 : vector<8xf32> to vector<8x1xf32>
    %430 = vector.broadcast %429 : vector<8x1xf32> to vector<8x8xf32>
    %431 = arith.divf %427, %430 : vector<8x8xf32>
    %cst_313 = arith.constant dense<0.000000e+00> : vector<8x8xf32>
    %432 = tpu.matmul %431, %421, %cst_313 {dimension_numbers = #tpu.dot_dimension_numbers<[1], [0], [0], [1], [0, 0, 1, 1], [], []>} : vector<8x8xf32>, vector<8x8xf32>, vector<8x8xf32> -> vector<8x8xf32>
    %433 = vector.extract_strided_slice %291 {offsets = [8, 0], sizes = [8, 8], strides = [1, 1]} : vector<16x8xf32> to vector<8x8xf32>
    %434 = vector.extract_strided_slice %319 {offsets = [8, 0], sizes = [8, 8], strides = [1, 1]} : vector<16x8xf32> to vector<8x8xf32>
    %435 = vector.extract_strided_slice %347 {offsets = [8, 0], sizes = [8, 8], strides = [1, 1]} : vector<16x8xf32> to vector<8x8xf32>
    %cst_314 = arith.constant dense<0.000000e+00> : vector<8x8xf32>
    %436 = tpu.matmul %433, %434, %cst_314 {dimension_numbers = #tpu.dot_dimension_numbers<[1], [1], [0], [0], [0, 0, 1, 0], [], []>} : vector<8x8xf32>, vector<8x8xf32>, vector<8x8xf32> -> vector<8x8xf32>
    %cst_315 = arith.constant dense<0xFF800000> : vector<8xf32>
    %437 = vector.multi_reduction <maximumf>, %436, %cst_315 [1] : vector<8x8xf32> to vector<8xf32>
    %438 = vector.shape_cast %437 : vector<8xf32> to vector<8x1xf32>
    %439 = vector.broadcast %438 : vector<8x1xf32> to vector<8x8xf32>
    %440 = arith.subf %436, %439 : vector<8x8xf32>
    %441 = math.exp %440 : vector<8x8xf32>
    %cst_316 = arith.constant dense<0.000000e+00> : vector<8xf32>
    %442 = vector.multi_reduction <add>, %441, %cst_316 [1] : vector<8x8xf32> to vector<8xf32>
    %443 = vector.shape_cast %442 : vector<8xf32> to vector<8x1xf32>
    %444 = vector.broadcast %443 : vector<8x1xf32> to vector<8x8xf32>
    %445 = arith.divf %441, %444 : vector<8x8xf32>
    %cst_317 = arith.constant dense<0.000000e+00> : vector<8x8xf32>
    %446 = tpu.matmul %445, %435, %cst_317 {dimension_numbers = #tpu.dot_dimension_numbers<[1], [0], [0], [1], [0, 0, 1, 1], [], []>} : vector<8x8xf32>, vector<8x8xf32>, vector<8x8xf32> -> vector<8x8xf32>
    %447 = vector.extract_strided_slice %298 {offsets = [8, 0], sizes = [8, 8], strides = [1, 1]} : vector<16x8xf32> to vector<8x8xf32>
    %448 = vector.extract_strided_slice %326 {offsets = [8, 0], sizes = [8, 8], strides = [1, 1]} : vector<16x8xf32> to vector<8x8xf32>
    %449 = vector.extract_strided_slice %354 {offsets = [8, 0], sizes = [8, 8], strides = [1, 1]} : vector<16x8xf32> to vector<8x8xf32>
    %cst_318 = arith.constant dense<0.000000e+00> : vector<8x8xf32>
    %450 = tpu.matmul %447, %448, %cst_318 {dimension_numbers = #tpu.dot_dimension_numbers<[1], [1], [0], [0], [0, 0, 1, 0], [], []>} : vector<8x8xf32>, vector<8x8xf32>, vector<8x8xf32> -> vector<8x8xf32>
    %cst_319 = arith.constant dense<0xFF800000> : vector<8xf32>
    %451 = vector.multi_reduction <maximumf>, %450, %cst_319 [1] : vector<8x8xf32> to vector<8xf32>
    %452 = vector.shape_cast %451 : vector<8xf32> to vector<8x1xf32>
    %453 = vector.broadcast %452 : vector<8x1xf32> to vector<8x8xf32>
    %454 = arith.subf %450, %453 : vector<8x8xf32>
    %455 = math.exp %454 : vector<8x8xf32>
    %cst_320 = arith.constant dense<0.000000e+00> : vector<8xf32>
    %456 = vector.multi_reduction <add>, %455, %cst_320 [1] : vector<8x8xf32> to vector<8xf32>
    %457 = vector.shape_cast %456 : vector<8xf32> to vector<8x1xf32>
    %458 = vector.broadcast %457 : vector<8x1xf32> to vector<8x8xf32>
    %459 = arith.divf %455, %458 : vector<8x8xf32>
    %cst_321 = arith.constant dense<0.000000e+00> : vector<8x8xf32>
    %460 = tpu.matmul %459, %449, %cst_321 {dimension_numbers = #tpu.dot_dimension_numbers<[1], [0], [0], [1], [0, 0, 1, 1], [], []>} : vector<8x8xf32>, vector<8x8xf32>, vector<8x8xf32> -> vector<8x8xf32>
    %461 = vector.extract_strided_slice %305 {offsets = [8, 0], sizes = [8, 8], strides = [1, 1]} : vector<16x8xf32> to vector<8x8xf32>
    %462 = vector.extract_strided_slice %333 {offsets = [8, 0], sizes = [8, 8], strides = [1, 1]} : vector<16x8xf32> to vector<8x8xf32>
    %463 = vector.extract_strided_slice %361 {offsets = [8, 0], sizes = [8, 8], strides = [1, 1]} : vector<16x8xf32> to vector<8x8xf32>
    %cst_322 = arith.constant dense<0.000000e+00> : vector<8x8xf32>
    %464 = tpu.matmul %461, %462, %cst_322 {dimension_numbers = #tpu.dot_dimension_numbers<[1], [1], [0], [0], [0, 0, 1, 0], [], []>} : vector<8x8xf32>, vector<8x8xf32>, vector<8x8xf32> -> vector<8x8xf32>
    %cst_323 = arith.constant dense<0xFF800000> : vector<8xf32>
    %465 = vector.multi_reduction <maximumf>, %464, %cst_323 [1] : vector<8x8xf32> to vector<8xf32>
    %466 = vector.shape_cast %465 : vector<8xf32> to vector<8x1xf32>
    %467 = vector.broadcast %466 : vector<8x1xf32> to vector<8x8xf32>
    %468 = arith.subf %464, %467 : vector<8x8xf32>
    %469 = math.exp %468 : vector<8x8xf32>
    %cst_324 = arith.constant dense<0.000000e+00> : vector<8xf32>
    %470 = vector.multi_reduction <add>, %469, %cst_324 [1] : vector<8x8xf32> to vector<8xf32>
    %471 = vector.shape_cast %470 : vector<8xf32> to vector<8x1xf32>
    %472 = vector.broadcast %471 : vector<8x1xf32> to vector<8x8xf32>
    %473 = arith.divf %469, %472 : vector<8x8xf32>
    %cst_325 = arith.constant dense<0.000000e+00> : vector<8x8xf32>
    %474 = tpu.matmul %473, %463, %cst_325 {dimension_numbers = #tpu.dot_dimension_numbers<[1], [0], [0], [1], [0, 0, 1, 1], [], []>} : vector<8x8xf32>, vector<8x8xf32>, vector<8x8xf32> -> vector<8x8xf32>
    %475 = tpu.concatenate %432, %446, %460, %474 in 1 : vector<8x8xf32>, vector<8x8xf32>, vector<8x8xf32>, vector<8x8xf32> -> vector<8x32xf32>
    %476 = tpu.concatenate %418, %475 in 0 : vector<8x32xf32>, vector<8x32xf32> -> vector<16x32xf32>
    %c1_326 = arith.constant 1 : index
    %c0_327 = arith.constant 0 : index
    %c0_328 = arith.constant 0 : index
    %477 = vector.load %arg10[%c1_326, %c0_327, %c0_328] : memref<2x32x32xf32, #tpu.memory_space<vmem>>, vector<1x32x32xf32>
    %478 = vector.shape_cast %477 : vector<1x32x32xf32> to vector<32x32xf32>
    %cst_329 = arith.constant dense<0.000000e+00> : vector<16x32xf32>
    %479 = tpu.matmul %476, %478, %cst_329 {dimension_numbers = #tpu.dot_dimension_numbers<[1], [0], [0], [1], [0, 0, 1, 1], [], []>} : vector<16x32xf32>, vector<32x32xf32>, vector<16x32xf32> -> vector<16x32xf32>
    %c1_330 = arith.constant 1 : index
    %c0_331 = arith.constant 0 : index
    %c0_332 = arith.constant 0 : index
    %480 = vector.load %arg11[%c1_330, %c0_331, %c0_332] : memref<2x1x32xf32, #tpu.memory_space<vmem>>, vector<1x1x32xf32>
    %481 = vector.shape_cast %480 : vector<1x1x32xf32> to vector<1x32xf32>
    %482 = vector.broadcast %481 : vector<1x32xf32> to vector<16x32xf32>
    %483 = arith.addf %479, %482 : vector<16x32xf32>
    %484 = arith.addf %277, %483 : vector<16x32xf32>
    %c1_333 = arith.constant 1 : index
    %c0_334 = arith.constant 0 : index
    %c0_335 = arith.constant 0 : index
    %485 = vector.load %arg16[%c1_333, %c0_334, %c0_335] : memref<2x1x32xf32, #tpu.memory_space<vmem>>, vector<1x1x32xf32>
    %486 = vector.shape_cast %485 : vector<1x1x32xf32> to vector<1x32xf32>
    %c1_336 = arith.constant 1 : index
    %c0_337 = arith.constant 0 : index
    %c0_338 = arith.constant 0 : index
    %487 = vector.load %arg17[%c1_336, %c0_337, %c0_338] : memref<2x1x32xf32, #tpu.memory_space<vmem>>, vector<1x1x32xf32>
    %488 = vector.shape_cast %487 : vector<1x1x32xf32> to vector<1x32xf32>
    %cst_339 = arith.constant dense<0.000000e+00> : vector<16xf32>
    %489 = vector.multi_reduction <add>, %484, %cst_339 [1] : vector<16x32xf32> to vector<16xf32>
    %490 = vector.shape_cast %489 : vector<16xf32> to vector<16x1xf32>
    %cst_340 = arith.constant 3.200000e+01 : f32
    %491 = vector.broadcast %cst_340 : f32 to vector<16x1xf32>
    %492 = arith.divf %490, %491 : vector<16x1xf32>
    %493 = vector.broadcast %492 : vector<16x1xf32> to vector<16x32xf32>
    %494 = arith.subf %484, %493 : vector<16x32xf32>
    %495 = arith.mulf %494, %494 : vector<16x32xf32>
    %cst_341 = arith.constant dense<0.000000e+00> : vector<16xf32>
    %496 = vector.multi_reduction <add>, %495, %cst_341 [1] : vector<16x32xf32> to vector<16xf32>
    %497 = vector.shape_cast %496 : vector<16xf32> to vector<16x1xf32>
    %cst_342 = arith.constant 3.200000e+01 : f32
    %498 = vector.broadcast %cst_342 : f32 to vector<16x1xf32>
    %499 = arith.divf %497, %498 : vector<16x1xf32>
    %cst_343 = arith.constant 9.99999974E-6 : f32
    %500 = vector.broadcast %cst_343 : f32 to vector<16x1xf32>
    %501 = arith.addf %499, %500 : vector<16x1xf32>
    %502 = math.rsqrt %501 : vector<16x1xf32>
    %503 = vector.broadcast %502 : vector<16x1xf32> to vector<16x32xf32>
    %504 = arith.mulf %494, %503 : vector<16x32xf32>
    %505 = vector.broadcast %486 : vector<1x32xf32> to vector<16x32xf32>
    %506 = arith.mulf %504, %505 : vector<16x32xf32>
    %507 = vector.broadcast %488 : vector<1x32xf32> to vector<16x32xf32>
    %508 = arith.addf %506, %507 : vector<16x32xf32>
    %c1_344 = arith.constant 1 : index
    %c0_345 = arith.constant 0 : index
    %c0_346 = arith.constant 0 : index
    %509 = vector.load %arg12[%c1_344, %c0_345, %c0_346] : memref<2x32x64xf32, #tpu.memory_space<vmem>>, vector<1x32x64xf32>
    %510 = vector.shape_cast %509 : vector<1x32x64xf32> to vector<32x64xf32>
    %cst_347 = arith.constant dense<0.000000e+00> : vector<16x64xf32>
    %511 = tpu.matmul %508, %510, %cst_347 {dimension_numbers = #tpu.dot_dimension_numbers<[1], [0], [0], [1], [0, 0, 1, 1], [], []>} : vector<16x32xf32>, vector<32x64xf32>, vector<16x64xf32> -> vector<16x64xf32>
    %c1_348 = arith.constant 1 : index
    %c0_349 = arith.constant 0 : index
    %c0_350 = arith.constant 0 : index
    %512 = vector.load %arg13[%c1_348, %c0_349, %c0_350] : memref<2x1x64xf32, #tpu.memory_space<vmem>>, vector<1x1x64xf32>
    %513 = vector.shape_cast %512 : vector<1x1x64xf32> to vector<1x64xf32>
    %514 = vector.broadcast %513 : vector<1x64xf32> to vector<16x64xf32>
    %515 = arith.addf %511, %514 : vector<16x64xf32>
    %cst_351 = arith.constant 0.000000e+00 : f32
    %516 = vector.broadcast %cst_351 : f32 to vector<16x64xf32>
    %517 = arith.maximumf %515, %516 : vector<16x64xf32>
    %c1_352 = arith.constant 1 : index
    %c0_353 = arith.constant 0 : index
    %c0_354 = arith.constant 0 : index
    %518 = vector.load %arg14[%c1_352, %c0_353, %c0_354] : memref<2x64x32xf32, #tpu.memory_space<vmem>>, vector<1x64x32xf32>
    %519 = vector.shape_cast %518 : vector<1x64x32xf32> to vector<64x32xf32>
    %cst_355 = arith.constant dense<0.000000e+00> : vector<16x32xf32>
    %520 = tpu.matmul %517, %519, %cst_355 {dimension_numbers = #tpu.dot_dimension_numbers<[1], [0], [0], [1], [0, 0, 1, 1], [], []>} : vector<16x64xf32>, vector<64x32xf32>, vector<16x32xf32> -> vector<16x32xf32>
    %c1_356 = arith.constant 1 : index
    %c0_357 = arith.constant 0 : index
    %c0_358 = arith.constant 0 : index
    %521 = vector.load %arg15[%c1_356, %c0_357, %c0_358] : memref<2x1x32xf32, #tpu.memory_space<vmem>>, vector<1x1x32xf32>
    %522 = vector.shape_cast %521 : vector<1x1x32xf32> to vector<1x32xf32>
    %523 = vector.broadcast %522 : vector<1x32xf32> to vector<16x32xf32>
    %524 = arith.addf %520, %523 : vector<16x32xf32>
    %525 = arith.addf %508, %524 : vector<16x32xf32>
    %c1_359 = arith.constant 1 : index
    %c0_360 = arith.constant 0 : index
    %c0_361 = arith.constant 0 : index
    %526 = vector.load %arg18[%c1_359, %c0_360, %c0_361] : memref<2x1x32xf32, #tpu.memory_space<vmem>>, vector<1x1x32xf32>
    %527 = vector.shape_cast %526 : vector<1x1x32xf32> to vector<1x32xf32>
    %c1_362 = arith.constant 1 : index
    %c0_363 = arith.constant 0 : index
    %c0_364 = arith.constant 0 : index
    %528 = vector.load %arg19[%c1_362, %c0_363, %c0_364] : memref<2x1x32xf32, #tpu.memory_space<vmem>>, vector<1x1x32xf32>
    %529 = vector.shape_cast %528 : vector<1x1x32xf32> to vector<1x32xf32>
    %cst_365 = arith.constant dense<0.000000e+00> : vector<16xf32>
    %530 = vector.multi_reduction <add>, %525, %cst_365 [1] : vector<16x32xf32> to vector<16xf32>
    %531 = vector.shape_cast %530 : vector<16xf32> to vector<16x1xf32>
    %cst_366 = arith.constant 3.200000e+01 : f32
    %532 = vector.broadcast %cst_366 : f32 to vector<16x1xf32>
    %533 = arith.divf %531, %532 : vector<16x1xf32>
    %534 = vector.broadcast %533 : vector<16x1xf32> to vector<16x32xf32>
    %535 = arith.subf %525, %534 : vector<16x32xf32>
    %536 = arith.mulf %535, %535 : vector<16x32xf32>
    %cst_367 = arith.constant dense<0.000000e+00> : vector<16xf32>
    %537 = vector.multi_reduction <add>, %536, %cst_367 [1] : vector<16x32xf32> to vector<16xf32>
    %538 = vector.shape_cast %537 : vector<16xf32> to vector<16x1xf32>
    %cst_368 = arith.constant 3.200000e+01 : f32
    %539 = vector.broadcast %cst_368 : f32 to vector<16x1xf32>
    %540 = arith.divf %538, %539 : vector<16x1xf32>
    %cst_369 = arith.constant 9.99999974E-6 : f32
    %541 = vector.broadcast %cst_369 : f32 to vector<16x1xf32>
    %542 = arith.addf %540, %541 : vector<16x1xf32>
    %543 = math.rsqrt %542 : vector<16x1xf32>
    %544 = vector.broadcast %543 : vector<16x1xf32> to vector<16x32xf32>
    %545 = arith.mulf %535, %544 : vector<16x32xf32>
    %546 = vector.broadcast %527 : vector<1x32xf32> to vector<16x32xf32>
    %547 = arith.mulf %545, %546 : vector<16x32xf32>
    %548 = vector.broadcast %529 : vector<1x32xf32> to vector<16x32xf32>
    %549 = arith.addf %547, %548 : vector<16x32xf32>
    %c0_370 = arith.constant 0 : index
    %c0_371 = arith.constant 0 : index
    %550 = vector.load %arg20[%c0_370, %c0_371] : memref<32x128xf32, #tpu.memory_space<vmem>>, vector<32x128xf32>
    %cst_372 = arith.constant dense<0.000000e+00> : vector<16x128xf32>
    %551 = tpu.matmul %549, %550, %cst_372 {dimension_numbers = #tpu.dot_dimension_numbers<[1], [0], [0], [1], [0, 0, 1, 1], [], []>} : vector<16x32xf32>, vector<32x128xf32>, vector<16x128xf32> -> vector<16x128xf32>
    %c0_373 = arith.constant 0 : index
    %c0_374 = arith.constant 0 : index
    %552 = vector.load %arg21[%c0_373, %c0_374] : memref<1x128xf32, #tpu.memory_space<vmem>>, vector<1x128xf32>
    %553 = vector.broadcast %552 : vector<1x128xf32> to vector<16x128xf32>
    %554 = arith.addf %551, %553 : vector<16x128xf32>
    %c0_375 = arith.constant 0 : index
    %c0_376 = arith.constant 0 : index
    %555 = vector.load %arg22[%c0_375, %c0_376] : memref<16x128xf32, #tpu.memory_space<vmem>>, vector<16x128xf32>
    tpu.vector_store %arg22[%c0_375, %c0_376], %554 {strides = array<i32>} : memref<16x128xf32, #tpu.memory_space<vmem>>, vector<16x128xf32>,
    return
  }
  func.func @transform_0(%arg0: i32) -> (i32, i32) {
    %c0_i32 = arith.constant 0 : i32
    %c0_i32_0 = arith.constant 0 : i32
    %c0_i32_1 = arith.constant 0 : i32
    return %c0_i32, %c0_i32_0 : i32, i32
  }
  func.func @transform_1(%arg0: i32) -> (i32, i32) {
    %c0_i32 = arith.constant 0 : i32
    %c0_i32_0 = arith.constant 0 : i32
    %c0_i32_1 = arith.constant 0 : i32
    return %c0_i32, %c0_i32_0 : i32, i32
  }
  func.func @transform_2(%arg0: i32) -> (i32, i32) {
    %c0_i32 = arith.constant 0 : i32
    %c0_i32_0 = arith.constant 0 : i32
    %c0_i32_1 = arith.constant 0 : i32
    return %c0_i32, %c0_i32_0 : i32, i32
  }
  func.func @transform_3(%arg0: i32) -> (i32, i32, i32, i32) {
    %c0_i32 = arith.constant 0 : i32
    %c0_i32_0 = arith.constant 0 : i32
    %c0_i32_1 = arith.constant 0 : i32
    %c0_i32_2 = arith.constant 0 : i32
    %c0_i32_3 = arith.constant 0 : i32
    return %c0_i32, %c0_i32_0, %c0_i32_1, %c0_i32_2 : i32, i32, i32, i32
  }
  func.func @transform_4(%arg0: i32) -> (i32, i32, i32, i32) {
    %c0_i32 = arith.constant 0 : i32
    %c0_i32_0 = arith.constant 0 : i32
    %c0_i32_1 = arith.constant 0 : i32
    %c0_i32_2 = arith.constant 0 : i32
    %c0_i32_3 = arith.constant 0 : i32
    return %c0_i32, %c0_i32_0, %c0_i32_1, %c0_i32_2 : i32, i32, i32, i32
  }
  func.func @transform_5(%arg0: i32) -> (i32, i32, i32, i32) {
    %c0_i32 = arith.constant 0 : i32
    %c0_i32_0 = arith.constant 0 : i32
    %c0_i32_1 = arith.constant 0 : i32
    %c0_i32_2 = arith.constant 0 : i32
    %c0_i32_3 = arith.constant 0 : i32
    return %c0_i32, %c0_i32_0, %c0_i32_1, %c0_i32_2 : i32, i32, i32, i32
  }
  func.func @transform_6(%arg0: i32) -> (i32, i32, i32, i32) {
    %c0_i32 = arith.constant 0 : i32
    %c0_i32_0 = arith.constant 0 : i32
    %c0_i32_1 = arith.constant 0 : i32
    %c0_i32_2 = arith.constant 0 : i32
    %c0_i32_3 = arith.constant 0 : i32
    return %c0_i32, %c0_i32_0, %c0_i32_1, %c0_i32_2 : i32, i32, i32, i32
  }
  func.func @transform_7(%arg0: i32) -> (i32, i32, i32, i32) {
    %c0_i32 = arith.constant 0 : i32
    %c0_i32_0 = arith.constant 0 : i32
    %c0_i32_1 = arith.constant 0 : i32
    %c0_i32_2 = arith.constant 0 : i32
    %c0_i32_3 = arith.constant 0 : i32
    return %c0_i32, %c0_i32_0, %c0_i32_1, %c0_i32_2 : i32, i32, i32, i32
  }
  func.func @transform_8(%arg0: i32) -> (i32, i32, i32, i32) {
    %c0_i32 = arith.constant 0 : i32
    %c0_i32_0 = arith.constant 0 : i32
    %c0_i32_1 = arith.constant 0 : i32
    %c0_i32_2 = arith.constant 0 : i32
    %c0_i32_3 = arith.constant 0 : i32
    return %c0_i32, %c0_i32_0, %c0_i32_1, %c0_i32_2 : i32, i32, i32, i32
  }
  func.func @transform_9(%arg0: i32) -> (i32, i32, i32) {
    %c0_i32 = arith.constant 0 : i32
    %c0_i32_0 = arith.constant 0 : i32
    %c0_i32_1 = arith.constant 0 : i32
    %c0_i32_2 = arith.constant 0 : i32
    return %c0_i32, %c0_i32_0, %c0_i32_1 : i32, i32, i32
  }
  func.func @transform_10(%arg0: i32) -> (i32, i32, i32) {
    %c0_i32 = arith.constant 0 : i32
    %c0_i32_0 = arith.constant 0 : i32
    %c0_i32_1 = arith.constant 0 : i32
    %c0_i32_2 = arith.constant 0 : i32
    return %c0_i32, %c0_i32_0, %c0_i32_1 : i32, i32, i32
  }
  func.func @transform_11(%arg0: i32) -> (i32, i32, i32) {
    %c0_i32 = arith.constant 0 : i32
    %c0_i32_0 = arith.constant 0 : i32
    %c0_i32_1 = arith.constant 0 : i32
    %c0_i32_2 = arith.constant 0 : i32
    return %c0_i32, %c0_i32_0, %c0_i32_1 : i32, i32, i32
  }
  func.func @transform_12(%arg0: i32) -> (i32, i32, i32) {
    %c0_i32 = arith.constant 0 : i32
    %c0_i32_0 = arith.constant 0 : i32
    %c0_i32_1 = arith.constant 0 : i32
    %c0_i32_2 = arith.constant 0 : i32
    return %c0_i32, %c0_i32_0, %c0_i32_1 : i32, i32, i32
  }
  func.func @transform_13(%arg0: i32) -> (i32, i32, i32) {
    %c0_i32 = arith.constant 0 : i32
    %c0_i32_0 = arith.constant 0 : i32
    %c0_i32_1 = arith.constant 0 : i32
    %c0_i32_2 = arith.constant 0 : i32
    return %c0_i32, %c0_i32_0, %c0_i32_1 : i32, i32, i32
  }
  func.func @transform_14(%arg0: i32) -> (i32, i32, i32) {
    %c0_i32 = arith.constant 0 : i32
    %c0_i32_0 = arith.constant 0 : i32
    %c0_i32_1 = arith.constant 0 : i32
    %c0_i32_2 = arith.constant 0 : i32
    return %c0_i32, %c0_i32_0, %c0_i32_1 : i32, i32, i32
  }
  func.func @transform_15(%arg0: i32) -> (i32, i32, i32) {
    %c0_i32 = arith.constant 0 : i32
    %c0_i32_0 = arith.constant 0 : i32
    %c0_i32_1 = arith.constant 0 : i32
    %c0_i32_2 = arith.constant 0 : i32
    return %c0_i32, %c0_i32_0, %c0_i32_1 : i32, i32, i32
  }
  func.func @transform_16(%arg0: i32) -> (i32, i32, i32) {
    %c0_i32 = arith.constant 0 : i32
    %c0_i32_0 = arith.constant 0 : i32
    %c0_i32_1 = arith.constant 0 : i32
    %c0_i32_2 = arith.constant 0 : i32
    return %c0_i32, %c0_i32_0, %c0_i32_1 : i32, i32, i32
  }
  func.func @transform_17(%arg0: i32) -> (i32, i32, i32) {
    %c0_i32 = arith.constant 0 : i32
    %c0_i32_0 = arith.constant 0 : i32
    %c0_i32_1 = arith.constant 0 : i32
    %c0_i32_2 = arith.constant 0 : i32
    return %c0_i32, %c0_i32_0, %c0_i32_1 : i32, i32, i32
  }
  func.func @transform_18(%arg0: i32) -> (i32, i32, i32) {
    %c0_i32 = arith.constant 0 : i32
    %c0_i32_0 = arith.constant 0 : i32
    %c0_i32_1 = arith.constant 0 : i32
    %c0_i32_2 = arith.constant 0 : i32
    return %c0_i32, %c0_i32_0, %c0_i32_1 : i32, i32, i32
  }
  func.func @transform_19(%arg0: i32) -> (i32, i32) {
    %c0_i32 = arith.constant 0 : i32
    %c0_i32_0 = arith.constant 0 : i32
    %c0_i32_1 = arith.constant 0 : i32
    return %c0_i32, %c0_i32_0 : i32, i32
  }
  func.func @transform_20(%arg0: i32) -> (i32, i32) {
    %c0_i32 = arith.constant 0 : i32
    %c0_i32_0 = arith.constant 0 : i32
    %c0_i32_1 = arith.constant 0 : i32
    return %c0_i32, %c0_i32_0 : i32, i32
  }
  func.func @transform_21(%arg0: i32) -> (i32, i32) {
    %c0_i32 = arith.constant 0 : i32
    %c0_i32_0 = arith.constant 0 : i32
    %c0_i32_1 = arith.constant 0 : i32
    return %c0_i32, %c0_i32_0 : i32, i32
  }
}

</mosaic_0001>

<bundles_post_ra>
// kernel: tpu_custom_call.1
= control target key start
LH: loop header
LB: loop body
LE: loop exit
PB: predicated region body
PF: predicated region fallthrough
CT: control target
= control target key end

     0   :  { %s8396_s0 = inlined_call_operand.vmem [shape: f32[16,128], index: 0, kind: input, shape index: {}]   ;;  %s8397_s1 = inlined_call_operand.vmem [shape: f32[128,32], index: 1, kind: input, shape index: {}]   ;;  %s8398_s2 = inlined_call_operand.vmem [shape: f32[1,32], index: 2, kind: input, shape index: {}]   ;;  %s8399_s3 = inlined_call_operand.vmem [shape: f32[2,4,32,8], index: 3, kind: input, shape index: {}]   ;;  %s8400_s4 = inlined_call_operand.vmem [shape: f32[2,4,32,8], index: 4, kind: input, shape index: {}]   ;;  %s8401_s5 = inlined_call_operand.vmem [shape: f32[2,4,32,8], index: 5, kind: input, shape index: {}]   ;;  %s8402_s6 = inlined_call_operand.vmem [shape: f32[2,4,1,8], index: 6, kind: input, shape index: {}]   ;;  %s8403_s7 = inlined_call_operand.vmem [shape: f32[2,4,1,8], index: 7, kind: input, shape index: {}]   ;;  %s8404_s8 = inlined_call_operand.vmem [shape: f32[2,4,1,8], index: 8, kind: input, shape index: {}]   ;;  %s8405_s9 = inlined_call_operand.vmem [shape: f32[2,32,32], index: 9, kind: input, shape index: {}]   ;;  %s8406_s10 = inlined_call_operand.vmem [shape: f32[2,1,32], index: 10, kind: input, shape index: {}]   ;;  %s8407_s11 = inlined_call_operand.vmem [shape: f32[2,32,64], index: 11, kind: input, shape index: {}]   ;;  %s8408_s12 = inlined_call_operand.vmem [shape: f32[2,1,64], index: 12, kind: input, shape index: {}]   ;;  %s8409_s13 = inlined_call_operand.vmem [shape: f32[2,64,32], index: 13, kind: input, shape index: {}]   ;;  %s8410_s14 = inlined_call_operand.vmem [shape: f32[2,1,32], index: 14, kind: input, shape index: {}]   ;;  %s8411_s15 = inlined_call_operand.vmem [shape: f32[2,1,32], index: 15, kind: input, shape index: {}]   ;;  %s8412_s16 = inlined_call_operand.vmem [shape: f32[2,1,32], index: 16, kind: input, shape index: {}]   ;;  %s8413_s17 = inlined_call_operand.vmem [shape: f32[2,1,32], index: 17, kind: input, shape index: {}]   ;;  %s8414_s18 = inlined_call_operand.vmem [shape: f32[2,1,32], index: 18, kind: input, shape index: {}]   ;;  %s8415_s19 = inlined_call_operand.vmem [shape: f32[32,128], index: 19, kind: input, shape index: {}]   ;;  %s8416_s20 = inlined_call_operand.vmem [shape: f32[1,128], index: 20, kind: input, shape index: {}]   ;;  %s8417_s21 = inlined_call_operand.hbm [shape: f32[16,128], index: 21, kind: output, shape index: {}]  }
   0x1   :  { %8425 = sst [smem:[#allocation5_spill]] %s8396_s0 }
   0x2   :  { %8426 = sst [smem:[#allocation6_spill]] %s8397_s1 }
   0x3   :  { %8427 = sst [smem:[#allocation7_spill]] %s8398_s2 }
   0x4   :  { %8428 = sst [smem:[#allocation8_spill]] %s8399_s3 }
   0x5   :  { %8429 = sst [smem:[#allocation9_spill]] %s8400_s4 }
   0x6   :  { %8430 = sst [smem:[#allocation10_spill]] %s8401_s5 }
   0x7   :  { %s8431_s26 = sld [smem:[#allocation6_spill]]  ;;  %s8432_s27 = sld [smem:[#allocation5_spill]] }
   0x8   :  { %s8433_s4 = sld [smem:[#allocation8_spill]] }
   0xd   :  { %v71_v0 = vld [vmem:[%s8431_s26] sm:$0xff]  ;;  %v72_v1 = vld [vmem:[%s8431_s26 + $0x8] sm:$0xff]  ;;  %v73_v2 = vld [vmem:[%s8431_s26 + $0x10] sm:$0xff] }
   0xe   :  { %v6887_v3 = vpack.c.bf16 %v72_v1, %v71_v0  ;;  %v74_v4 = vld [vmem:[%s8431_s26 + $0x18] sm:$0xff]  ;;  %v75_v6 = vld [vmem:[%s8431_s26 + $0x20] sm:$0xff]  ;;  %v76_v7 = vld [vmem:[%s8431_s26 + $0x28] sm:$0xff] }
   0xf   :  { %v6891_v5 = vpack.c.bf16 %v74_v4, %v73_v2  ;;  %v6895_v8 = vpack.c.bf16 %v76_v7, %v75_v6  ;;  %v77_v9 = vld [vmem:[%s8431_s26 + $0x30] sm:$0xff]  ;;  %v69_v10 = vld [vmem:[%s8432_s27] sm:$0xff]  ;;  %v78_v11 = vld [vmem:[%s8431_s26 + $0x38] sm:$0xff] }
  0x10   :  { %6888 = vmatprep.subr.bf16.mxu0 %v6887_v3  ;;  %6367 = vmatprep.mubr.f32.mxu0 %v69_v10  ;;  %v169_v12 = vld [vmem:[%s8433_s4] sm:$0xff]  ;;  %v170_v13 = vld [vmem:[%s8433_s4 + $0x8] sm:$0xff] }
  0x11   :  { %6890 = vmatpush3.bf16.msra.mxu0 %v6887_v3  ;;  %v6919_v14 = vpack.c.bf16 %v170_v13, %v169_v12 }
  0x12   :  { %6892 = vmatprep.subr.bf16.mxu0 %v6891_v5 }
  0x13   :  { %26 = vsyncpa [#allocation3], 0  ;;  %v6899_v15 = vpack.c.bf16 %v78_v11, %v77_v9  ;;  %6920 = vmatprep.subr.bf16.mxu1 %v6919_v14  ;;  %v79_v16 = vld [vmem:[%s8431_s26 + $0x40] sm:$0xff]  ;;  %v80_v17 = vld [vmem:[%s8431_s26 + $0x48] sm:$0xff]  ;;  %s8434_s3 = sld [smem:[#allocation9_spill]]  ;;  %s8435_s24 = sld [smem:[#allocation7_spill]] }
  0x14   :  { %6922 = vmatpush3.bf16.msra.mxu1 %v6919_v14  ;;  %v6903_v18 = vpack.c.bf16 %v80_v17, %v79_v16  ;;  %v81_v19 = vld [vmem:[%s8431_s26 + $0x50] sm:$0xff]  ;;  %v82_v20 = vld [vmem:[%s8431_s26 + $0x58] sm:$0xff]  ;;  %v83_v22 = vld [vmem:[%s8431_s26 + $0x60] sm:$0xff]  ;;  %vm180_vm0 = vcmask 261120   ;;  %s8436_s25 = sld [smem:[#allocation10_spill]]  ;;  %vm7295_vm1 = vmmov 0  }
  0x15   :  { %6894 = vmatpush3.bf16.msra.mxu0 %v6891_v5  ;;  %v6907_v21 = vpack.c.bf16 %v82_v20, %v81_v19  ;;  %v84_v23 = vld [vmem:[%s8431_s26 + $0x68] sm:$0xff]  ;;  %v85_v25 = vld [vmem:[%s8431_s26 + $0x70] sm:$0xff]  ;;  %v86_v26 = vld [vmem:[%s8431_s26 + $0x78] sm:$0xff]  ;;  %vm1226_vm2 = vcmask 64512   ;;  %s7297_s0 = smov 16   ;;  %s8423_s23 = smov 24  }
  0x16   :  { %6896 = vmatprep.subr.bf16.mxu0 %v6895_v8  ;;  %v6911_v24 = vpack.c.bf16 %v84_v23, %v83_v22  ;;  %v6915_v27 = vpack.c.bf16 %v86_v26, %v85_v25  ;;  %v70_v31 = vld [vmem:[%s8432_s27 + $0x8] sm:$0xff]  ;;  %v171_v32 = vld [vmem:[%s8433_s4 + $0x10] sm:$0xff]  ;;  %v172_v33 = vld [vmem:[%s8433_s4 + $0x18] sm:$0xff]  ;;  %vm1880_vm3 = vcmask 130048   ;;  %vm1882_vm4 = vcmask 195584   ;;  %s8437_s1 = smov 24  }
  0x17   :  { %v6923_v35 = vpack.c.bf16 %v172_v33, %v171_v32  ;;  %v5785_v38 = vld [vmem:[%s8433_s4 + $0x20] sm:$0xff]  ;;  %v5786_v39 = vld [vmem:[%s8433_s4 + $0x28] sm:$0xff]  ;;  %v5787_v46 = vld [vmem:[%s8433_s4 + $0x30] sm:$0xff]  ;;  %vm2787_vm5 = vcmask 523264  }
  0x18   :  { %v6927_v41 = vpack.c.bf16 %v5786_v39, %v5785_v38  ;;  %v5788_v48 = vld [vmem:[%s8433_s4 + $0x38] sm:$0xff]  ;;  %v5793_v53 = vld [vmem:[%s8433_s4 + $0x40] sm:$0xff]  ;;  %v5794_v56 = vld [vmem:[%s8433_s4 + $0x48] sm:$0xff]  ;;  %v7294_v39 = vmov 0.0  }
  0x19   :  { %6898 = vmatpush3.bf16.msra.mxu0 %v6895_v8  ;;  %v526_v28 = vld [vmem:[%s8434_s3] sm:$0xff]  ;;  %v527_v29 = vld [vmem:[%s8434_s3 + $0x8] sm:$0xff]  ;;  %v528_v34 = vld [vmem:[%s8434_s3 + $0x10] sm:$0xff]  ;;  %6924 = vmatprep.subr.bf16.mxu1 %v6923_v35  ;;  %v6931_v54 = vpack.c.bf16 %v5788_v48, %v5787_v46  ;;  %v6935_v59 = vpack.c.bf16 %v5794_v56, %v5793_v53 }
  0x1a   :  { %6900 = vmatprep.subr.bf16.mxu0 %v6899_v15  ;;  %v6951_v30 = vpack.c.bf16 %v527_v29, %v526_v28  ;;  %v529_v36 = vld [vmem:[%s8434_s3 + $0x18] sm:$0xff]  ;;  %6926 = vmatpush3.bf16.msra.mxu1 %v6923_v35  ;;  %v5820_v40 = vld [vmem:[%s8434_s3 + $0x40] sm:$0xff]  ;;  %v5821_v42 = vld [vmem:[%s8434_s3 + $0x48] sm:$0xff] }
  0x1b   :  { %v6955_v37 = vpack.c.bf16 %v529_v36, %v528_v34  ;;  %v6967_v43 = vpack.c.bf16 %v5821_v42, %v5820_v40  ;;  %6928 = vmatprep.subr.bf16.mxu1 %v6927_v41  ;;  %v5781_v44 = vld [vmem:[%s8435_s24] ss:$0 sm:$0xff]  ;;  %v5822_v49 = vld [vmem:[%s8434_s3 + $0x50] sm:$0xff]  ;;  %v5823_v50 = vld [vmem:[%s8434_s3 + $0x58] sm:$0xff]  ;;  %s7296_s24 = smov 8  }
  0x1c   :  { %v6971_v55 = vpack.c.bf16 %v5823_v50, %v5822_v49  ;;  %v876_v57 = vld [vmem:[%s8436_s25] sm:$0xff]  ;;  %v877_v58 = vld [vmem:[%s8436_s25 + $0x8] sm:$0xff]  ;;  %v5795_v61 = vld [vmem:[%s8433_s4 + $0x50] sm:$0xff] }
  0x1d   :  { %6902 = vmatpush3.bf16.msra.mxu0 %v6899_v15  ;;  %v6983_v60 = vpack.c.bf16 %v877_v58, %v876_v57  ;;  %v5796_v62 = vld [vmem:[%s8433_s4 + $0x58] sm:$0xff]  ;;  %v878_v63 = vld [vmem:[%s8436_s25 + $0x10] sm:$0xff]  ;;  %v5801_v3 = vld [vmem:[%s8433_s4 + $0x60] sm:$0xff] }
  0x1e   :  { %6904 = vmatprep.subr.bf16.mxu0 %v6903_v18  ;;  %v879_v0 = vld [vmem:[%s8436_s25 + $0x18] sm:$0xff]  ;;  %v6939_v1 = vpack.c.bf16 %v5796_v62, %v5795_v61  ;;  %v5802_v4 = vld [vmem:[%s8433_s4 + $0x68] sm:$0xff]  ;;  %v5847_v5 = vld [vmem:[%s8436_s25 + $0x40] sm:$0xff] }
  0x1f   :  { %v6987_v2 = vpack.c.bf16 %v879_v0, %v878_v63  ;;  %v5848_v6 = vld [vmem:[%s8436_s25 + $0x48] sm:$0xff]  ;;  %v6943_v7 = vpack.c.bf16 %v5802_v4, %v5801_v3  ;;  %v5803_v9 = vld [vmem:[%s8433_s4 + $0x70] sm:$0xff]  ;;  %v5804_v10 = vld [vmem:[%s8433_s4 + $0x78] sm:$0xff] }
  0x20   :  { %v6999_v8 = vpack.c.bf16 %v5848_v6, %v5847_v5  ;;  %v5849_v11 = vld [vmem:[%s8436_s25 + $0x50] sm:$0xff]  ;;  %v5850_v12 = vld [vmem:[%s8436_s25 + $0x58] sm:$0xff]  ;;  %v6947_v13 = vpack.c.bf16 %v5804_v10, %v5803_v9  ;;  %v5812_v14 = vld [vmem:[%s8434_s3 + $0x20] sm:$0xff] }
  0x21   :  { %6906 = vmatpush3.bf16.msra.mxu0 %v6903_v18  ;;  %v5813_v15 = vld [vmem:[%s8434_s3 + $0x28] sm:$0xff]  ;;  %v7003_v16 = vpack.c.bf16 %v5850_v12, %v5849_v11  ;;  %v5814_v18 = vld [vmem:[%s8434_s3 + $0x30] sm:$0xff]  ;;  %v5815_v19 = vld [vmem:[%s8434_s3 + $0x38] sm:$0xff] }
  0x22   :  { %6908 = vmatprep.subr.bf16.mxu0 %v6907_v21  ;;  %v6959_v17 = vpack.c.bf16 %v5813_v15, %v5812_v14  ;;  %v6963_v20 = vpack.c.bf16 %v5815_v19, %v5814_v18  ;;  %v5829_v22 = vld [vmem:[%s8434_s3 + $0x68] sm:$0xff]  ;;  %v5831_v25 = vld [vmem:[%s8434_s3 + $0x78] sm:$0xff]  ;;  %v5855_v33 = vld [vmem:[%s8436_s25 + $0x60] sm:$0xff] }
  0x23   :  { %v5840_v28 = vld [vmem:[%s8436_s25 + $0x28] sm:$0xff]  ;;  %v5857_v36 = vld [vmem:[%s8436_s25 + $0x70] sm:$0xff]  ;;  %v5809_v40 = vld [vmem:[%s8403_s7] ss:$0 sm:$0xff] }
  0x24   :  { %v5856_v34 = vld [vmem:[%s8436_s25 + $0x68] sm:$0xff]  ;;  %v5790_v4 = vld [vmem:[%s8402_s6 + $0x1] ss:$0 sm:$0xff]  ;;  %v5825_v6 = vld [vmem:[%s8403_s7 + $0x2] ss:$0 sm:$0xff] }
  0x25   :  { %6910 = vmatpush3.bf16.msra.mxu0 %v6907_v21  ;;  %v5828_v21 = vld [vmem:[%s8434_s3 + $0x60] sm:$0xff]  ;;  %v7007_v35 = vpack.c.bf16 %v5856_v34, %v5855_v33 }
  0x26   :  { %6912 = vmatprep.subr.bf16.mxu0 %v6911_v24  ;;  %v6975_v23 = vpack.c.bf16 %v5829_v22, %v5828_v21  ;;  %v5798_v9 = vld [vmem:[%s8402_s6 + $0x2] ss:$0 sm:$0xff]  ;;  %v5833_v10 = vld [vmem:[%s8403_s7 + $0x3] ss:$0 sm:$0xff] }
  0x27   :  { %v5806_v14 = vld [vmem:[%s8402_s6 + $0x3] ss:$0 sm:$0xff] }
  0x29   :  { %6914 = vmatpush3.bf16.msra.mxu0 %v6911_v24  ;;  %v5830_v24 = vld [vmem:[%s8434_s3 + $0x70] sm:$0xff] }
  0x2a   :  { %6916 = vmatprep.subr.bf16.mxu0 %v6915_v27  ;;  %v6979_v26 = vpack.c.bf16 %v5831_v25, %v5830_v24 }
  0x2d   :  { %6918 = vmatpush3.bf16.msra.mxu0 %v6915_v27  ;;  %v5839_v27 = vld [vmem:[%s8436_s25 + $0x20] sm:$0xff] }
  0x2e   :  { %6952 = vmatprep.subr.bf16.mxu0 %v6951_v30  ;;  %v6991_v29 = vpack.c.bf16 %v5840_v28, %v5839_v27 }
  0x30   :  { %6368 = vmatmul.mubr.f32.vlgmr.msra.gmra.mrb[0].mxu0 %v70_v31  ;;  %v5842_v31 = vld [vmem:[%s8436_s25 + $0x38] sm:$0xff] }
  0x31   :  { %6954 = vmatpush3.bf16.msra.mxu0 %v6951_v30  ;;  %v5841_v30 = vld [vmem:[%s8436_s25 + $0x30] sm:$0xff] }
  0x32   :  { %6956 = vmatprep.subr.bf16.mxu0 %v6955_v37  ;;  %v6995_v32 = vpack.c.bf16 %v5842_v31, %v5841_v30 }
  0x35   :  { %6958 = vmatpush3.bf16.msra.mxu0 %v6955_v37  ;;  %v5858_v37 = vld [vmem:[%s8436_s25 + $0x78] sm:$0xff] }
  0x36   :  { %6968 = vmatprep.subr.bf16.mxu0 %v6967_v43  ;;  %v7011_v38 = vpack.c.bf16 %v5858_v37, %v5857_v36 }
 0x103   :  { %v6369_v45 = vpop.f32.mrb[0].mxu0 }
 0x104   :  { %v160_v47 = vpop.f32.mrb[1].mxu0  ;;  %v7518_v52 = vadd.f32 %v6369_v45, %v5781_v44  ;;  %v5782_v45 = vld [vmem:[%s8402_s6] ss:$0 sm:$0xff] }
 0x105   :  { %v7516_v51 = vadd.f32 %v5781_v44, %v160_v47 }
 0x107   :  { %6378 = vmatprep.mubr.msk.f32.mxu1 %vm180_vm0, %v7516_v51  ;;  %6422 = vmatprep.mubr.msk.f32.mxu0 %vm180_vm0, %v7516_v51 }
 0x108   :  { %6379 = vmatmul.mubr.msk.f32.vlgmr.msra.gmra.mrb[0].mxu1 %vm180_vm0, %v7518_v52  ;;  %6423 = vmatmul.mubr.msk.f32.vlgmr.msra.gmra.mrb[2].mxu0 %vm180_vm0, %v7518_v52 }
 0x109   :  { %6930 = vmatpush3.bf16.msra.mxu1 %v6927_v41  ;;  %6970 = vmatpush3.bf16.msra.mxu0 %v6967_v43 }
 0x10a   :  { %6389 = vmatprep.mubr.msk.f32.mxu1 %vm180_vm0, %v7516_v51  ;;  %6444 = vmatprep.mubr.msk.f32.mxu0 %vm180_vm0, %v7516_v51 }
 0x10b   :  { %6932 = vmatprep.subr.bf16.mxu1 %v6931_v54  ;;  %6972 = vmatprep.subr.bf16.mxu0 %v6971_v55 }
 0x10d   :  { %6934 = vmatpush3.bf16.msra.mxu1 %v6931_v54  ;;  %6974 = vmatpush3.bf16.msra.mxu0 %v6971_v55  ;;  %v5836_v54 = vld [vmem:[%s8404_s8] ss:$0 sm:$0xff] }
 0x10e   :  { %6936 = vmatprep.subr.bf16.mxu1 %v6935_v59  ;;  %6984 = vmatprep.subr.bf16.mxu0 %v6983_v60 }
 0x110   :  { %6390 = vmatmul.mubr.msk.f32.vlgmr.msra.gmra.mrb[2].mxu1 %vm180_vm0, %v7518_v52  ;;  %6445 = vmatmul.mubr.msk.f32.vlgmr.msra.gmra.mrb[4].mxu0 %vm180_vm0, %v7518_v52 }
 0x111   :  { %6938 = vmatpush3.bf16.msra.mxu1 %v6935_v59  ;;  %6400 = vmatprep.mubr.msk.f32.mxu1 %vm180_vm0, %v7516_v51 }
 0x112   :  { %6986 = vmatpush3.bf16.msra.mxu0 %v6983_v60  ;;  %6466 = vmatprep.mubr.msk.f32.mxu0 %vm180_vm0, %v7516_v51 }
 0x113   :  { %6940 = vmatprep.subr.bf16.mxu1 %v6939_v1  ;;  %6988 = vmatprep.subr.bf16.mxu0 %v6987_v2 }
 0x115   :  { %6942 = vmatpush3.bf16.msra.mxu1 %v6939_v1  ;;  %v5817_v1 = vld [vmem:[%s8403_s7 + $0x1] ss:$0 sm:$0xff] }
 0x116   :  { %6990 = vmatpush3.bf16.msra.mxu0 %v6987_v2  ;;  %6944 = vmatprep.subr.bf16.mxu1 %v6943_v7 }
 0x117   :  { %7000 = vmatprep.subr.bf16.mxu0 %v6999_v8 }
 0x118   :  { %6401 = vmatmul.mubr.msk.f32.vlgmr.msra.gmra.mrb[4].mxu1 %vm180_vm0, %v7518_v52 }
 0x119   :  { %6467 = vmatmul.mubr.msk.f32.vlgmr.msra.gmra.mrb[6].mxu0 %vm180_vm0, %v7518_v52  ;;  %6946 = vmatpush3.bf16.msra.mxu1 %v6943_v7 }
 0x11a   :  { %6411 = vmatprep.mubr.msk.f32.mxu1 %vm180_vm0, %v7516_v51  ;;  %7002 = vmatpush3.bf16.msra.mxu0 %v6999_v8 }
 0x11b   :  { %6488 = vmatprep.mubr.msk.f32.mxu0 %vm180_vm0, %v7516_v51  ;;  %6948 = vmatprep.subr.bf16.mxu1 %v6947_v13 }
 0x11c   :  { %7004 = vmatprep.subr.bf16.mxu0 %v7003_v16 }
 0x11d   :  { %6950 = vmatpush3.bf16.msra.mxu1 %v6947_v13 }
 0x11e   :  { %7006 = vmatpush3.bf16.msra.mxu0 %v7003_v16  ;;  %6960 = vmatprep.subr.bf16.mxu1 %v6959_v17 }
 0x11f   :  { %6512 = vmatprep.subr.mxu0 %v7294_v39 }
 0x120   :  { %6412 = vmatmul.mubr.msk.f32.vlgmr.msra.gmra.mrb[6].mxu1 %vm180_vm0, %v7518_v52 }
 0x121   :  { %6489 = vmatmul.mubr.msk.f32.vlgmr.msra.gmra.mrb[8].mxu0 %vm180_vm0, %v7518_v52  ;;  %6962 = vmatpush3.bf16.msra.mxu1 %v6959_v17 }
 0x122   :  { %6433 = vmatprep.mubr.msk.f32.mxu1 %vm180_vm0, %v7516_v51  ;;  %6964 = vmatprep.subr.bf16.mxu1 %v6963_v20 }
 0x123   :  { %6514 = vmatprep.mubr.msk.f32.mxu0 %vm7295_vm1, %v7294_v39 }
 0x125   :  { %6966 = vmatpush3.bf16.msra.mxu1 %v6963_v20 }
 0x126   :  { %6976 = vmatprep.subr.bf16.mxu1 %v6975_v23 }
 0x128   :  { %6434 = vmatmul.mubr.msk.f32.vlgmr.msra.gmra.mrb[8].mxu1 %vm180_vm0, %v7518_v52 }
 0x129   :  { %6978 = vmatpush3.bf16.msra.mxu1 %v6975_v23  ;;  %6455 = vmatprep.mubr.msk.f32.mxu1 %vm180_vm0, %v7516_v51 }
 0x12a   :  { %6980 = vmatprep.subr.bf16.mxu1 %v6979_v26 }
 0x12d   :  { %6982 = vmatpush3.bf16.msra.mxu1 %v6979_v26 }
 0x12e   :  { %6992 = vmatprep.subr.bf16.mxu1 %v6991_v29 }
 0x130   :  { %6456 = vmatmul.mubr.msk.f32.vlgmr.msra.gmra.mrb[10].mxu1 %vm180_vm0, %v7518_v52 }
 0x131   :  { %6994 = vmatpush3.bf16.msra.mxu1 %v6991_v29  ;;  %6477 = vmatprep.mubr.msk.f32.mxu1 %vm180_vm0, %v7516_v51 }
 0x132   :  { %6996 = vmatprep.subr.bf16.mxu1 %v6995_v32 }
 0x135   :  { %6998 = vmatpush3.bf16.msra.mxu1 %v6995_v32 }
 0x136   :  { %7008 = vmatprep.subr.bf16.mxu1 %v7007_v35 }
 0x138   :  { %6478 = vmatmul.mubr.msk.f32.vlgmr.msra.gmra.mrb[12].mxu1 %vm180_vm0, %v7518_v52 }
 0x139   :  { %7010 = vmatpush3.bf16.msra.mxu1 %v7007_v35  ;;  %6499 = vmatprep.mubr.msk.f32.mxu1 %vm180_vm0, %v7516_v51 }
 0x13a   :  { %7012 = vmatprep.subr.bf16.mxu1 %v7011_v38 }
 0x13d   :  { %7014 = vmatpush3.bf16.msra.mxu1 %v7011_v38 }
 0x13e   :  { %6502 = vmatprep.subr.mxu1 %v7294_v39 }
 0x140   :  { %6500 = vmatmul.mubr.msk.f32.vlgmr.msra.gmra.mrb[14].mxu1 %vm180_vm0, %v7518_v52 }
 0x141   :  { %6504 = vmatprep.mubr.msk.f32.mxu1 %vm7295_vm1, %v7294_v39 }
 0x1db   :  { %v6380_v41 = vpop.f32.mrb[0].mxu1  ;;  %v6424_v42 = vpop.f32.mrb[2].mxu0 }
 0x1dc   :  { %v253_v43 = vpop.f32.mrb[1].mxu1  ;;  %v603_v44 = vpop.f32.mrb[3].mxu0  ;;  %v609_v17 = vadd.f32 %v6424_v42, %v5809_v40  ;;  %v259_v19 = vadd.f32 %v6380_v41, %v5782_v45 }
 0x1dd   :  { %v604_v46 = vadd.f32 %v5809_v40, %v603_v44  ;;  %v254_v47 = vadd.f32 %v5782_v45, %v253_v43 }
 0x1df   :  { %6503 = vmatpush3.xpose.msk.msra.mxu1 %vm1226_vm2, %v604_v46 }
 0x1e0   :  { %6507 = vmatprep.subr.mxu1 %v7294_v39 }
 0x1e2   :  { %6505 = vmatmul.mubr.msk.f32.vlgmr.msra.gmra.mrb[16].mxu1 %vm1226_vm2, %v254_v47 }
 0x1e3   :  { %v6391_v48 = vpop.f32.mrb[2].mxu1  ;;  %v6446_v49 = vpop.f32.mrb[4].mxu0  ;;  %6509 = vmatprep.mubr.msk.f32.mxu1 %vm7295_vm1, %v7294_v39 }
 0x1e4   :  { %v341_v50 = vpop.f32.mrb[3].mxu1  ;;  %v779_v53 = vpop.f32.mrb[5].mxu0  ;;  %v347_v22 = vadd.f32 %v6391_v48, %v5790_v4  ;;  %v785_v23 = vadd.f32 %v6446_v49, %v5825_v6 }
 0x1e5   :  { %v342_v7 = vadd.f32 %v5790_v4, %v341_v50  ;;  %v780_v8 = vadd.f32 %v5825_v6, %v779_v53 }
 0x1eb   :  { %v6402_v55 = vpop.f32.mrb[4].mxu1 }
 0x1ec   :  { %v6468_v56 = vpop.f32.mrb[6].mxu0  ;;  %v429_v57 = vpop.f32.mrb[5].mxu1  ;;  %v435_v25 = vadd.f32 %v6402_v55, %v5798_v9 }
 0x1ed   :  { %v7684_v58 = vadd.f32 %v6468_v56, %v5836_v54  ;;  %v953_v59 = vpop.f32.mrb[7].mxu0  ;;  %v430_v12 = vadd.f32 %v5798_v9, %v429_v57 }
 0x1ee   :  { %v954_v60 = vadd.f32 %v5836_v54, %v953_v59 }
 0x1f0   :  { %6508 = vmatpush3.msra.mxu1 %v954_v60 }
 0x1f1   :  { %6517 = vmatprep.subr.mxu1 %v7294_v39 }
 0x1f3   :  { %v6413_v61 = vpop.f32.mrb[6].mxu1 }
 0x1f4   :  { %v7687_v62 = vpop.f32.mrb[8].mxu0  ;;  %v517_v63 = vpop.f32.mrb[7].mxu1  ;;  %v523_v28 = vadd.f32 %v6413_v61, %v5806_v14 }
 0x1f5   :  { %v7689_v0 = vpop.f32.mrb[9].mxu0  ;;  %v518_v16 = vadd.f32 %v5806_v14, %v517_v63 }
 0x1fb   :  { %v6435_v2 = vpop.f32.mrb[8].mxu1 }
 0x1fc   :  { %v691_v3 = vpop.f32.mrb[9].mxu1  ;;  %v697_v21 = vadd.f32 %v6435_v2, %v5817_v1 }
 0x1fd   :  { %v692_v5 = vadd.f32 %v5817_v1, %v691_v3 }
 0x1ff   :  { %6513 = vmatpush3.xpose.msk.msra.mxu0 %vm1226_vm2, %v692_v5 }
 0x200   :  { %6522 = vmatprep.subr.mxu0 %v7294_v39 }
 0x202   :  { %6515 = vmatmul.mubr.msk.f32.vlgmr.msra.gmra.mrb[10].mxu0 %vm1226_vm2, %v342_v7 }
 0x203   :  { %v6457_v11 = vpop.f32.mrb[10].mxu1  ;;  %6523 = vmatpush3.xpose.msk.msra.mxu0 %vm1226_vm2, %v780_v8  ;;  %6524 = vmatprep.mubr.msk.f32.mxu0 %vm7295_vm1, %v7294_v39 }
 0x204   :  { %v867_v13 = vpop.f32.mrb[11].mxu1  ;;  %6532 = vmatprep.subr.mxu0 %v7294_v39  ;;  %v873_v27 = vadd.f32 %v6457_v11, %v5833_v10 }
 0x205   :  { %v868_v15 = vadd.f32 %v5833_v10, %v867_v13 }
 0x206   :  { %6525 = vmatmul.mubr.msk.f32.vlgmr.msra.gmra.mrb[12].mxu0 %vm1226_vm2, %v430_v12 }
 0x207   :  { %6533 = vmatpush3.xpose.msk.msra.mxu0 %vm1226_vm2, %v868_v15  ;;  %6534 = vmatprep.mubr.msk.f32.mxu0 %vm7295_vm1, %v7294_v39 }
 0x208   :  { %6542 = vmatprep.subr.mxu0 %v7294_v39 }
 0x20a   :  { %6535 = vmatmul.mubr.msk.f32.vlgmr.msra.gmra.mrb[14].mxu0 %vm1226_vm2, %v518_v16 }
 0x20b   :  { %v7722_v18 = vpop.f32.mrb[12].mxu1  ;;  %6543 = vmatpush3.xpose.msk.msra.mxu0 %vm1226_vm2, %v609_v17  ;;  %6544 = vmatprep.mubr.msk.f32.mxu0 %vm7295_vm1, %v7294_v39 }
 0x20c   :  { %v7727_v20 = vpop.f32.mrb[13].mxu1  ;;  %6552 = vmatprep.subr.mxu0 %v7294_v39 }
 0x20e   :  { %6545 = vmatmul.mubr.msk.f32.vlgmr.msra.gmra.mrb[16].mxu0 %vm1226_vm2, %v259_v19 }
 0x20f   :  { %6553 = vmatpush3.xpose.msk.msra.mxu0 %vm1226_vm2, %v697_v21  ;;  %6554 = vmatprep.mubr.msk.f32.mxu0 %vm7295_vm1, %v7294_v39 }
 0x210   :  { %6562 = vmatprep.subr.mxu0 %v7294_v39 }
 0x212   :  { %6555 = vmatmul.mubr.msk.f32.vlgmr.msra.gmra.mrb[18].mxu0 %vm1226_vm2, %v347_v22 }
 0x213   :  { %v7736_v24 = vpop.f32.mrb[14].mxu1  ;;  %6563 = vmatpush3.xpose.msk.msra.mxu0 %vm1226_vm2, %v785_v23  ;;  %6564 = vmatprep.mubr.msk.f32.mxu0 %vm7295_vm1, %v7294_v39 }
 0x214   :  { %v7741_v26 = vpop.f32.mrb[15].mxu1  ;;  %6572 = vmatprep.subr.mxu0 %v7294_v39 }
 0x216   :  { %6565 = vmatmul.mubr.msk.f32.vlgmr.msra.gmra.mrb[20].mxu0 %vm1226_vm2, %v435_v25 }
 0x217   :  { %6573 = vmatpush3.xpose.msk.msra.mxu0 %vm1226_vm2, %v873_v27  ;;  %6574 = vmatprep.mubr.msk.f32.mxu0 %vm7295_vm1, %v7294_v39 }
 0x21a   :  { %6575 = vmatmul.mubr.msk.f32.vlgmr.msra.gmra.mrb[22].mxu0 %vm1226_vm2, %v523_v28 }
 0x2b5   :  { %v1299_v29 = vpop.f32.mrb[16].mxu1 }
 0x2b6   :  { %v6506_v30 = vpop.f32.mrb[17].mxu1  ;;  %v1303_v31 = vsel %vm1226_vm2, %v1299_v29, -inf }
 0x2b7   :  { %1304 = vmax.xlane.f32.xlu0 %v1303_v31 }
 0x2d5   :  { %v1459_v32 = vpop.f32.mrb[10].mxu0 }
 0x2d6   :  { %v6516_v33 = vpop.f32.mrb[11].mxu0  ;;  %v1463_v34 = vsel %vm1226_vm2, %v1459_v32, -inf }
 0x2d7   :  { %1464 = vmax.xlane.f32.xlu0 %v1463_v34 }
 0x2d9   :  { %v1619_v35 = vpop.f32.mrb[12].mxu0 }
 0x2da   :  { %v6526_v36 = vpop.f32.mrb[13].mxu0  ;;  %v1623_v37 = vsel %vm1226_vm2, %v1619_v35, -inf }
 0x2db   :  { %1624 = vmax.xlane.f32.xlu1 %v1623_v37 }
 0x2dd   :  { %v1779_v38 = vpop.f32.mrb[14].mxu0 }
 0x2de   :  { %v6536_v40 = vpop.f32.mrb[15].mxu0  ;;  %v1783_v41 = vsel %vm1226_vm2, %v1779_v38, -inf }
 0x2df   :  { %1784 = vmax.xlane.f32.xlu1 %v1783_v41  ;;  %v5844_v41 = vld [vmem:[%s8404_s8 + $0x1] ss:$0 sm:$0xff] }
 0x2e1   :  { %v1956_v42 = vpop.f32.mrb[16].mxu0 }
 0x2e2   :  { %v6546_v43 = vpop.f32.mrb[17].mxu0  ;;  %v1960_v44 = vsel %vm1226_vm2, %v1956_v42, -inf }
 0x2e3   :  { %1961 = vmax.xlane.f32.xlu0 %v1960_v44  ;;  %v1042_v44 = vadd.f32 %v5844_v41, %v7727_v20 }
 0x2e5   :  { %v2116_v45 = vpop.f32.mrb[18].mxu0 }
 0x2e6   :  { %v6556_v46 = vpop.f32.mrb[19].mxu0  ;;  %v2120_v47 = vsel %vm1226_vm2, %v2116_v45, -inf }
 0x2e7   :  { %2121 = vmax.xlane.f32.xlu1 %v2120_v47 }
 0x2e9   :  { %v2276_v48 = vpop.f32.mrb[20].mxu0 }
 0x2ea   :  { %v6566_v49 = vpop.f32.mrb[21].mxu0  ;;  %v2280_v50 = vsel %vm1226_vm2, %v2276_v48, -inf }
 0x2eb   :  { %2281 = vmax.xlane.f32.xlu0 %v2280_v50 }
 0x2ed   :  { %v2436_v53 = vpop.f32.mrb[22].mxu0 }
 0x2ee   :  { %v6576_v54 = vpop.f32.mrb[23].mxu0  ;;  %v2440_v55 = vsel %vm1226_vm2, %v2436_v53, -inf }
 0x2ef   :  { %2441 = vmax.xlane.f32.xlu1 %v2440_v55  ;;  %v5860_v54 = vld [vmem:[%s8404_s8 + $0x3] ss:$0 sm:$0xff] }
 0x344   :  { %v1305_v56 = vpop.xlane.xlu0 %1304 }
 0x345   :  { %v1306_v57 = vsub.f32 %v1299_v29, %v1305_v56 }
 0x347   :  { %v1307_v59 = vmul.f32 1.442695, %v1306_v57 }
 0x349   :  { %7190 = vpow2.f32 %v1307_v59  ;;  %v1218_v59 = vadd.f32 %v5860_v54, %v7741_v26 }
 0x353   :  { %v7191_v60 = vpop.eup %7190 }
 0x354   :  { %v1309_v61 = vsel %vm1226_vm2, %v7191_v60, 0.0 }
 0x355   :  { %1310 = vadd.xlane.f32.xlu0 %v1309_v61 }
 0x364   :  { %v1465_v63 = vpop.xlane.xlu0 %1464 }
 0x365   :  { %v1466_v1 = vsub.f32 %v1459_v32, %v1465_v63 }
 0x367   :  { %v1467_v2 = vmul.f32 1.442695, %v1466_v1 }
 0x368   :  { %v1625_v3 = vpop.xlane.xlu1 %1624 }
 0x369   :  { %7192 = vpow2.f32 %v1467_v2  ;;  %v1626_v4 = vsub.f32 %v1619_v35, %v1625_v3  ;;  %v1047_v2 = vadd.f32 %v7722_v18, %v5844_v41 }
 0x36b   :  { %v1627_v5 = vmul.f32 1.442695, %v1626_v4 }
 0x36c   :  { %v1785_v6 = vpop.xlane.xlu1 %1784 }
 0x36d   :  { %7194 = vpow2.f32 %v1627_v5  ;;  %v1786_v7 = vsub.f32 %v1779_v38, %v1785_v6  ;;  %v1223_v6 = vadd.f32 %v7736_v24, %v5860_v54  ;;  %v2539_v24 = vld [vmem:[%s8405_s9] sm:$0xff] }
 0x36f   :  { %v1787_v8 = vmul.f32 1.442695, %v1786_v7 }
 0x370   :  { %v1962_v9 = vpop.xlane.xlu0 %1961 }
 0x371   :  { %7196 = vpow2.f32 %v1787_v8  ;;  %v1963_v10 = vsub.f32 %v1956_v42, %v1962_v9 }
 0x373   :  { %v7193_v11 = vpop.eup %7192  ;;  %v1964_v12 = vmul.f32 1.442695, %v1963_v10 }
 0x374   :  { %v2122_v13 = vpop.xlane.xlu1 %2121  ;;  %v1469_v14 = vsel %vm1226_vm2, %v7193_v11, 0.0 }
 0x375   :  { %7198 = vpow2.f32 %v1964_v12  ;;  %v2123_v15 = vsub.f32 %v2116_v45, %v2122_v13  ;;  %1470 = vadd.xlane.f32.xlu1 %v1469_v14  ;;  %v2540_v13 = vld [vmem:[%s8405_s9 + $0x8] sm:$0xff] }
 0x377   :  { %v7195_v16 = vpop.eup %7194  ;;  %v2124_v17 = vmul.f32 1.442695, %v2123_v15  ;;  %v7015_v15 = vpack.c.bf16 %v2540_v13, %v2539_v24 }
 0x378   :  { %v2282_v19 = vpop.xlane.xlu0 %2281  ;;  %v1629_v21 = vsel %vm1226_vm2, %v7195_v16, 0.0 }
 0x379   :  { %7200 = vpow2.f32 %v2124_v17  ;;  %v2283_v22 = vsub.f32 %v2276_v48, %v2282_v19  ;;  %1630 = vadd.xlane.f32.xlu0 %v1629_v21  ;;  %v5852_v48 = vld [vmem:[%s8404_s8 + $0x2] ss:$0 sm:$0xff]  ;;  %7016 = vmatprep.subr.bf16.mxu0 %v7015_v15  ;;  %v2541_v17 = vld [vmem:[%s8405_s9 + $0x10] sm:$0xff]  ;;  %v2542_v19 = vld [vmem:[%s8405_s9 + $0x18] sm:$0xff] }
 0x37a   :  { %7018 = vmatpush3.bf16.msra.mxu0 %v7015_v15 }
 0x37b   :  { %v7197_v23 = vpop.eup %7196  ;;  %v2284_v25 = vmul.f32 1.442695, %v2283_v22  ;;  %v7019_v22 = vpack.c.bf16 %v2542_v19, %v2541_v17 }
 0x37c   :  { %v2442_v27 = vpop.xlane.xlu1 %2441  ;;  %v1789_v28 = vsel %vm1226_vm2, %v7197_v23, 0.0 }
 0x37d   :  { %7202 = vpow2.f32 %v2284_v25  ;;  %v2443_v29 = vsub.f32 %v2436_v53, %v2442_v27  ;;  %1790 = vadd.xlane.f32.xlu1 %v1789_v28  ;;  %v1130_v53 = vadd.f32 %v5852_v48, %v7689_v0  ;;  %7020 = vmatprep.subr.bf16.mxu0 %v7019_v22 }
 0x37e   :  { %7022 = vmatpush3.bf16.msra.mxu0 %v7019_v22 }
 0x37f   :  { %v7199_v30 = vpop.eup %7198  ;;  %v2444_v31 = vmul.f32 1.442695, %v2443_v29 }
 0x380   :  { %v1966_v32 = vsel %vm1226_vm2, %v7199_v30, 0.0 }
 0x381   :  { %7204 = vpow2.f32 %v2444_v31  ;;  %1967 = vadd.xlane.f32.xlu0 %v1966_v32 }
 0x383   :  { %v7201_v33 = vpop.eup %7200 }
 0x384   :  { %v2126_v34 = vsel %vm1226_vm2, %v7201_v33, 0.0 }
 0x385   :  { %2127 = vadd.xlane.f32.xlu1 %v2126_v34 }
 0x387   :  { %v7763_v35 = vpop.eup %7202 }
 0x388   :  { %v2286_v36 = vsel %vm1226_vm2, %v7763_v35, 0.0 }
 0x389   :  { %2287 = vadd.xlane.f32.xlu0 %v2286_v36 }
 0x38b   :  { %v7767_v37 = vpop.eup %7204 }
 0x38c   :  { %v2446_v38 = vsel %vm1226_vm2, %v7767_v37, 0.0 }
 0x38d   :  { %2447 = vadd.xlane.f32.xlu1 %v2446_v38 }
 0x3e2   :  { %v1311_v40 = vpop.xlane.xlu0 %1310 }
 0x3e3   :  { %7206 = vrcp.f32 %v1311_v40 }
 0x3ed   :  { %v7207_v42 = vpop.eup %7206 }
 0x3ee   :  { %v1313_v43 = vmul.f32 %v7207_v42, %v7191_v60 }
 0x3f0   :  { %6510 = vmatmul.mubr.msk.f32.vlgmr.msra.gmra.mrb[18].mxu1 %vm1226_vm2, %v1313_v43 }
 0x3f1   :  { %6518 = vmatpush3.msra.mxu1 %v1042_v44  ;;  %6519 = vmatprep.mubr.msk.f32.mxu1 %vm7295_vm1, %v7294_v39 }
 0x3f2   :  { %6527 = vmatprep.subr.mxu1 %v7294_v39 }
 0x402   :  { %v1471_v45 = vpop.xlane.xlu1 %1470 }
 0x403   :  { %7208 = vrcp.f32 %v1471_v45 }
 0x406   :  { %v1631_v46 = vpop.xlane.xlu0 %1630 }
 0x407   :  { %7210 = vrcp.f32 %v1631_v46  ;;  %v5887_v46 = vld [vmem:[%s8406_s10] ss:$0 sm:$0xff] }
 0x40a   :  { %v1791_v47 = vpop.xlane.xlu1 %1790 }
 0x40b   :  { %7212 = vrcp.f32 %v1791_v47 }
 0x40d   :  { %v7209_v49 = vpop.eup %7208 }
 0x40e   :  { %v1473_v20 = vmul.f32 %v7209_v49, %v7193_v11  ;;  %v1968_v50 = vpop.xlane.xlu0 %1967 }
 0x40f   :  { %7214 = vrcp.f32 %v1968_v50 }
 0x410   :  { %6520 = vmatmul.mubr.msk.f32.vlgmr.msra.gmra.mrb[20].mxu1 %vm1226_vm2, %v1473_v20 }
 0x411   :  { %v7211_v55 = vpop.eup %7210  ;;  %6528 = vmatpush3.msra.mxu1 %v1130_v53  ;;  %6529 = vmatprep.mubr.msk.f32.mxu1 %vm7295_vm1, %v7294_v39 }
 0x412   :  { %v1633_v56 = vmul.f32 %v7211_v55, %v7195_v16  ;;  %v2128_v57 = vpop.xlane.xlu1 %2127  ;;  %6537 = vmatprep.subr.mxu1 %v7294_v39 }
 0x413   :  { %7216 = vrcp.f32 %v2128_v57 }
 0x414   :  { %6530 = vmatmul.mubr.msk.f32.vlgmr.msra.gmra.mrb[22].mxu1 %vm1226_vm2, %v1633_v56 }
 0x415   :  { %v7213_v0 = vpop.eup %7212  ;;  %6538 = vmatpush3.msra.mxu1 %v1218_v59  ;;  %6539 = vmatprep.mubr.msk.f32.mxu1 %vm7295_vm1, %v7294_v39 }
 0x416   :  { %v1793_v60 = vmul.f32 %v7213_v0, %v7197_v23  ;;  %v2288_v61 = vpop.xlane.xlu0 %2287  ;;  %6547 = vmatprep.subr.mxu1 %v7294_v39 }
 0x417   :  { %7218 = vrcp.f32 %v2288_v61 }
 0x418   :  { %6540 = vmatmul.mubr.msk.f32.vlgmr.msra.gmra.mrb[24].mxu1 %vm1226_vm2, %v1793_v60 }
 0x419   :  { %v7215_v63 = vpop.eup %7214  ;;  %6548 = vmatpush3.msra.mxu1 %v7684_v58  ;;  %6549 = vmatprep.mubr.msk.f32.mxu1 %vm7295_vm1, %v7294_v39  ;;  %v1135_v58 = vadd.f32 %v7687_v62, %v5852_v48 }
 0x41a   :  { %v1970_v26 = vmul.f32 %v7215_v63, %v7199_v30  ;;  %v2448_v1 = vpop.xlane.xlu1 %2447  ;;  %6557 = vmatprep.subr.mxu1 %v7294_v39 }
 0x41b   :  { %7220 = vrcp.f32 %v2448_v1 }
 0x41c   :  { %6550 = vmatmul.mubr.msk.f32.vlgmr.msra.gmra.mrb[26].mxu1 %vm1226_vm2, %v1970_v26 }
 0x41d   :  { %v7217_v3 = vpop.eup %7216  ;;  %6558 = vmatpush3.msra.mxu1 %v1047_v2  ;;  %6559 = vmatprep.mubr.msk.f32.mxu1 %vm7295_vm1, %v7294_v39  ;;  %v2679_v2 = vld [vmem:[%s8407_s11 + $0x8] sm:$0xff] }
 0x41e   :  { %v2130_v4 = vmul.f32 %v7217_v3, %v7201_v33  ;;  %6567 = vmatprep.subr.mxu1 %v7294_v39 }
 0x420   :  { %6560 = vmatmul.mubr.msk.f32.vlgmr.msra.gmra.mrb[28].mxu1 %vm1226_vm2, %v2130_v4  ;;  %v2680_v4 = vld [vmem:[%s8407_s11 + $0x10] sm:$0xff] }
 0x421   :  { %v7219_v5 = vpop.eup %7218  ;;  %6568 = vmatpush3.msra.mxu1 %v1135_v58  ;;  %6569 = vmatprep.mubr.msk.f32.mxu1 %vm7295_vm1, %v7294_v39  ;;  %v2681_v58 = vld [vmem:[%s8407_s11 + $0x18] sm:$0xff] }
 0x422   :  { %v2290_v18 = vmul.f32 %v7219_v5, %v7763_v35  ;;  %6577 = vmatprep.subr.mxu1 %v7294_v39  ;;  %v7027_v5 = vpack.c.bf16 %v2681_v58, %v2680_v4  ;;  %v5902_v4 = vld [vmem:[%s8433_s4 + $0x90] sm:$0xff]  ;;  %v5903_v58 = vld [vmem:[%s8433_s4 + $0x98] sm:$0xff] }
 0x424   :  { %6570 = vmatmul.mubr.msk.f32.vlgmr.msra.gmra.mrb[30].mxu1 %vm1226_vm2, %v2290_v18  ;;  %v2772_v18 = vld [vmem:[%s8409_s13] sm:$0xff] }
 0x425   :  { %v7221_v7 = vpop.eup %7220  ;;  %6578 = vmatpush3.msra.mxu1 %v1223_v6  ;;  %6579 = vmatprep.mubr.msk.f32.mxu1 %vm7295_vm1, %v7294_v39  ;;  %v2773_v6 = vld [vmem:[%s8409_s13 + $0x8] sm:$0xff] }
 0x426   :  { %v2450_v62 = vmul.f32 %v7221_v7, %v7767_v37  ;;  %v2774_v7 = vld [vmem:[%s8409_s13 + $0x10] sm:$0xff] }
 0x428   :  { %6580 = vmatmul.mubr.msk.f32.vlgmr.msra.gmra.mrb[32].mxu1 %vm1226_vm2, %v2450_v62  ;;  %v7031_v62 = vpack.c.bf16 %v2773_v6, %v2772_v18  ;;  %v7051_v18 = vpack.c.bf16 %v5903_v58, %v5902_v4  ;;  %v5919_v6 = vld [vmem:[%s8433_s4 + $0xd8] sm:$0xff]  ;;  %v5958_v58 = vld [vmem:[%s8434_s3 + $0xf0] sm:$0xff] }
 0x42a   :  { %7032 = vmatprep.subr.bf16.mxu0 %v7031_v62 }
 0x4c3   :  { %v1383_v8 = vpop.f32.mrb[18].mxu1 }
 0x4c4   :  { %v6511_v9 = vpop.f32.mrb[19].mxu1 }
 0x4e3   :  { %v1543_v10 = vpop.f32.mrb[20].mxu1 }
 0x4e4   :  { %1868 = vrot.lane.b32.xlu0 %v1543_v10, %s7296_s24  ;;  %v6521_v11 = vpop.f32.mrb[21].mxu1  ;;  %v2776_v10 = vld [vmem:[%s8409_s13 + $0x20] sm:$0xff] }
 0x4e5   :  { %v2777_v11 = vld [vmem:[%s8409_s13 + $0x28] sm:$0xff] }
 0x4e7   :  { %v1703_v12 = vpop.f32.mrb[22].mxu1 }
 0x4e8   :  { %1872 = vrot.lane.b32.xlu1 %v1703_v12, %s7297_s0  ;;  %v6531_v14 = vpop.f32.mrb[23].mxu1  ;;  %v7039_v12 = vpack.c.bf16 %v2777_v11, %v2776_v10  ;;  %v5933_v11 = vld [vmem:[%s8434_s3 + $0x88] sm:$0xff] }
 0x4eb   :  { %v1863_v16 = vpop.f32.mrb[24].mxu1 }
 0x4ec   :  { %1876 = vrot.lane.b32.xlu1 %v1863_v16, %s8423_s23  ;;  %v6541_v21 = vpop.f32.mrb[25].mxu1 }
 0x4ed   :  { %v5890_v21 = vld [vmem:[%s8411_s15] ss:$0 sm:$0xff] }
 0x4ef   :  { %v2040_v23 = vpop.f32.mrb[26].mxu1 }
 0x4f0   :  { %v6551_v25 = vpop.f32.mrb[27].mxu1 }
 0x4f3   :  { %v2200_v27 = vpop.f32.mrb[28].mxu1 }
 0x4f4   :  { %2525 = vrot.lane.b32.xlu1 %v2200_v27, %s7296_s24  ;;  %v6561_v28 = vpop.f32.mrb[29].mxu1 }
 0x4f7   :  { %v2360_v29 = vpop.f32.mrb[30].mxu1 }
 0x4f8   :  { %2529 = vrot.lane.b32.xlu0 %v2360_v29, %s7297_s0  ;;  %v6571_v30 = vpop.f32.mrb[31].mxu1 }
 0x4fb   :  { %v2520_v31 = vpop.f32.mrb[32].mxu1 }
 0x4fc   :  { %2533 = vrot.lane.b32.xlu1 %v2520_v31, %s8423_s23  ;;  %v6581_v32 = vpop.f32.mrb[33].mxu1 }
 0x4fd   :  { %v2778_v32 = vld [vmem:[%s8409_s13 + $0x30] sm:$0xff] }
 0x556   :  { %v1869_v33 = vpop.permute.xlu0 %1868 }
 0x557   :  { %v1879_v35 = vsel %vm1226_vm2, %v1383_v8, %v1869_v33  ;;  %v2775_v8 = vld [vmem:[%s8409_s13 + $0x18] sm:$0xff] }
 0x558   :  { %v7035_v9 = vpack.c.bf16 %v2775_v8, %v2774_v7  ;;  %v2779_v33 = vld [vmem:[%s8409_s13 + $0x38] sm:$0xff]  ;;  %v5909_v8 = vld [vmem:[%s8433_s4 + $0xa8] sm:$0xff] }
 0x55a   :  { %v1873_v34 = vpop.permute.xlu1 %1872 }
 0x55b   :  { %v1881_v36 = vsel %vm1880_vm3, %v1879_v35, %v1873_v34  ;;  %v7043_v34 = vpack.c.bf16 %v2779_v33, %v2778_v32  ;;  %v5892_v35 = vld [vmem:[%s8408_s12] ss:$0 sm:$0xff]  ;;  %v5934_v32 = vld [vmem:[%s8434_s3 + $0x90] sm:$0xff]  ;;  %v5935_v33 = vld [vmem:[%s8434_s3 + $0x98] sm:$0xff] }
 0x55e   :  { %v1877_v37 = vpop.permute.xlu1 %1876 }
 0x55f   :  { %v1883_v38 = vsel %vm1882_vm4, %v1881_v36, %v1877_v37 }
 0x560   :  { %6590 = vmatprep.mubr.msk.f32.mxu0 %vm180_vm0, %v1883_v38 }
 0x566   :  { %v2526_v40 = vpop.permute.xlu1 %2525 }
 0x567   :  { %v2536_v42 = vsel %vm1226_vm2, %v2040_v23, %v2526_v40  ;;  %v5891_v23 = vld [vmem:[%s8412_s16] ss:$0 sm:$0xff] }
 0x56a   :  { %v2530_v41 = vpop.permute.xlu0 %2529 }
 0x56b   :  { %v2537_v43 = vsel %vm1880_vm3, %v2536_v42, %v2530_v41 }
 0x56e   :  { %v2534_v44 = vpop.permute.xlu1 %2533 }
 0x56f   :  { %v2538_v45 = vsel %vm1882_vm4, %v2537_v43, %v2534_v44  ;;  %v5895_v43 = vld [vmem:[%s8410_s14] ss:$0 sm:$0xff] }
 0x570   :  { %6591 = vmatmul.mubr.msk.f32.vlgmr.msra.gmra.mrb[24].mxu0 %vm180_vm0, %v2538_v45 }
 0x571   :  { %7034 = vmatpush3.bf16.msra.mxu0 %v7031_v62  ;;  %v5908_v62 = vld [vmem:[%s8433_s4 + $0xa0] sm:$0xff] }
 0x572   :  { %7036 = vmatprep.subr.bf16.mxu0 %v7035_v9  ;;  %v7055_v10 = vpack.c.bf16 %v5909_v8, %v5908_v62  ;;  %v5972_v62 = vld [vmem:[%s8436_s25 + $0xa0] sm:$0xff]  ;;  %v5973_v8 = vld [vmem:[%s8436_s25 + $0xa8] sm:$0xff] }
 0x575   :  { %7038 = vmatpush3.bf16.msra.mxu0 %v7035_v9  ;;  %v5932_v9 = vld [vmem:[%s8434_s3 + $0x80] sm:$0xff] }
 0x576   :  { %7040 = vmatprep.subr.bf16.mxu0 %v7039_v12 }
 0x579   :  { %7042 = vmatpush3.bf16.msra.mxu0 %v7039_v12  ;;  %v7079_v12 = vpack.c.bf16 %v5933_v11, %v5932_v9  ;;  %v5974_v11 = vld [vmem:[%s8436_s25 + $0xb0] sm:$0xff] }
 0x57a   :  { %7044 = vmatprep.subr.bf16.mxu0 %v7043_v34 }
 0x57d   :  { %7046 = vmatpush3.bf16.msra.mxu0 %v7043_v34 }
 0x643   :  { %v6592_v47 = vpop.f32.mrb[24].mxu0 }
 0x644   :  { %v2628_v48 = vadd.f32 %v6592_v47, %v5887_v46  ;;  %v2622_v49 = vpop.f32.mrb[25].mxu0 }
 0x645   :  { %v2623_v20 = vadd.f32 %v5887_v46, %v2622_v49 }
 0x646   :  { %v2632_v50 = vadd.f32 %v2628_v48, %v7518_v52 }
 0x647   :  { %v2631_v53 = vadd.f32 %v2623_v20, %v7516_v51  ;;  %v2678_v51 = vld [vmem:[%s8407_s11] sm:$0xff] }
 0x648   :  { %v2638_v54 = vsel %vm180_vm0, %v2632_v50, 0.0  ;;  %v7023_v3 = vpack.c.bf16 %v2679_v2, %v2678_v51  ;;  %v5917_v2 = vld [vmem:[%s8433_s4 + $0xc8] sm:$0xff] }
 0x649   :  { %2639 = vadd.xlane.f32.xlu1 %v2638_v54  ;;  %v2635_v55 = vsel %vm180_vm0, %v2631_v53, 0.0 }
 0x64a   :  { %2636 = vadd.xlane.f32.xlu0 %v2635_v55  ;;  %7024 = vmatprep.subr.bf16.mxu1 %v7023_v3 }
 0x64b   :  { %7026 = vmatpush3.bf16.msra.mxu1 %v7023_v3 }
 0x64c   :  { %7028 = vmatprep.subr.bf16.mxu1 %v7027_v5 }
 0x64f   :  { %7030 = vmatpush3.bf16.msra.mxu1 %v7027_v5  ;;  %v5918_v5 = vld [vmem:[%s8433_s4 + $0xd0] sm:$0xff] }
 0x650   :  { %v7067_v7 = vpack.c.bf16 %v5919_v6, %v5918_v5  ;;  %v5959_v5 = vld [vmem:[%s8434_s3 + $0xf8] sm:$0xff] }
 0x651   :  { %v5983_v6 = vld [vmem:[%s8436_s25 + $0xd8] sm:$0xff] }
 0x6d6   :  { %v2640_v56 = vpop.xlane.xlu1 %2639 }
 0x6d7   :  { %v2643_v57 = vmul.f32 0.03125, %v2640_v56  ;;  %v2637_v59 = vpop.xlane.xlu0 %2636 }
 0x6d8   :  { %v2642_v0 = vmul.f32 0.03125, %v2637_v59 }
 0x6d9   :  { %v2645_v60 = vsub.f32 %v2632_v50, %v2643_v57 }
 0x6da   :  { %v2644_v61 = vsub.f32 %v2631_v53, %v2642_v0 }
 0x6db   :  { %v2647_v1 = vmul.f32 %v2645_v60, %v2645_v60 }
 0x6dc   :  { %v2646_v63 = vmul.f32 %v2644_v61, %v2644_v61 }
 0x6dd   :  { %v2651_v52 = vsel %vm180_vm0, %v2647_v1, 0.0  ;;  %v5901_v1 = vld [vmem:[%s8433_s4 + $0x88] sm:$0xff] }
 0x6de   :  { %v2648_v26 = vsel %vm180_vm0, %v2646_v63, 0.0 }
 0x6df   :  { %2649 = vadd.xlane.f32.xlu0 %v2648_v26  ;;  %v5900_v26 = vld [vmem:[%s8433_s4 + $0x80] sm:$0xff] }
 0x6e0   :  { %v7047_v51 = vpack.c.bf16 %v5901_v1, %v5900_v26  ;;  %v5956_v26 = vld [vmem:[%s8434_s3 + $0xe0] sm:$0xff]  ;;  %v5957_v1 = vld [vmem:[%s8434_s3 + $0xe8] sm:$0xff] }
 0x6e2   :  { %7048 = vmatprep.subr.bf16.mxu1 %v7047_v51 }
 0x6e3   :  { %2652 = vadd.xlane.f32.xlu0 %v2651_v52  ;;  %v5916_v52 = vld [vmem:[%s8433_s4 + $0xc0] sm:$0xff] }
 0x6e4   :  { %v7063_v3 = vpack.c.bf16 %v5917_v2, %v5916_v52  ;;  %v5981_v2 = vld [vmem:[%s8436_s25 + $0xc8] sm:$0xff] }
 0x6e6   :  { %7064 = vmatprep.subr.bf16.mxu0 %v7063_v3 }
 0x76c   :  { %v2650_v24 = vpop.xlane.xlu0 %2649 }
 0x76d   :  { %v2654_v13 = vmul.f32 0.03125, %v2650_v24 }
 0x76f   :  { %v2656_v14 = vadd.f32 1e-05, %v2654_v13 }
 0x770   :  { %v2653_v15 = vpop.xlane.xlu0 %2652 }
 0x771   :  { %7222 = vrsqrt.f32 %v2656_v14  ;;  %v2655_v16 = vmul.f32 0.03125, %v2653_v15 }
 0x773   :  { %v2657_v17 = vadd.f32 1e-05, %v2655_v16 }
 0x775   :  { %7224 = vrsqrt.f32 %v2657_v17 }
 0x77b   :  { %v7223_v19 = vpop.eup %7222 }
 0x77c   :  { %v2660_v22 = vmul.f32 %v7223_v19, %v2644_v61 }
 0x77e   :  { %v2668_v25 = vmul.f32 %v5890_v21, %v2660_v22 }
 0x77f   :  { %v7225_v27 = vpop.eup %7224 }
 0x780   :  { %v2661_v28 = vmul.f32 %v7225_v27, %v2645_v60  ;;  %v2676_v29 = vadd.f32 %v5891_v23, %v2668_v25  ;;  %v5899_v27 = vld [vmem:[%s8414_s18] ss:$0 sm:$0xff] }
 0x782   :  { %v2669_v30 = vmul.f32 %v5890_v21, %v2661_v28  ;;  %6601 = vmatprep.mubr.msk.f32.mxu1 %vm180_vm0, %v2676_v29  ;;  %v5898_v21 = vld [vmem:[%s8413_s17] ss:$0 sm:$0xff] }
 0x784   :  { %v2677_v31 = vadd.f32 %v5891_v23, %v2669_v30  ;;  %v5910_v30 = vld [vmem:[%s8433_s4 + $0xb0] sm:$0xff] }
 0x786   :  { %6602 = vmatmul.mubr.msk.f32.vlgmr.msra.gmra.mrb[34].mxu1 %vm180_vm0, %v2677_v31 }
 0x787   :  { %7050 = vmatpush3.bf16.msra.mxu1 %v7047_v51  ;;  %v5980_v51 = vld [vmem:[%s8436_s25 + $0xc0] sm:$0xff] }
 0x788   :  { %7052 = vmatprep.subr.bf16.mxu1 %v7051_v18  ;;  %v7127_v4 = vpack.c.bf16 %v5981_v2, %v5980_v51 }
 0x78b   :  { %7054 = vmatpush3.bf16.msra.mxu1 %v7051_v18  ;;  %v5982_v18 = vld [vmem:[%s8436_s25 + $0xd0] sm:$0xff] }
 0x78c   :  { %7056 = vmatprep.subr.bf16.mxu1 %v7055_v10  ;;  %v7131_v9 = vpack.c.bf16 %v5983_v6, %v5982_v18 }
 0x859   :  { %v6603_v36 = vpop.f32.mrb[34].mxu1 }
 0x85a   :  { %v2767_v37 = vadd.f32 %v6603_v36, %v5892_v35  ;;  %v2761_v38 = vpop.f32.mrb[35].mxu1  ;;  %v5924_v36 = vld [vmem:[%s8433_s4 + $0xe0] sm:$0xff] }
 0x85b   :  { %v2762_v40 = vadd.f32 %v5892_v35, %v2761_v38  ;;  %v7083_v38 = vpack.c.bf16 %v5935_v33, %v5934_v32  ;;  %v5905_v32 = vld [vmem:[%s8402_s6 + $0x4] ss:$0 sm:$0xff] }
 0x85c   :  { %v2771_v42 = vmax.f32 %v2767_v37, 0.0 }
 0x85d   :  { %v2770_v41 = vmax.f32 %v2762_v40, 0.0  ;;  %v5925_v40 = vld [vmem:[%s8433_s4 + $0xe8] sm:$0xff] }
 0x85f   :  { %6620 = vmatprep.mubr.msk.f32.mxu0 %vm2787_vm5, %v2770_v41  ;;  %v5948_v41 = vld [vmem:[%s8434_s3 + $0xc0] sm:$0xff] }
 0x860   :  { %6621 = vmatmul.mubr.msk.f32.vlgmr.msra.gmra.mrb[26].mxu0 %vm2787_vm5, %v2771_v42  ;;  %v5949_v42 = vld [vmem:[%s8434_s3 + $0xc8] sm:$0xff] }
 0x861   :  { %7066 = vmatpush3.bf16.msra.mxu0 %v7063_v3  ;;  %v7103_v3 = vpack.c.bf16 %v5957_v1, %v5956_v26 }
 0x862   :  { %7068 = vmatprep.subr.bf16.mxu0 %v7067_v7 }
 0x865   :  { %7070 = vmatpush3.bf16.msra.mxu0 %v7067_v7  ;;  %v7107_v7 = vpack.c.bf16 %v5959_v5, %v5958_v58 }
 0x866   :  { %7080 = vmatprep.subr.bf16.mxu0 %v7079_v12 }
 0x933   :  { %v6622_v44 = vpop.f32.mrb[26].mxu0 }
 0x934   :  { %v2866_v45 = vadd.f32 %v6622_v44, %v5895_v43  ;;  %v2860_v46 = vpop.f32.mrb[27].mxu0  ;;  %v7095_v44 = vpack.c.bf16 %v5949_v42, %v5948_v41  ;;  %v5945_v42 = vld [vmem:[%s8403_s7 + $0x5] ss:$0 sm:$0xff] }
 0x935   :  { %v2861_v47 = vadd.f32 %v5895_v43, %v2860_v46  ;;  %v7071_v43 = vpack.c.bf16 %v5925_v40, %v5924_v36  ;;  %v5927_v46 = vld [vmem:[%s8433_s4 + $0xf8] sm:$0xff] }
 0x936   :  { %v2870_v48 = vadd.f32 %v2866_v45, %v2677_v31  ;;  %v5911_v31 = vld [vmem:[%s8433_s4 + $0xb8] sm:$0xff]  ;;  %v5926_v45 = vld [vmem:[%s8433_s4 + $0xf0] sm:$0xff] }
 0x937   :  { %v2869_v49 = vadd.f32 %v2861_v47, %v2676_v29  ;;  %v7059_v37 = vpack.c.bf16 %v5911_v31, %v5910_v30  ;;  %v5950_v47 = vld [vmem:[%s8434_s3 + $0xd0] sm:$0xff] }
 0x938   :  { %v2876_v20 = vsel %vm180_vm0, %v2870_v48, 0.0 }
 0x939   :  { %2877 = vadd.xlane.f32.xlu1 %v2876_v20  ;;  %v2873_v50 = vsel %vm180_vm0, %v2869_v49, 0.0 }
 0x93a   :  { %2874 = vadd.xlane.f32.xlu0 %v2873_v50  ;;  %v5940_v50 = vld [vmem:[%s8434_s3 + $0xa0] sm:$0xff] }
 0x9c6   :  { %v2878_v53 = vpop.xlane.xlu1 %2877 }
 0x9c7   :  { %v2880_v54 = vmul.f32 0.03125, %v2878_v53  ;;  %v2875_v55 = vpop.xlane.xlu0 %2874  ;;  %v5941_v53 = vld [vmem:[%s8434_s3 + $0xa8] sm:$0xff] }
 0x9c8   :  { %v2879_v56 = vmul.f32 0.03125, %v2875_v55  ;;  %v5965_v55 = vld [vmem:[%s8436_s25 + $0x88] sm:$0xff] }
 0x9c9   :  { %v2882_v57 = vsub.f32 %v2870_v48, %v2880_v54  ;;  %v5951_v48 = vld [vmem:[%s8434_s3 + $0xd8] sm:$0xff]  ;;  %v5964_v54 = vld [vmem:[%s8436_s25 + $0x80] sm:$0xff] }
 0x9ca   :  { %v2881_v59 = vsub.f32 %v2869_v49, %v2879_v56  ;;  %v7075_v49 = vpack.c.bf16 %v5927_v46, %v5926_v45  ;;  %v7099_v20 = vpack.c.bf16 %v5951_v48, %v5950_v47  ;;  %v7087_v56 = vpack.c.bf16 %v5941_v53, %v5940_v50  ;;  %v5913_v47 = vld [vmem:[%s8402_s6 + $0x5] ss:$0 sm:$0xff]  ;;  %v5953_v50 = vld [vmem:[%s8403_s7 + $0x6] ss:$0 sm:$0xff] }
 0x9cb   :  { %v2884_v0 = vmul.f32 %v2882_v57, %v2882_v57 }
 0x9cc   :  { %v2883_v60 = vmul.f32 %v2881_v59, %v2881_v59 }
 0x9cd   :  { %v2888_v61 = vsel %vm180_vm0, %v2884_v0, 0.0  ;;  %v5943_v0 = vld [vmem:[%s8434_s3 + $0xb8] sm:$0xff] }
 0x9ce   :  { %2889 = vadd.xlane.f32.xlu1 %v2888_v61  ;;  %v2885_v63 = vsel %vm180_vm0, %v2883_v60, 0.0  ;;  %v5966_v60 = vld [vmem:[%s8436_s25 + $0x90] sm:$0xff]  ;;  %v5967_v61 = vld [vmem:[%s8436_s25 + $0x98] sm:$0xff] }
 0x9cf   :  { %2886 = vadd.xlane.f32.xlu0 %v2885_v63  ;;  %v7115_v52 = vpack.c.bf16 %v5967_v61, %v5966_v60 }
 0xa5b   :  { %v2890_v24 = vpop.xlane.xlu1 %2889 }
 0xa5c   :  { %v2892_v13 = vmul.f32 0.03125, %v2890_v24  ;;  %v2887_v14 = vpop.xlane.xlu0 %2886 }
 0xa5d   :  { %v2891_v15 = vmul.f32 0.03125, %v2887_v14  ;;  %v5989_v14 = vld [vmem:[%s8436_s25 + $0xe8] sm:$0xff] }
 0xa5e   :  { %v2894_v16 = vadd.f32 1e-05, %v2892_v13  ;;  %v5988_v13 = vld [vmem:[%s8436_s25 + $0xe0] sm:$0xff] }
 0xa5f   :  { %v2893_v17 = vadd.f32 1e-05, %v2891_v15  ;;  %v7135_v15 = vpack.c.bf16 %v5989_v14, %v5988_v13 }
 0xa60   :  { %7226 = vrsqrt.f32 %v2894_v16  ;;  %v5990_v16 = vld [vmem:[%s8436_s25 + $0xf0] sm:$0xff] }
 0xa61   :  { %7228 = vrsqrt.f32 %v2893_v17  ;;  %v5991_v17 = vld [vmem:[%s8436_s25 + $0xf8] sm:$0xff] }
 0xa6a   :  { %v7227_v19 = vpop.eup %7226 }
 0xa6b   :  { %v7229_v22 = vpop.eup %7228  ;;  %v2898_v23 = vmul.f32 %v7227_v19, %v2882_v57  ;;  %v7111_v57 = vpack.c.bf16 %v5965_v55, %v5964_v54  ;;  %v7139_v19 = vpack.c.bf16 %v5991_v17, %v5990_v16  ;;  %v5921_v55 = vld [vmem:[%s8402_s6 + $0x6] ss:$0 sm:$0xff] }
 0xa6c   :  { %v2897_v25 = vmul.f32 %v7229_v22, %v2881_v59  ;;  %v5942_v59 = vld [vmem:[%s8434_s3 + $0xb0] sm:$0xff] }
 0xa6d   :  { %v2906_v28 = vmul.f32 %v5898_v21, %v2898_v23  ;;  %v7091_v63 = vpack.c.bf16 %v5943_v0, %v5942_v59 }
 0xa6e   :  { %v2905_v29 = vmul.f32 %v5898_v21, %v2897_v25 }
 0xa6f   :  { %v7964_v35 = vadd.f32 %v5899_v27, %v2906_v28 }
 0xa70   :  { %v7962_v34 = vadd.f32 %v5899_v27, %v2905_v29  ;;  %v5937_v27 = vld [vmem:[%s8403_s7 + $0x4] ss:$0 sm:$0xff] }
 0xa72   :  { %6631 = vmatprep.mubr.msk.f32.mxu1 %vm180_vm0, %v7962_v34  ;;  %6653 = vmatprep.mubr.msk.f32.mxu0 %vm180_vm0, %v7962_v34 }
 0xa73   :  { %6632 = vmatmul.mubr.msk.f32.vlgmr.msra.gmra.mrb[36].mxu1 %vm180_vm0, %v7964_v35  ;;  %6654 = vmatmul.mubr.msk.f32.vlgmr.msra.gmra.mrb[28].mxu0 %vm180_vm0, %v7964_v35 }
 0xa74   :  { %7058 = vmatpush3.bf16.msra.mxu1 %v7055_v10  ;;  %7082 = vmatpush3.bf16.msra.mxu0 %v7079_v12  ;;  %v7119_v10 = vpack.c.bf16 %v5973_v8, %v5972_v62  ;;  %v5975_v12 = vld [vmem:[%s8436_s25 + $0xb8] sm:$0xff] }
 0xa75   :  { %6642 = vmatprep.mubr.msk.f32.mxu1 %vm180_vm0, %v7962_v34  ;;  %6675 = vmatprep.mubr.msk.f32.mxu0 %vm180_vm0, %v7962_v34  ;;  %v7123_v24 = vpack.c.bf16 %v5975_v12, %v5974_v11 }
 0xa76   :  { %7060 = vmatprep.subr.bf16.mxu1 %v7059_v37  ;;  %7084 = vmatprep.subr.bf16.mxu0 %v7083_v38 }
 0xa78   :  { %7062 = vmatpush3.bf16.msra.mxu1 %v7059_v37  ;;  %7086 = vmatpush3.bf16.msra.mxu0 %v7083_v38 }
 0xa79   :  { %7072 = vmatprep.subr.bf16.mxu1 %v7071_v43  ;;  %7096 = vmatprep.subr.bf16.mxu0 %v7095_v44 }
 0xa7b   :  { %6643 = vmatmul.mubr.msk.f32.vlgmr.msra.gmra.mrb[38].mxu1 %vm180_vm0, %v7964_v35  ;;  %6676 = vmatmul.mubr.msk.f32.vlgmr.msra.gmra.mrb[30].mxu0 %vm180_vm0, %v7964_v35 }
 0xa7c   :  { %7074 = vmatpush3.bf16.msra.mxu1 %v7071_v43  ;;  %6664 = vmatprep.mubr.msk.f32.mxu1 %vm180_vm0, %v7962_v34  ;;  %v5969_v43 = vld [vmem:[%s8404_s8 + $0x4] ss:$0 sm:$0xff] }
 0xa7d   :  { %7098 = vmatpush3.bf16.msra.mxu0 %v7095_v44  ;;  %6697 = vmatprep.mubr.msk.f32.mxu0 %vm180_vm0, %v7962_v34 }
 0xa7e   :  { %7076 = vmatprep.subr.bf16.mxu1 %v7075_v49  ;;  %7100 = vmatprep.subr.bf16.mxu0 %v7099_v20 }
 0xa80   :  { %7078 = vmatpush3.bf16.msra.mxu1 %v7075_v49 }
 0xa81   :  { %7102 = vmatpush3.bf16.msra.mxu0 %v7099_v20  ;;  %7088 = vmatprep.subr.bf16.mxu1 %v7087_v56 }
 0xa82   :  { %7112 = vmatprep.subr.bf16.mxu0 %v7111_v57 }
 0xa83   :  { %6665 = vmatmul.mubr.msk.f32.vlgmr.msra.gmra.mrb[40].mxu1 %vm180_vm0, %v7964_v35 }
 0xa84   :  { %6698 = vmatmul.mubr.msk.f32.vlgmr.msra.gmra.mrb[32].mxu0 %vm180_vm0, %v7964_v35  ;;  %7090 = vmatpush3.bf16.msra.mxu1 %v7087_v56 }
 0xa85   :  { %6686 = vmatprep.mubr.msk.f32.mxu1 %vm180_vm0, %v7962_v34  ;;  %7114 = vmatpush3.bf16.msra.mxu0 %v7111_v57  ;;  %v5961_v57 = vld [vmem:[%s8403_s7 + $0x7] ss:$0 sm:$0xff] }
 0xa86   :  { %6719 = vmatprep.mubr.msk.f32.mxu0 %vm180_vm0, %v7962_v34  ;;  %7092 = vmatprep.subr.bf16.mxu1 %v7091_v63 }
 0xa87   :  { %7116 = vmatprep.subr.bf16.mxu0 %v7115_v52 }
 0xa88   :  { %7094 = vmatpush3.bf16.msra.mxu1 %v7091_v63  ;;  %v5929_v63 = vld [vmem:[%s8402_s6 + $0x7] ss:$0 sm:$0xff] }
 0xa89   :  { %7118 = vmatpush3.bf16.msra.mxu0 %v7115_v52  ;;  %7104 = vmatprep.subr.bf16.mxu1 %v7103_v3 }
 0xa8a   :  { %7128 = vmatprep.subr.bf16.mxu0 %v7127_v4 }
 0xa8b   :  { %6687 = vmatmul.mubr.msk.f32.vlgmr.msra.gmra.mrb[42].mxu1 %vm180_vm0, %v7964_v35 }
 0xa8c   :  { %6720 = vmatmul.mubr.msk.f32.vlgmr.msra.gmra.mrb[34].mxu0 %vm180_vm0, %v7964_v35  ;;  %7106 = vmatpush3.bf16.msra.mxu1 %v7103_v3 }
 0xa8d   :  { %6708 = vmatprep.mubr.msk.f32.mxu1 %vm180_vm0, %v7962_v34  ;;  %7130 = vmatpush3.bf16.msra.mxu0 %v7127_v4 }
 0xa8e   :  { %6741 = vmatprep.mubr.msk.f32.mxu0 %vm180_vm0, %v7962_v34  ;;  %7108 = vmatprep.subr.bf16.mxu1 %v7107_v7 }
 0xa8f   :  { %7132 = vmatprep.subr.bf16.mxu0 %v7131_v9 }
 0xa90   :  { %7110 = vmatpush3.bf16.msra.mxu1 %v7107_v7 }
 0xa91   :  { %7134 = vmatpush3.bf16.msra.mxu0 %v7131_v9  ;;  %7120 = vmatprep.subr.bf16.mxu1 %v7119_v10 }
 0xa92   :  { %6755 = vmatprep.subr.mxu0 %v7294_v39 }
 0xa93   :  { %6709 = vmatmul.mubr.msk.f32.vlgmr.msra.gmra.mrb[44].mxu1 %vm180_vm0, %v7964_v35 }
 0xa94   :  { %6742 = vmatmul.mubr.msk.f32.vlgmr.msra.gmra.mrb[36].mxu0 %vm180_vm0, %v7964_v35  ;;  %7122 = vmatpush3.bf16.msra.mxu1 %v7119_v10 }
 0xa95   :  { %6730 = vmatprep.mubr.msk.f32.mxu1 %vm180_vm0, %v7962_v34  ;;  %7124 = vmatprep.subr.bf16.mxu1 %v7123_v24 }
 0xa96   :  { %6757 = vmatprep.mubr.msk.f32.mxu0 %vm7295_vm1, %v7294_v39 }
 0xa98   :  { %7126 = vmatpush3.bf16.msra.mxu1 %v7123_v24 }
 0xa99   :  { %7136 = vmatprep.subr.bf16.mxu1 %v7135_v15 }
 0xa9b   :  { %6731 = vmatmul.mubr.msk.f32.vlgmr.msra.gmra.mrb[46].mxu1 %vm180_vm0, %v7964_v35 }
 0xa9c   :  { %7138 = vmatpush3.bf16.msra.mxu1 %v7135_v15  ;;  %6752 = vmatprep.mubr.msk.f32.mxu1 %vm180_vm0, %v7962_v34 }
 0xa9d   :  { %7140 = vmatprep.subr.bf16.mxu1 %v7139_v19 }
 0xaa0   :  { %7142 = vmatpush3.bf16.msra.mxu1 %v7139_v19 }
 0xaa1   :  { %6760 = vmatprep.subr.mxu1 %v7294_v39 }
 0xaa3   :  { %6753 = vmatmul.mubr.msk.f32.vlgmr.msra.gmra.mrb[48].mxu1 %vm180_vm0, %v7964_v35 }
 0xaa4   :  { %6762 = vmatprep.mubr.msk.f32.mxu1 %vm7295_vm1, %v7294_v39 }
 0xb46   :  { %v6633_v21 = vpop.f32.mrb[36].mxu1  ;;  %v8116_v22 = vpop.f32.mrb[28].mxu0 }
 0xb47   :  { %v3000_v23 = vpop.f32.mrb[37].mxu1  ;;  %v3176_v25 = vpop.f32.mrb[29].mxu0  ;;  %v3006_v3 = vadd.f32 %v6633_v21, %v5905_v32  ;;  %v3182_v7 = vadd.f32 %v8116_v22, %v5921_v55 }
 0xb48   :  { %v3001_v36 = vadd.f32 %v5905_v32, %v3000_v23  ;;  %v3177_v0 = vadd.f32 %v5921_v55, %v3176_v25 }
 0xb4e   :  { %v6644_v28 = vpop.f32.mrb[38].mxu1  ;;  %v6677_v29 = vpop.f32.mrb[30].mxu0 }
 0xb4f   :  { %v3088_v30 = vpop.f32.mrb[39].mxu1  ;;  %v3352_v31 = vpop.f32.mrb[31].mxu0  ;;  %v3358_v51 = vadd.f32 %v6677_v29, %v5937_v27  ;;  %v3094_v5 = vadd.f32 %v6644_v28, %v5913_v47 }
 0xb50   :  { %v3353_v33 = vadd.f32 %v5937_v27, %v3352_v31  ;;  %v3089_v54 = vadd.f32 %v5913_v47, %v3088_v30 }
 0xb52   :  { %6756 = vmatpush3.xpose.msk.msra.mxu0 %vm1226_vm2, %v3353_v33 }
 0xb53   :  { %6765 = vmatprep.subr.mxu0 %v7294_v39 }
 0xb55   :  { %6758 = vmatmul.mubr.msk.f32.vlgmr.msra.gmra.mrb[38].mxu0 %vm1226_vm2, %v3001_v36 }
 0xb56   :  { %v8127_v37 = vpop.f32.mrb[40].mxu1  ;;  %6767 = vmatprep.mubr.msk.f32.mxu0 %vm7295_vm1, %v7294_v39 }
 0xb57   :  { %v6699_v38 = vpop.f32.mrb[32].mxu0  ;;  %v3264_v40 = vpop.f32.mrb[41].mxu1  ;;  %v3270_v9 = vadd.f32 %v8127_v37, %v5929_v63 }
 0xb58   :  { %v3528_v41 = vpop.f32.mrb[33].mxu0  ;;  %v3265_v52 = vadd.f32 %v5929_v63, %v3264_v40  ;;  %v3534_v18 = vadd.f32 %v6699_v38, %v5953_v50 }
 0xb59   :  { %v3529_v56 = vadd.f32 %v5953_v50, %v3528_v41 }
 0xb5e   :  { %v6688_v44 = vpop.f32.mrb[42].mxu1 }
 0xb5f   :  { %v6721_v45 = vpop.f32.mrb[34].mxu0  ;;  %v3440_v46 = vpop.f32.mrb[43].mxu1  ;;  %v3446_v58 = vadd.f32 %v6688_v44, %v5945_v42 }
 0xb60   :  { %v8140_v48 = vadd.f32 %v6721_v45, %v5969_v43  ;;  %v3441_v49 = vadd.f32 %v5945_v42, %v3440_v46  ;;  %v3704_v20 = vpop.f32.mrb[35].mxu0 }
 0xb61   :  { %v3705_v53 = vadd.f32 %v5969_v43, %v3704_v20 }
 0xb62   :  { %6766 = vmatpush3.xpose.msk.msra.mxu0 %vm1226_vm2, %v3441_v49 }
 0xb63   :  { %6761 = vmatpush3.msra.mxu1 %v3705_v53  ;;  %6775 = vmatprep.subr.mxu0 %v7294_v39 }
 0xb64   :  { %6770 = vmatprep.subr.mxu1 %v7294_v39 }
 0xb65   :  { %6768 = vmatmul.mubr.msk.f32.vlgmr.msra.gmra.mrb[40].mxu0 %vm1226_vm2, %v3089_v54 }
 0xb66   :  { %v6710_v59 = vpop.f32.mrb[44].mxu1  ;;  %6776 = vmatpush3.xpose.msk.msra.mxu0 %vm1226_vm2, %v3529_v56  ;;  %6777 = vmatprep.mubr.msk.f32.mxu0 %vm7295_vm1, %v7294_v39 }
 0xb67   :  { %v8158_v60 = vpop.f32.mrb[36].mxu0  ;;  %v3616_v61 = vpop.f32.mrb[45].mxu1  ;;  %6785 = vmatprep.subr.mxu0 %v7294_v39  ;;  %v3622_v8 = vadd.f32 %v6710_v59, %v5961_v57 }
 0xb68   :  { %v3617_v26 = vadd.f32 %v5961_v57, %v3616_v61  ;;  %v8164_v1 = vpop.f32.mrb[37].mxu0 }
 0xb69   :  { %6778 = vmatmul.mubr.msk.f32.vlgmr.msra.gmra.mrb[42].mxu0 %vm1226_vm2, %v3177_v0 }
 0xb6a   :  { %6786 = vmatpush3.xpose.msk.msra.mxu0 %vm1226_vm2, %v3617_v26  ;;  %6787 = vmatprep.mubr.msk.f32.mxu0 %vm7295_vm1, %v7294_v39 }
 0xb6b   :  { %6795 = vmatprep.subr.mxu0 %v7294_v39 }
 0xb6d   :  { %6788 = vmatmul.mubr.msk.f32.vlgmr.msra.gmra.mrb[44].mxu0 %vm1226_vm2, %v3265_v52 }
 0xb6e   :  { %v8172_v2 = vpop.f32.mrb[46].mxu1  ;;  %6796 = vmatpush3.xpose.msk.msra.mxu0 %vm1226_vm2, %v3358_v51  ;;  %6797 = vmatprep.mubr.msk.f32.mxu0 %vm7295_vm1, %v7294_v39 }
 0xb6f   :  { %v8177_v4 = vpop.f32.mrb[47].mxu1  ;;  %6805 = vmatprep.subr.mxu0 %v7294_v39 }
 0xb71   :  { %6798 = vmatmul.mubr.msk.f32.vlgmr.msra.gmra.mrb[46].mxu0 %vm1226_vm2, %v3006_v3 }
 0xb72   :  { %6806 = vmatpush3.xpose.msk.msra.mxu0 %vm1226_vm2, %v3446_v58  ;;  %6807 = vmatprep.mubr.msk.f32.mxu0 %vm7295_vm1, %v7294_v39 }
 0xb73   :  { %6815 = vmatprep.subr.mxu0 %v7294_v39 }
 0xb75   :  { %6808 = vmatmul.mubr.msk.f32.vlgmr.msra.gmra.mrb[48].mxu0 %vm1226_vm2, %v3094_v5 }
 0xb76   :  { %v8186_v6 = vpop.f32.mrb[48].mxu1  ;;  %6816 = vmatpush3.xpose.msk.msra.mxu0 %vm1226_vm2, %v3534_v18  ;;  %6817 = vmatprep.mubr.msk.f32.mxu0 %vm7295_vm1, %v7294_v39 }
 0xb77   :  { %v8192_v62 = vpop.f32.mrb[49].mxu1  ;;  %6825 = vmatprep.subr.mxu0 %v7294_v39 }
 0xb79   :  { %6818 = vmatmul.mubr.msk.f32.vlgmr.msra.gmra.mrb[50].mxu0 %vm1226_vm2, %v3182_v7 }
 0xb7a   :  { %6826 = vmatpush3.xpose.msk.msra.mxu0 %vm1226_vm2, %v3622_v8  ;;  %6827 = vmatprep.mubr.msk.f32.mxu0 %vm7295_vm1, %v7294_v39 }
 0xb7d   :  { %6828 = vmatmul.mubr.msk.f32.vlgmr.msra.gmra.mrb[52].mxu0 %vm1226_vm2, %v3270_v9 }
 0xc28   :  { %v4049_v10 = vpop.f32.mrb[38].mxu0 }
 0xc29   :  { %v6759_v11 = vpop.f32.mrb[39].mxu0  ;;  %v4053_v12 = vsel %vm1226_vm2, %v4049_v10, -inf }
 0xc2a   :  { %4054 = vmax.xlane.f32.xlu0 %v4053_v12 }
 0xc38   :  { %v4209_v24 = vpop.f32.mrb[40].mxu0 }
 0xc39   :  { %v6769_v13 = vpop.f32.mrb[41].mxu0  ;;  %v4213_v14 = vsel %vm1226_vm2, %v4209_v24, -inf }
 0xc3a   :  { %4214 = vmax.xlane.f32.xlu1 %v4213_v14 }
 0xc3c   :  { %v4369_v15 = vpop.f32.mrb[42].mxu0 }
 0xc3d   :  { %v6779_v16 = vpop.f32.mrb[43].mxu0  ;;  %v4373_v17 = vsel %vm1226_vm2, %v4369_v15, -inf }
 0xc3e   :  { %4374 = vmax.xlane.f32.xlu0 %v4373_v17 }
 0xc40   :  { %v4529_v19 = vpop.f32.mrb[44].mxu0 }
 0xc41   :  { %v6789_v21 = vpop.f32.mrb[45].mxu0  ;;  %v4533_v22 = vsel %vm1226_vm2, %v4529_v19, -inf }
 0xc42   :  { %4534 = vmax.xlane.f32.xlu1 %v4533_v22  ;;  %v5977_v22 = vld [vmem:[%s8404_s8 + $0x5] ss:$0 sm:$0xff] }
 0xc44   :  { %v4704_v23 = vpop.f32.mrb[46].mxu0 }
 0xc45   :  { %v6799_v25 = vpop.f32.mrb[47].mxu0  ;;  %v4708_v27 = vsel %vm1226_vm2, %v4704_v23, -inf }
 0xc46   :  { %4709 = vmax.xlane.f32.xlu0 %v4708_v27  ;;  %v3793_v27 = vadd.f32 %v5977_v22, %v8177_v4 }
 0xc48   :  { %v4864_v28 = vpop.f32.mrb[48].mxu0 }
 0xc49   :  { %v6809_v29 = vpop.f32.mrb[49].mxu0  ;;  %v4868_v30 = vsel %vm1226_vm2, %v4864_v28, -inf }
 0xc4a   :  { %4869 = vmax.xlane.f32.xlu1 %v4868_v30 }
 0xc4c   :  { %v5024_v31 = vpop.f32.mrb[50].mxu0 }
 0xc4d   :  { %v6819_v32 = vpop.f32.mrb[51].mxu0  ;;  %v5028_v33 = vsel %vm1226_vm2, %v5024_v31, -inf }
 0xc4e   :  { %5029 = vmax.xlane.f32.xlu0 %v5028_v33 }
 0xc50   :  { %v5184_v36 = vpop.f32.mrb[52].mxu0 }
 0xc51   :  { %v6829_v37 = vpop.f32.mrb[53].mxu0  ;;  %v5188_v38 = vsel %vm1226_vm2, %v5184_v36, -inf }
 0xc52   :  { %5189 = vmax.xlane.f32.xlu1 %v5188_v38  ;;  %v5993_v37 = vld [vmem:[%s8404_s8 + $0x7] ss:$0 sm:$0xff] }
 0xcb7   :  { %v4055_v40 = vpop.xlane.xlu0 %4054 }
 0xcb8   :  { %v4056_v41 = vsub.f32 %v4049_v10, %v4055_v40 }
 0xcba   :  { %v4057_v42 = vmul.f32 1.442695, %v4056_v41 }
 0xcbc   :  { %7230 = vpow2.f32 %v4057_v42  ;;  %v3969_v42 = vadd.f32 %v5993_v37, %v8192_v62 }
 0xcc6   :  { %v7231_v43 = vpop.eup %7230 }
 0xcc7   :  { %v4215_v44 = vpop.xlane.xlu1 %4214  ;;  %v4059_v45 = vsel %vm1226_vm2, %v7231_v43, 0.0 }
 0xcc8   :  { %v4216_v46 = vsub.f32 %v4209_v24, %v4215_v44  ;;  %4060 = vadd.xlane.f32.xlu0 %v4059_v45 }
 0xcca   :  { %v4217_v47 = vmul.f32 1.442695, %v4216_v46 }
 0xccb   :  { %v4375_v49 = vpop.xlane.xlu0 %4374 }
 0xccc   :  { %7232 = vpow2.f32 %v4217_v47  ;;  %v4376_v20 = vsub.f32 %v4369_v15, %v4375_v49  ;;  %v3798_v47 = vadd.f32 %v8172_v2, %v5977_v22 }
 0xcce   :  { %v4377_v50 = vmul.f32 1.442695, %v4376_v20 }
 0xccf   :  { %v4535_v53 = vpop.xlane.xlu1 %4534 }
 0xcd0   :  { %7234 = vpow2.f32 %v4377_v50  ;;  %v4536_v54 = vsub.f32 %v4529_v19, %v4535_v53  ;;  %v3974_v53 = vadd.f32 %v8186_v6, %v5993_v37  ;;  %v6020_v6 = vld [vmem:[%s8405_s9 + $0x20] sm:$0xff] }
 0xcd2   :  { %v4537_v55 = vmul.f32 1.442695, %v4536_v54 }
 0xcd3   :  { %v4710_v56 = vpop.xlane.xlu0 %4709 }
 0xcd4   :  { %7236 = vpow2.f32 %v4537_v55  ;;  %v4711_v57 = vsub.f32 %v4704_v23, %v4710_v56 }
 0xcd6   :  { %v7233_v59 = vpop.eup %7232  ;;  %v4712_v0 = vmul.f32 1.442695, %v4711_v57 }
 0xcd7   :  { %v4870_v61 = vpop.xlane.xlu1 %4869  ;;  %v4219_v63 = vsel %vm1226_vm2, %v7233_v59, 0.0 }
 0xcd8   :  { %7238 = vpow2.f32 %v4712_v0  ;;  %v4871_v26 = vsub.f32 %v4864_v28, %v4870_v61  ;;  %4220 = vadd.xlane.f32.xlu1 %v4219_v63  ;;  %v6021_v61 = vld [vmem:[%s8405_s9 + $0x28] sm:$0xff] }
 0xcd9   :  { %v7143_v63 = vpack.c.bf16 %v6021_v61, %v6020_v6 }
 0xcda   :  { %v7235_v52 = vpop.eup %7234  ;;  %v4872_v51 = vmul.f32 1.442695, %v4871_v26 }
 0xcdb   :  { %v5030_v3 = vpop.xlane.xlu0 %5029  ;;  %v4379_v58 = vsel %vm1226_vm2, %v7235_v52, 0.0  ;;  %7144 = vmatprep.subr.bf16.mxu0 %v7143_v63 }
 0xcdc   :  { %7240 = vpow2.f32 %v4872_v51  ;;  %v5031_v5 = vsub.f32 %v5024_v31, %v5030_v3  ;;  %4380 = vadd.xlane.f32.xlu0 %v4379_v58  ;;  %v5985_v31 = vld [vmem:[%s8404_s8 + $0x6] ss:$0 sm:$0xff]  ;;  %7146 = vmatpush3.bf16.msra.mxu0 %v7143_v63  ;;  %v6023_v51 = vld [vmem:[%s8405_s9 + $0x38] sm:$0xff] }
 0xcde   :  { %v7237_v18 = vpop.eup %7236  ;;  %v5032_v7 = vmul.f32 1.442695, %v5031_v5 }
 0xcdf   :  { %v5190_v8 = vpop.xlane.xlu1 %5189  ;;  %v4539_v9 = vsel %vm1226_vm2, %v7237_v18, 0.0 }
 0xce0   :  { %7242 = vpow2.f32 %v5032_v7  ;;  %v5191_v10 = vsub.f32 %v5184_v36, %v5190_v8  ;;  %4540 = vadd.xlane.f32.xlu1 %v4539_v9  ;;  %v3881_v36 = vadd.f32 %v5985_v31, %v8164_v1 }
 0xce2   :  { %v7239_v11 = vpop.eup %7238  ;;  %v5192_v12 = vmul.f32 1.442695, %v5191_v10 }
 0xce3   :  { %v4714_v24 = vsel %vm1226_vm2, %v7239_v11, 0.0 }
 0xce4   :  { %7244 = vpow2.f32 %v5192_v12  ;;  %4715 = vadd.xlane.f32.xlu0 %v4714_v24 }
 0xce6   :  { %v7241_v13 = vpop.eup %7240 }
 0xce7   :  { %v4874_v14 = vsel %vm1226_vm2, %v7241_v13, 0.0 }
 0xce8   :  { %4875 = vadd.xlane.f32.xlu1 %v4874_v14 }
 0xcea   :  { %v8215_v15 = vpop.eup %7242 }
 0xceb   :  { %v5034_v16 = vsel %vm1226_vm2, %v8215_v15, 0.0 }
 0xcec   :  { %5035 = vadd.xlane.f32.xlu0 %v5034_v16 }
 0xcee   :  { %v8219_v17 = vpop.eup %7244 }
 0xcef   :  { %v5194_v19 = vsel %vm1226_vm2, %v8219_v17, 0.0 }
 0xcf0   :  { %5195 = vadd.xlane.f32.xlu1 %v5194_v19 }
 0xd55   :  { %v4061_v21 = vpop.xlane.xlu0 %4060 }
 0xd56   :  { %7246 = vrcp.f32 %v4061_v21 }
 0xd60   :  { %v7247_v23 = vpop.eup %7246 }
 0xd61   :  { %v4063_v25 = vmul.f32 %v7247_v23, %v7231_v43 }
 0xd63   :  { %6763 = vmatmul.mubr.msk.f32.vlgmr.msra.gmra.mrb[50].mxu1 %vm1226_vm2, %v4063_v25 }
 0xd64   :  { %6771 = vmatpush3.msra.mxu1 %v3793_v27  ;;  %6772 = vmatprep.mubr.msk.f32.mxu1 %vm7295_vm1, %v7294_v39 }
 0xd65   :  { %v4221_v28 = vpop.xlane.xlu1 %4220  ;;  %6780 = vmatprep.subr.mxu1 %v7294_v39 }
 0xd66   :  { %7248 = vrcp.f32 %v4221_v28  ;;  %v6025_v28 = vld [vmem:[%s8406_s10 + $0x1] ss:$0 sm:$0xff] }
 0xd69   :  { %v4381_v29 = vpop.xlane.xlu0 %4380 }
 0xd6a   :  { %7250 = vrcp.f32 %v4381_v29 }
 0xd6d   :  { %v4541_v30 = vpop.xlane.xlu1 %4540 }
 0xd6e   :  { %7252 = vrcp.f32 %v4541_v30 }
 0xd70   :  { %v7249_v32 = vpop.eup %7248 }
 0xd71   :  { %v4223_v4 = vmul.f32 %v7249_v32, %v7233_v59  ;;  %v4716_v33 = vpop.xlane.xlu0 %4715 }
 0xd72   :  { %7254 = vrcp.f32 %v4716_v33 }
 0xd73   :  { %6773 = vmatmul.mubr.msk.f32.vlgmr.msra.gmra.mrb[52].mxu1 %vm1226_vm2, %v4223_v4 }
 0xd74   :  { %v7251_v38 = vpop.eup %7250  ;;  %6781 = vmatpush3.msra.mxu1 %v3881_v36  ;;  %6782 = vmatprep.mubr.msk.f32.mxu1 %vm7295_vm1, %v7294_v39 }
 0xd75   :  { %v4383_v40 = vmul.f32 %v7251_v38, %v7235_v52  ;;  %v4876_v41 = vpop.xlane.xlu1 %4875  ;;  %6790 = vmatprep.subr.mxu1 %v7294_v39  ;;  %v6022_v52 = vld [vmem:[%s8405_s9 + $0x30] sm:$0xff] }
 0xd76   :  { %7256 = vrcp.f32 %v4876_v41  ;;  %v7147_v58 = vpack.c.bf16 %v6023_v51, %v6022_v52  ;;  %v6030_v51 = vld [vmem:[%s8411_s15 + $0x1] ss:$0 sm:$0xff] }
 0xd77   :  { %6783 = vmatmul.mubr.msk.f32.vlgmr.msra.gmra.mrb[54].mxu1 %vm1226_vm2, %v4383_v40 }
 0xd78   :  { %v7253_v1 = vpop.eup %7252  ;;  %6791 = vmatpush3.msra.mxu1 %v3969_v42  ;;  %6792 = vmatprep.mubr.msk.f32.mxu1 %vm7295_vm1, %v7294_v39 }
 0xd79   :  { %v4543_v43 = vmul.f32 %v7253_v1, %v7237_v18  ;;  %v5036_v44 = vpop.xlane.xlu0 %5035  ;;  %6800 = vmatprep.subr.mxu1 %v7294_v39  ;;  %7148 = vmatprep.subr.bf16.mxu0 %v7147_v58 }
 0xd7a   :  { %7258 = vrcp.f32 %v5036_v44  ;;  %7150 = vmatpush3.bf16.msra.mxu0 %v7147_v58  ;;  %v6031_v58 = vld [vmem:[%s8412_s16 + $0x1] ss:$0 sm:$0xff] }
 0xd7b   :  { %6793 = vmatmul.mubr.msk.f32.vlgmr.msra.gmra.mrb[56].mxu1 %vm1226_vm2, %v4543_v43 }
 0xd7c   :  { %v7255_v45 = vpop.eup %7254  ;;  %6801 = vmatpush3.msra.mxu1 %v8140_v48  ;;  %6802 = vmatprep.mubr.msk.f32.mxu1 %vm7295_vm1, %v7294_v39  ;;  %v3886_v48 = vadd.f32 %v8158_v60, %v5985_v31 }
 0xd7d   :  { %v4718_v62 = vmul.f32 %v7255_v45, %v7239_v11  ;;  %v5196_v46 = vpop.xlane.xlu1 %5195  ;;  %6810 = vmatprep.subr.mxu1 %v7294_v39 }
 0xd7e   :  { %7260 = vrcp.f32 %v5196_v46  ;;  %v6033_v46 = vld [vmem:[%s8407_s11 + $0x28] sm:$0xff] }
 0xd7f   :  { %6803 = vmatmul.mubr.msk.f32.vlgmr.msra.gmra.mrb[58].mxu1 %vm1226_vm2, %v4718_v62 }
 0xd80   :  { %v7257_v49 = vpop.eup %7256  ;;  %6811 = vmatpush3.msra.mxu1 %v3798_v47  ;;  %6812 = vmatprep.mubr.msk.f32.mxu1 %vm7295_vm1, %v7294_v39 }
 0xd81   :  { %v4878_v20 = vmul.f32 %v7257_v49, %v7241_v13  ;;  %6820 = vmatprep.subr.mxu1 %v7294_v39  ;;  %v6034_v49 = vld [vmem:[%s8407_s11 + $0x30] sm:$0xff] }
 0xd83   :  { %6813 = vmatmul.mubr.msk.f32.vlgmr.msra.gmra.mrb[60].mxu1 %vm1226_vm2, %v4878_v20  ;;  %v6035_v20 = vld [vmem:[%s8407_s11 + $0x38] sm:$0xff] }
 0xd84   :  { %v7259_v50 = vpop.eup %7258  ;;  %6821 = vmatpush3.msra.mxu1 %v3886_v48  ;;  %6822 = vmatprep.mubr.msk.f32.mxu1 %vm7295_vm1, %v7294_v39  ;;  %v7155_v48 = vpack.c.bf16 %v6035_v20, %v6034_v49 }
 0xd85   :  { %v5038_v2 = vmul.f32 %v7259_v50, %v8215_v15  ;;  %6830 = vmatprep.subr.mxu1 %v7294_v39  ;;  %v6040_v50 = vld [vmem:[%s8409_s13 + $0x40] sm:$0xff] }
 0xd87   :  { %6823 = vmatmul.mubr.msk.f32.vlgmr.msra.gmra.mrb[62].mxu1 %vm1226_vm2, %v5038_v2  ;;  %v6041_v2 = vld [vmem:[%s8409_s13 + $0x48] sm:$0xff] }
 0xd88   :  { %v7261_v54 = vpop.eup %7260  ;;  %6831 = vmatpush3.msra.mxu1 %v3974_v53  ;;  %6832 = vmatprep.mubr.msk.f32.mxu1 %vm7295_vm1, %v7294_v39  ;;  %v6042_v53 = vld [vmem:[%s8409_s13 + $0x50] sm:$0xff] }
 0xd89   :  { %v5198_v60 = vmul.f32 %v7261_v54, %v8219_v17  ;;  %v7159_v54 = vpack.c.bf16 %v6041_v2, %v6040_v50 }
 0xd8b   :  { %6833 = vmatmul.mubr.msk.f32.vlgmr.msra.gmra.mrb[64].mxu1 %vm1226_vm2, %v5198_v60  ;;  %v6043_v60 = vld [vmem:[%s8409_s13 + $0x58] sm:$0xff]  ;;  %7160 = vmatprep.subr.bf16.mxu0 %v7159_v54 }
 0xe36   :  { %v4133_v55 = vpop.f32.mrb[50].mxu1 }
 0xe37   :  { %v6764_v56 = vpop.f32.mrb[51].mxu1 }
 0xe38   :  { %v6044_v56 = vld [vmem:[%s8409_s13 + $0x60] sm:$0xff] }
 0xe46   :  { %v4293_v57 = vpop.f32.mrb[52].mxu1 }
 0xe47   :  { %4618 = vrot.lane.b32.xlu0 %v4293_v57, %s7296_s24  ;;  %v6774_v59 = vpop.f32.mrb[53].mxu1  ;;  %v6045_v57 = vld [vmem:[%s8409_s13 + $0x68] sm:$0xff] }
 0xe48   :  { %v7167_v59 = vpack.c.bf16 %v6045_v57, %v6044_v56  ;;  %v6055_v57 = vld [vmem:[%s8414_s18 + $0x1] ss:$0 sm:$0xff] }
 0xe4a   :  { %v4453_v0 = vpop.f32.mrb[54].mxu1 }
 0xe4b   :  { %4622 = vrot.lane.b32.xlu1 %v4453_v0, %s7297_s0  ;;  %v6784_v39 = vpop.f32.mrb[55].mxu1 }
 0xe4e   :  { %v4613_v26 = vpop.f32.mrb[56].mxu1 }
 0xe4f   :  { %4626 = vrot.lane.b32.xlu1 %v4613_v26, %s8437_s1  ;;  %v6794_v3 = vpop.f32.mrb[57].mxu1 }
 0xe52   :  { %v4788_v5 = vpop.f32.mrb[58].mxu1 }
 0xe53   :  { %v6804_v18 = vpop.f32.mrb[59].mxu1 }
 0xe56   :  { %v4948_v7 = vpop.f32.mrb[60].mxu1 }
 0xe57   :  { %5273 = vrot.lane.b32.xlu1 %v4948_v7, %s7296_s24  ;;  %v6814_v8 = vpop.f32.mrb[61].mxu1 }
 0xe5a   :  { %v5108_v9 = vpop.f32.mrb[62].mxu1 }
 0xe5b   :  { %5277 = vrot.lane.b32.xlu0 %v5108_v9, %s7297_s0  ;;  %v6824_v10 = vpop.f32.mrb[63].mxu1 }
 0xe5e   :  { %v5268_v11 = vpop.f32.mrb[64].mxu1 }
 0xe5f   :  { %5281 = vrot.lane.b32.xlu1 %v5268_v11, %s8437_s1  ;;  %v6834_v12 = vpop.f32.mrb[65].mxu1  ;;  %v6046_v11 = vld [vmem:[%s8409_s13 + $0x70] sm:$0xff] }
 0xe60   :  { %v6047_v12 = vld [vmem:[%s8409_s13 + $0x78] sm:$0xff] }
 0xeb9   :  { %v4619_v24 = vpop.permute.xlu0 %4618 }
 0xeba   :  { %v4629_v14 = vsel %vm1226_vm2, %v4133_v55, %v4619_v24  ;;  %v7163_v55 = vpack.c.bf16 %v6043_v60, %v6042_v53  ;;  %v7171_v24 = vpack.c.bf16 %v6047_v12, %v6046_v11 }
 0xebd   :  { %v4623_v13 = vpop.permute.xlu1 %4622 }
 0xebe   :  { %v4630_v15 = vsel %vm1880_vm3, %v4629_v14, %v4623_v13  ;;  %v6037_v13 = vld [vmem:[%s8408_s12 + $0x1] ss:$0 sm:$0xff] }
 0xec1   :  { %v4627_v16 = vpop.permute.xlu1 %4626 }
 0xec2   :  { %v4631_v17 = vsel %vm1882_vm4, %v4630_v15, %v4627_v16 }
 0xec3   :  { %6843 = vmatprep.mubr.msk.f32.mxu0 %vm180_vm0, %v4631_v17 }
 0xec9   :  { %v5274_v19 = vpop.permute.xlu1 %5273 }
 0xeca   :  { %v5284_v22 = vsel %vm1226_vm2, %v4788_v5, %v5274_v19 }
 0xecd   :  { %v5278_v21 = vpop.permute.xlu0 %5277 }
 0xece   :  { %v5285_v23 = vsel %vm1880_vm3, %v5284_v22, %v5278_v21  ;;  %v6049_v22 = vld [vmem:[%s8410_s14 + $0x1] ss:$0 sm:$0xff] }
 0xed1   :  { %v5282_v25 = vpop.permute.xlu1 %5281 }
 0xed2   :  { %v5286_v27 = vsel %vm1882_vm4, %v5285_v23, %v5282_v25 }
 0xed3   :  { %6844 = vmatmul.mubr.msk.f32.vlgmr.msra.gmra.mrb[54].mxu0 %vm180_vm0, %v5286_v27 }
 0xed4   :  { %7162 = vmatpush3.bf16.msra.mxu0 %v7159_v54  ;;  %v6054_v54 = vld [vmem:[%s8413_s17 + $0x1] ss:$0 sm:$0xff]  ;;  %s7299_s17 = smov [#allocation2]  }
 0xed5   :  { %7164 = vmatprep.subr.bf16.mxu0 %v7163_v55  ;;  %s5770_s10 = sshll.u32 %s7299_s17, 4  ;;  %s5771_s10 = int_to_ptr.vmem [resolvable:$true] %s5770_s10 }
 0xed6   :  { %s7270_s18 = scalar_lea.vmem %s5771_s10, 256  ;;  %p7275_p1 = scmp.lt.s32.totalorder %s5771_s10, %s5771_s10 }
 0xed7   :  { %p7271_p0 = scmp.ne.s32.totalorder %s5771_s10, %s7270_s18  ;;  %p7276_p2 = scmp.lt.s32.totalorder %s7270_s18, %s7270_s18 }
 0xed8   :  { %7166 = vmatpush3.bf16.msra.mxu0 %v7163_v55 }
 0xed9   :  { %7168 = vmatprep.subr.bf16.mxu0 %v7167_v59  ;;  %p7277_p3 = por %p7276_p2, %p7275_p1 }
 0xedb   :  { %p7278_p4 = pnand %p7277_p3, %p7271_p0 }
 0xedc   :  { %7170 = vmatpush3.bf16.msra.mxu0 %v7167_v59 }
 0xedd   :  { %7172 = vmatprep.subr.bf16.mxu0 %v7171_v24 }
 0xee0   :  { %7174 = vmatpush3.bf16.msra.mxu0 %v7171_v24 }
 0xfa6   :  { %v6845_v29 = vpop.f32.mrb[54].mxu0 }
 0xfa7   :  { %v5378_v30 = vadd.f32 %v6845_v29, %v6025_v28  ;;  %v5372_v31 = vpop.f32.mrb[55].mxu0 }
 0xfa8   :  { %v5373_v32 = vadd.f32 %v6025_v28, %v5372_v31 }
 0xfa9   :  { %v5382_v4 = vadd.f32 %v5378_v30, %v7964_v35 }
 0xfaa   :  { %v5381_v33 = vadd.f32 %v5373_v32, %v7962_v34  ;;  %v6032_v34 = vld [vmem:[%s8407_s11 + $0x20] sm:$0xff] }
 0xfab   :  { %v5390_v36 = vsel %vm180_vm0, %v5382_v4, 0.0  ;;  %v7151_v47 = vpack.c.bf16 %v6033_v46, %v6032_v34  ;;  %v5674_v34 = vld [vmem:[%s8415_s19 + $0x18] sm:$0xff] }
 0xfac   :  { %5391 = vadd.xlane.f32.xlu1 %v5390_v36  ;;  %v5387_v37 = vsel %vm180_vm0, %v5381_v33, 0.0 }
 0xfad   :  { %5388 = vadd.xlane.f32.xlu0 %v5387_v37  ;;  %7152 = vmatprep.subr.bf16.mxu1 %v7151_v47 }
 0xfae   :  { %7154 = vmatpush3.bf16.msra.mxu1 %v7151_v47 }
 0xfaf   :  { %7156 = vmatprep.subr.bf16.mxu1 %v7155_v48 }
 0xfb2   :  { %7158 = vmatpush3.bf16.msra.mxu1 %v7155_v48 }
0x1039   :  { %v5392_v38 = vpop.xlane.xlu1 %5391 }
0x103a   :  { %v5394_v40 = vmul.f32 0.03125, %v5392_v38  ;;  %v5389_v41 = vpop.xlane.xlu0 %5388 }
0x103b   :  { %v5393_v42 = vmul.f32 0.03125, %v5389_v41 }
0x103c   :  { %v5396_v1 = vsub.f32 %v5382_v4, %v5394_v40 }
0x103d   :  { %v5395_v43 = vsub.f32 %v5381_v33, %v5393_v42 }
0x103e   :  { %v5398_v62 = vmul.f32 %v5396_v1, %v5396_v1 }
0x103f   :  { %v5397_v44 = vmul.f32 %v5395_v43, %v5395_v43 }
0x1040   :  { %v5402_v35 = vsel %vm180_vm0, %v5398_v62, 0.0 }
0x1041   :  { %v5399_v45 = vsel %vm180_vm0, %v5397_v44, 0.0  ;;  %v5671_v44 = vld [vmem:[%s8415_s19] sm:$0xff] }
0x1042   :  { %5400 = vadd.xlane.f32.xlu0 %v5399_v45  ;;  %v5672_v45 = vld [vmem:[%s8415_s19 + $0x8] sm:$0xff] }
0x1043   :  { %v7175_v62 = vpack.c.bf16 %v5672_v45, %v5671_v44 }
0x1045   :  { %7176 = vmatprep.subr.bf16.mxu1 %v7175_v62 }
0x1046   :  { %5403 = vadd.xlane.f32.xlu0 %v5402_v35  ;;  %v5673_v35 = vld [vmem:[%s8415_s19 + $0x10] sm:$0xff] }
0x1047   :  { %v7179_v46 = vpack.c.bf16 %v5674_v34, %v5673_v35 }
0x10cf   :  { %v5401_v0 = vpop.xlane.xlu0 %5400 }
0x10d0   :  { %v5405_v6 = vmul.f32 0.03125, %v5401_v0 }
0x10d2   :  { %v5407_v61 = vadd.f32 1e-05, %v5405_v6 }
0x10d3   :  { %v5404_v39 = vpop.xlane.xlu0 %5403 }
0x10d4   :  { %7262 = vrsqrt.f32 %v5407_v61  ;;  %v5406_v63 = vmul.f32 0.03125, %v5404_v39  ;;  %v6056_v39 = vld [vmem:[%s8416_s20] ss:$0 sm:$0xff] }
0x10d6   :  { %v5408_v26 = vadd.f32 1e-05, %v5406_v63 }
0x10d8   :  { %7264 = vrsqrt.f32 %v5408_v26 }
0x10de   :  { %v7263_v52 = vpop.eup %7262 }
0x10df   :  { %v5411_v3 = vmul.f32 %v7263_v52, %v5395_v43 }
0x10e1   :  { %v5419_v5 = vmul.f32 %v6030_v51, %v5411_v3 }
0x10e2   :  { %v7265_v18 = vpop.eup %7264 }
0x10e3   :  { %v5412_v7 = vmul.f32 %v7265_v18, %v5396_v1  ;;  %v5427_v8 = vadd.f32 %v6031_v58, %v5419_v5 }
0x10e5   :  { %v5420_v9 = vmul.f32 %v6030_v51, %v5412_v7  ;;  %6854 = vmatprep.mubr.msk.f32.mxu1 %vm180_vm0, %v5427_v8 }
0x10e7   :  { %v5428_v10 = vadd.f32 %v6031_v58, %v5420_v9 }
0x10e9   :  { %6855 = vmatmul.mubr.msk.f32.vlgmr.msra.gmra.mrb[66].mxu1 %vm180_vm0, %v5428_v10 }
0x10ea   :  { %7178 = vmatpush3.bf16.msra.mxu1 %v7175_v62 }
0x10eb   :  { %7180 = vmatprep.subr.bf16.mxu1 %v7179_v46 }
0x10ee   :  { %7182 = vmatpush3.bf16.msra.mxu1 %v7179_v46 }
0x11bc   :  { %v6856_v14 = vpop.f32.mrb[66].mxu1 }
0x11bd   :  { %v5520_v15 = vadd.f32 %v6856_v14, %v6037_v13  ;;  %v5514_v16 = vpop.f32.mrb[67].mxu1 }
0x11be   :  { %v5515_v17 = vadd.f32 %v6037_v13, %v5514_v16 }
0x11bf   :  { %v5524_v21 = vmax.f32 %v5520_v15, 0.0 }
0x11c0   :  { %v5523_v19 = vmax.f32 %v5515_v17, 0.0 }
0x11c2   :  { %6873 = vmatprep.mubr.msk.f32.mxu0 %vm2787_vm5, %v5523_v19 }
0x11c3   :  { %6874 = vmatmul.mubr.msk.f32.vlgmr.msra.gmra.mrb[56].mxu0 %vm2787_vm5, %v5524_v21 }
0x1296   :  { %v6875_v23 = vpop.f32.mrb[56].mxu0 }
0x1297   :  { %v5620_v25 = vadd.f32 %v6875_v23, %v6049_v22  ;;  %v5614_v27 = vpop.f32.mrb[57].mxu0 }
0x1298   :  { %v5615_v28 = vadd.f32 %v6049_v22, %v5614_v27 }
0x1299   :  { %v5624_v29 = vadd.f32 %v5620_v25, %v5428_v10 }
0x129a   :  { %v5623_v30 = vadd.f32 %v5615_v28, %v5427_v8 }
0x129b   :  { %v5632_v31 = vsel %vm180_vm0, %v5624_v29, 0.0 }
0x129c   :  { %5633 = vadd.xlane.f32.xlu1 %v5632_v31  ;;  %v5629_v32 = vsel %vm180_vm0, %v5623_v30, 0.0 }
0x129d   :  { %5630 = vadd.xlane.f32.xlu0 %v5629_v32 }
0x1329   :  { %v5634_v4 = vpop.xlane.xlu1 %5633 }
0x132a   :  { %v5636_v33 = vmul.f32 0.03125, %v5634_v4  ;;  %v5631_v36 = vpop.xlane.xlu0 %5630 }
0x132b   :  { %v5635_v37 = vmul.f32 0.03125, %v5631_v36 }
0x132c   :  { %v5638_v38 = vsub.f32 %v5624_v29, %v5636_v33 }
0x132d   :  { %v5637_v40 = vsub.f32 %v5623_v30, %v5635_v37 }
0x132e   :  { %v5640_v41 = vmul.f32 %v5638_v38, %v5638_v38 }
0x132f   :  { %v5639_v42 = vmul.f32 %v5637_v40, %v5637_v40 }
0x1330   :  { %v5644_v1 = vsel %vm180_vm0, %v5640_v41, 0.0 }
0x1331   :  { %5645 = vadd.xlane.f32.xlu1 %v5644_v1  ;;  %v5641_v43 = vsel %vm180_vm0, %v5639_v42, 0.0 }
0x1332   :  { %5642 = vadd.xlane.f32.xlu0 %v5641_v43 }
0x13be   :  { %v5646_v47 = vpop.xlane.xlu1 %5645 }
0x13bf   :  { %v5648_v49 = vmul.f32 0.03125, %v5646_v47  ;;  %v5643_v20 = vpop.xlane.xlu0 %5642 }
0x13c0   :  { %v5647_v48 = vmul.f32 0.03125, %v5643_v20 }
0x13c1   :  { %v5650_v50 = vadd.f32 1e-05, %v5648_v49 }
0x13c2   :  { %v5649_v2 = vadd.f32 1e-05, %v5647_v48 }
0x13c3   :  { %7266 = vrsqrt.f32 %v5650_v50 }
0x13c4   :  { %7268 = vrsqrt.f32 %v5649_v2 }
0x13cd   :  { %v7267_v53 = vpop.eup %7266 }
0x13ce   :  { %v7269_v60 = vpop.eup %7268  ;;  %v5654_v55 = vmul.f32 %v7267_v53, %v5638_v38 }
0x13cf   :  { %v5653_v56 = vmul.f32 %v7269_v60, %v5637_v40 }
0x13d0   :  { %v5662_v59 = vmul.f32 %v6054_v54, %v5654_v55 }
0x13d1   :  { %v5661_v0 = vmul.f32 %v6054_v54, %v5653_v56 }
0x13d2   :  { %v5670_v61 = vadd.f32 %v6055_v57, %v5662_v59 }
0x13d3   :  { %v5669_v6 = vadd.f32 %v6055_v57, %v5661_v0 }
0x13d5   :  { %6884 = vmatprep.mubr.msk.f32.mxu1 %vm180_vm0, %v5669_v6 }
0x13d6   :  { %6885 = vmatmul.mubr.msk.f32.vlgmr.msra.gmra.mrb[68].mxu1 %vm180_vm0, %v5670_v61 }
0x14a9   :  { %v6886_v63 = vpop.f32.mrb[68].mxu1 }
0x14aa   :  { %v5760_v26 = vadd.f32 %v6886_v63, %v6056_v39  ;;  %v5754_v52 = vpop.f32.mrb[69].mxu1 }
0x14ab   :  { %v5755_v51 = vadd.f32 %v6056_v39, %v5754_v52 }
0x14ac   :  { %5764 = vst [vmem:[#allocation2 + $0x8] sm:$0xff] %v5760_v26 }
0x14ad   :  { %5763 = vst [vmem:[#allocation2] sm:$0xff] %v5755_v51 }
0x14ae   :  { %7281 = shalt.err (!%p7278_p4)
}
0x14af   :  { %s7282_s20 = scalar_lea.hbm %s8417_s21, 256 }
0x14b0   :  { %p7283_p5 = scmp.ne.s32.totalorder %s8417_s21, %s7282_s20  ;;  %p7286_p6 = scmp.lt.u32.totalorder %s7282_s20, %s8417_s21 }
0x14b2   :  { %p7288_p7 = pnand %p7286_p6, %p7283_p5 }
0x14b4   :  { %7291 = shalt.err (!%p7288_p7)
}
0x14b5   :  { %s7300_s28 = smov 128  }
0x14b6   :  { %5776 = dma.vmem_to_hbm [thread:$0]  %s5771_s10, 256, %s8417_s21, [#allocation3], %s7300_s28, %s7300_s28, %s7296_s24  }
0x14b7   :  { %7292 = dma.done.wait [#allocation3], 256  }
0x14b8   :  { %7293 = vsyncadd [#allocation3], 4294967040 }
0x14b9   :  { %5780 = vsyncpa [#allocation3], 1 }

</bundles_post_ra>
